<compile_context>
chip_gen: v6e
topology: v6e:2x2x1
jax: 0.10.0
libtpu: 0.0.40
codegen_flags: <defaults>
</compile_context>

<pallas_src>
import functools
import math

import jax
import jax.numpy as jnp
import numpy as np
from jax.experimental import pallas as pl
from jax.experimental.pallas import tpu as pltpu

SCALES = (1, 2, 4)   # the block kernel below is specialised to these scales
VMEM_LIMIT = 48 * 1024 * 1024   # explicit scoped-VMEM cap (safe on v5e/v6e/v7x)


# ----------------------------------------------------------------------------
# In-kernel helpers
# ----------------------------------------------------------------------------
def _gelu(x):
    # exact (erf-based) GELU, matching torch.nn.GELU(approximate='none')
    return 0.5 * x * (1.0 + jax.lax.erf(x * (1.0 / math.sqrt(2.0))))


def _layernorm(x, g, b, eps=1e-5):
    mu = jnp.mean(x, axis=-1, keepdims=True)
    var = jnp.mean(jnp.square(x - mu), axis=-1, keepdims=True)
    return (x - mu) * jax.lax.rsqrt(var + eps) * g + b


def _mm(a, b):
    # cast the activation to the weight dtype (enables bf16 MXU when the
    # prepared weights are bf16) but always accumulate in f32.
    return jnp.dot(a.astype(b.dtype), b, preferred_element_type=jnp.float32)


# ----------------------------------------------------------------------------
# Kernel 1: time conditioning
#   TimestepEmbedding MLP (once, at layer step 0) + per-layer time_mlp
#   producing (scale, shift) for ALL batch rows at once (full sublane use).
# ----------------------------------------------------------------------------
def _conditioning_kernel(emb_ref, tew1, teb1, tew2, teb2,
                         tmw1, tmb1, tmw2s, tmb2s, tmw2t, tmb2t,
                         scale_ref, shift_ref, temb_sc):
    @pl.when(pl.program_id(0) == 0)
    def _():
        h = _gelu(_mm(emb_ref[...], tew1[...]) + teb1[...])
        temb_sc[...] = _mm(h, tew2[...]) + teb2[...]

    temb = temb_sc[...]                                    # [B, C] f32
    th = _gelu(_mm(temb, tmw1[0]) + tmb1[0])               # [B, C]
    scale_ref[0] = _mm(th, tmw2s[0]) + tmb2s[0]            # [B, C]
    shift_ref[0] = _mm(th, tmw2t[0]) + tmb2t[0]


def _conditioning_forward(prep, timesteps, B, C, L):
    # sinusoidal embedding (tiny, plain JAX data prep)
    half = C // 2
    freqs = jnp.exp(-math.log(10000.0) *
                    jnp.arange(half, dtype=jnp.float32) / half)
    args = timesteps.astype(jnp.float32)[:, None] * freqs[None, :]
    emb = jnp.concatenate([jnp.cos(args), jnp.sin(args)], axis=-1)
    if C % 2:
        emb = jnp.concatenate([emb, jnp.zeros_like(emb[:, :1])], axis=-1)

    def inv(a):
        nd = a.ndim
        return pl.BlockSpec(a.shape, lambda l, _n=nd: (0,) * _n)

    def per_layer(a):
        nd = a.ndim
        return pl.BlockSpec((1,) + a.shape[1:],
                            lambda l, _n=nd - 1: (l,) + (0,) * _n)

    in_specs = ([inv(emb)]
                + [inv(prep[k]) for k in ('te_w1', 'te_b1', 'te_w2', 'te_b2')]
                + [per_layer(prep[k]) for k in
                   ('tm_w1', 'tm_b1', 'tm_w2s', 'tm_b2s', 'tm_w2t', 'tm_b2t')])

    out_specs = (pl.BlockSpec((1, B, C), lambda l: (l, 0, 0)),
                 pl.BlockSpec((1, B, C), lambda l: (l, 0, 0)))

    return pl.pallas_call(
        _conditioning_kernel,
        grid=(L,),
        in_specs=in_specs,
        out_specs=out_specs,
        out_shape=(jax.ShapeDtypeStruct((L, B, C), jnp.float32),
                   jax.ShapeDtypeStruct((L, B, C), jnp.float32)),
        scratch_shapes=[pltpu.VMEM((B, C), jnp.float32)],
        compiler_params=pltpu.CompilerParams(
            dimension_semantics=("arbitrary",),
            vmem_limit_bytes=VMEM_LIMIT),
    )(emb, prep['te_w1'], prep['te_b1'], prep['te_w2'], prep['te_b2'],
      prep['tm_w1'], prep['tm_b1'], prep['tm_w2s'], prep['tm_b2s'],
      prep['tm_w2t'], prep['tm_b2t'])


# ----------------------------------------------------------------------------
# Kernel 2: the whole DiT stack (coarse + refine) + stage fusion.
#   grid = (batch "parallel", layer "arbitrary"); the activation is carried in
#   VMEM scratch across the layer axis; output is written only at the last
#   layer step (stage-fusion MLP of coarse & refine streams).
# ----------------------------------------------------------------------------
def _dit_stack_kernel(x_ref, m2_ref, m4_ref, ts_ref, tt_ref,
                      c1w_1, c1b_1, c2w_1, c2b_1,
                      c1w_2, c1b_2, c2w_2, c2b_2,
                      c1w_4, c1b_4, c2w_4, c2b_4,
                      fw1, fb1, fw2, fb2,
                      ln1g, ln1b,
                      wqkv, bqkv, wo, bo,
                      ln2g, ln2b,
                      mw1, mb1, mw2, mb2,
                      sfw1c, sfw1r, sfb1, sfw2, sfb2,
                      o_ref, act_sc, coarse_sc, *, num_heads):
    l = pl.program_id(1)
    n_layers = pl.num_programs(1)
    n_coarse = n_layers // 2

    # layer 0 reads the block input from HBM; later layers read the carried
    # activation that lives in VMEM scratch for this batch element.
    @pl.when(l == 0)
    def _():
        act_sc[...] = x_ref[0].astype(jnp.float32)

    x = act_sc[...]                                  # [N, C] f32
    N, C = x.shape
    H = num_heads
    Dh = C // H

    # ---- per-(layer, batch) time conditioning (precomputed) -----------------
    t_scale = ts_ref[0, 0]                           # [1, C]
    t_shift = tt_ref[0, 0]

    # ---- multi-scale token extractor ----------------------------------------
    # stride-s Conv1d (+ folded eval-mode BN) + GELU + 1x1 conv.  The stride-s
    # chunking of tokens is realised with strided loads from the VMEM-resident
    # activation and row-block accumulation of the conv weight, so x is never
    # re-read from HBM and no in-kernel reshape/concat is needed.
    def conv_branch(scale, c1w, c1b, c2w, c2b):
        w1c = c1w[0]                                 # [scale*C, C]
        pre = c1b[0]                                 # [1, C] (broadcasts)
        for k in range(scale):
            xs_k = x if scale == 1 else act_sc[pl.ds(k, N // scale, scale), :]
            pre = pre + _mm(xs_k, w1c[k * C:(k + 1) * C])
        h = _gelu(pre)                               # [N/scale, C]
        return _mm(h, c2w[0]) + c2b[0]

    f1 = conv_branch(1, c1w_1, c1b_1, c2w_1, c2b_1)                     # [N, C]
    f2 = _mm(m2_ref[...], conv_branch(2, c1w_2, c1b_2, c2w_2, c2b_2))   # interp
    f4 = _mm(m4_ref[...], conv_branch(4, c1w_4, c1b_4, c2w_4, c2b_4))

    # concat([f1,f2,f4], -1) @ fuse_w1 == sum_s f_s @ fuse_w1[row block s]
    w1 = fw1[0]
    fused = _gelu(_mm(f1, w1[:C]) + _mm(f2, w1[C:2 * C]) +
                  _mm(f4, w1[2 * C:]) + fb1[0])
    x_ms = _mm(fused, fw2[0]) + fb2[0] + x                              # + res

    # ---- modulate + LayerNorm 1 (ordering follows the PyTorch module) ------
    x_cond = x_ms * (1.0 + t_scale) + t_shift
    xn1 = _layernorm(x_cond, ln1g[0], ln1b[0])

    # ---- attention: fused QKV + per-head softmax(QK)V + fused out-proj ------
    qkv = _mm(xn1, wqkv[0]) + bqkv[0]                                   # [N,3C]
    inv_sqrt_dh = 1.0 / math.sqrt(Dh)
    heads = []
    for h in range(H):
        qh = qkv[:, h * Dh:(h + 1) * Dh]
        kh = qkv[:, C + h * Dh:C + (h + 1) * Dh]
        vh = qkv[:, 2 * C + h * Dh:2 * C + (h + 1) * Dh]
        s = jax.lax.dot_general(qh, kh, (((1,), (1,)), ((), ())),
                                preferred_element_type=jnp.float32)
        s = s * inv_sqrt_dh
        s = s - jnp.max(s, axis=-1, keepdims=True)
        p = jnp.exp(s)
        p = p * pl.reciprocal(jnp.sum(p, axis=-1, keepdims=True), approx=True)
        heads.append(_mm(p, vh))                                        # [N,Dh]
    attn_cat = jnp.concatenate(heads, axis=-1)                          # [N, C]
    attn_out = _mm(attn_cat, wo[0]) + bo[0]
    x_attn = x + attn_out                    # residual adds the BLOCK INPUT

    # ---- LayerNorm 2 + MLP ----------------------------------------------------
    xn2 = _layernorm(x_attn, ln2g[0], ln2b[0])
    mh = _gelu(_mm(xn2, mw1[0]) + mb1[0])
    new_x = x_attn + _mm(mh, mw2[0]) + mb2[0]

    act_sc[...] = new_x                      # carry to next layer (VMEM only)

    @pl.when(l == n_coarse - 1)
    def _():
        coarse_sc[...] = new_x               # snapshot coarse-stage output

    @pl.when(l == n_layers - 1)
    def _():
        # stage fusion: Linear(cat([coarse, refine])) -> GELU -> Linear,
        # concat-free via row-block split of sf_w1.
        hfuse = _gelu(_mm(coarse_sc[...], sfw1c[...]) +
                      _mm(new_x, sfw1r[...]) + sfb1[...])
        o_ref[0] = (_mm(hfuse, sfw2[...]) + sfb2[...]).astype(o_ref.dtype)


def _dit_stack_forward(prep, x, t_scale4, t_shift4, m2, m4, num_heads):
    B, N, C = x.shape
    L = prep['tm_w1'].shape[0]

    def batched_x(a):
        return pl.BlockSpec((1,) + a.shape[1:], lambda b, l: (b, 0, 0))

    def inv(a):
        nd = a.ndim
        return pl.BlockSpec(a.shape, lambda b, l, _n=nd: (0,) * _n)

    def per_layer(a):
        nd = a.ndim
        return pl.BlockSpec((1,) + a.shape[1:],
                            lambda b, l, _n=nd - 1: (l,) + (0,) * _n)

    cond_spec = lambda: pl.BlockSpec((1, 1, 1, C), lambda b, l: (l, b, 0, 0))

    layer_keys = ('c1w_1', 'c1b_1', 'c2w_1', 'c2b_1',
                  'c1w_2', 'c1b_2', 'c2w_2', 'c2b_2',
                  'c1w_4', 'c1b_4', 'c2w_4', 'c2b_4',
                  'fw1', 'fb1', 'fw2', 'fb2',
                  'ln1g', 'ln1b',
                  'wqkv', 'bqkv', 'wo', 'bo',
                  'ln2g', 'ln2b',
                  'mw1', 'mb1', 'mw2', 'mb2')
    fusion_keys = ('sf_w1c', 'sf_w1r', 'sf_b1', 'sf_w2', 'sf_b2')

    weights = [prep[k] for k in layer_keys]
    fusion = [prep[k] for k in fusion_keys]

    in_specs = ([batched_x(x), inv(m2), inv(m4), cond_spec(), cond_spec()]
                + [per_layer(w) for w in weights]
                + [inv(w) for w in fusion])

    return pl.pallas_call(
        functools.partial(_dit_stack_kernel, num_heads=num_heads),
        grid=(B, L),
        in_specs=in_specs,
        out_specs=pl.BlockSpec((1, N, C), lambda b, l: (b, 0, 0)),
        out_shape=jax.ShapeDtypeStruct((B, N, C), jnp.float32),
        scratch_shapes=[pltpu.VMEM((N, C), jnp.float32),   # running activation
                        pltpu.VMEM((N, C), jnp.float32)],  # coarse snapshot
        compiler_params=pltpu.CompilerParams(
            dimension_semantics=("parallel", "arbitrary"),
            vmem_limit_bytes=VMEM_LIMIT),
    )(x, m2, m4, t_scale4, t_shift4, *weights, *fusion)


# ----------------------------------------------------------------------------
# Jitted forward: 2 pallas_calls total (conditioning + full DiT stack).
# ----------------------------------------------------------------------------
@functools.partial(jax.jit, static_argnames=('num_heads',))
def two_stage_diffusion_forward(prep, x, timesteps, m2, m4, num_heads):
    B, N, C = x.shape
    L = prep['tm_w1'].shape[0]

    t_scale, t_shift = _conditioning_forward(prep, timesteps, B, C, L)
    # metadata-only reshape so the main kernel can block per (layer, batch)
    # with fully static (1,1,1,C) blocks.
    t_scale4 = t_scale.reshape(L, B, 1, C)
    t_shift4 = t_shift.reshape(L, B, 1, C)

    return _dit_stack_forward(prep, x, t_scale4, t_shift4, m2, m4, num_heads)


# ----------------------------------------------------------------------------
# Glue (plain JAX / numpy)
# ----------------------------------------------------------------------------
def build_interp_matrix(n_out, n_in):
    """Matches F.interpolate(mode='linear', align_corners=False)."""
    M = np.zeros((n_out, n_in), dtype=np.float32)
    ratio = n_in / n_out
    for i in range(n_out):
        src = max((i + 0.5) * ratio - 0.5, 0.0)
        i0 = min(int(np.floor(src)), n_in - 1)
        i1 = min(i0 + 1, n_in - 1)
        w1 = src - i0
        M[i, i0] += 1.0 - w1
        M[i, i1] += w1
    return jnp.asarray(M)


# ----------------------------------------------------------------------------
# One-time parameter preparation (outside the jitted forward)
# ----------------------------------------------------------------------------
def prepare_params(params, compute_dtype=jnp.float32):
    """Stack per-layer weights along a leading layer dim, reshape biases,
    split tm_w2 / sf_w1 into column/row blocks.  Matmul weights are stored in
    `compute_dtype` (pass jnp.bfloat16 on v6e/v7x); biases & LN params stay
    f32 (accumulation and statistics are f32 in-kernel)."""
    blocks = list(params['coarse']) + list(params['refine'])
    C = params['sf_w2'].shape[0]
    wd, bd = compute_dtype, jnp.float32

    def w_stack(fn):
        return jnp.stack([fn(p) for p in blocks]).astype(wd)

    def b_stack(fn):
        return jnp.stack([fn(p).reshape(1, -1) for p in blocks]).astype(bd)

    prep = {
        # TimestepEmbedding MLP
        'te_w1': params['time_emb']['w1'].astype(wd),
        'te_b1': params['time_emb']['b1'].reshape(1, -1).astype(bd),
        'te_w2': params['time_emb']['w2'].astype(wd),
        'te_b2': params['time_emb']['b2'].reshape(1, -1).astype(bd),
        # per-layer time_mlp; layer-2 split into (scale | shift) halves
        'tm_w1': w_stack(lambda p: p['tm_w1']),
        'tm_b1': b_stack(lambda p: p['tm_b1']),
        'tm_w2s': w_stack(lambda p: p['tm_w2'][:, :C]),
        'tm_b2s': b_stack(lambda p: p['tm_b2'][:C]),
        'tm_w2t': w_stack(lambda p: p['tm_w2'][:, C:]),
        'tm_b2t': b_stack(lambda p: p['tm_b2'][C:]),
        # multi-scale fusion
        'fw1': w_stack(lambda p: p['ms']['fuse_w1']),
        'fb1': b_stack(lambda p: p['ms']['fuse_b1']),
        'fw2': w_stack(lambda p: p['ms']['fuse_w2']),
        'fb2': b_stack(lambda p: p['ms']['fuse_b2']),
        # LayerNorms
        'ln1g': b_stack(lambda p: p['ln1_g']),
        'ln1b': b_stack(lambda p: p['ln1_b']),
        'ln2g': b_stack(lambda p: p['ln2_g']),
        'ln2b': b_stack(lambda p: p['ln2_b']),
        # attention (2D lane-dense layouts; heads are split in-kernel)
        'wqkv': w_stack(lambda p: p['attn_wqkv']),
        'bqkv': b_stack(lambda p: p['attn_bqkv']),
        'wo': w_stack(lambda p: p['attn_wo']),
        'bo': b_stack(lambda p: p['attn_bo']),
        # MLP
        'mw1': w_stack(lambda p: p['mlp_w1']),
        'mb1': b_stack(lambda p: p['mlp_b1']),
        'mw2': w_stack(lambda p: p['mlp_w2']),
        'mb2': b_stack(lambda p: p['mlp_b2']),
        # stage fusion; layer-1 split into (coarse | refine) row blocks
        'sf_w1c': params['sf_w1'][:C].astype(wd),
        'sf_w1r': params['sf_w1'][C:].astype(wd),
        'sf_b1': params['sf_b1'].reshape(1, -1).astype(bd),
        'sf_w2': params['sf_w2'].astype(wd),
        'sf_b2': params['sf_b2'].reshape(1, -1).astype(bd),
    }
    for i, s in enumerate(SCALES):
        prep[f'c1w_{s}'] = w_stack(lambda p, i=i: p['ms']['conv1_w'][i])
        prep[f'c1b_{s}'] = b_stack(lambda p, i=i: p['ms']['conv1_b'][i])
        prep[f'c2w_{s}'] = w_stack(lambda p, i=i: p['ms']['conv2_w'][i])
        prep[f'c2b_{s}'] = b_stack(lambda p, i=i: p['ms']['conv2_b'][i])
    return prep


# ----------------------------------------------------------------------------
# Deterministic synthetic parameter init (per-block, PyTorch-shaped)
# ----------------------------------------------------------------------------
def _init_dit_block(key, C):
    keys = jax.random.split(key, 48)
    it = iter(keys)

    def nk():
        return next(it)

    def lin(fi, fo):
        return (jax.random.normal(nk(), (fi, fo), jnp.float32) * 0.02,
                jax.random.normal(nk(), (fo,), jnp.float32) * 0.02)

    p = {}
    p['tm_w1'], p['tm_b1'] = lin(C, C)
    p['tm_w2'], p['tm_b2'] = lin(C, 2 * C)
    p['ln1_g'] = 1.0 + 0.02 * jax.random.normal(nk(), (C,), jnp.float32)
    p['ln1_b'] = 0.02 * jax.random.normal(nk(), (C,), jnp.float32)
    p['attn_wqkv'], p['attn_bqkv'] = lin(C, 3 * C)
    p['attn_wo'], p['attn_bo'] = lin(C, C)
    p['ln2_g'] = 1.0 + 0.02 * jax.random.normal(nk(), (C,), jnp.float32)
    p['ln2_b'] = 0.02 * jax.random.normal(nk(), (C,), jnp.float32)
    p['mlp_w1'], p['mlp_b1'] = lin(C, 4 * C)
    p['mlp_w2'], p['mlp_b2'] = lin(4 * C, C)

    ms = {'conv1_w': [], 'conv1_b': [], 'conv2_w': [], 'conv2_b': []}
    for s in SCALES:
        w1, b1 = lin(s * C, C)
        gamma = 1.0 + 0.02 * jax.random.normal(nk(), (C,), jnp.float32)
        beta = 0.02 * jax.random.normal(nk(), (C,), jnp.float32)
        # fold eval-mode BatchNorm1d (running_mean=0, running_var=1, eps=1e-5)
        g = gamma / jnp.sqrt(1.0 + 1e-5)
        ms['conv1_w'].append(w1 * g[None, :])
        ms['conv1_b'].append(b1 * g + beta)
        w2, b2 = lin(C, C)
        ms['conv2_w'].append(w2)
        ms['conv2_b'].append(b2)
    ms['fuse_w1'], ms['fuse_b1'] = lin(len(SCALES) * C, C)
    ms['fuse_w2'], ms['fuse_b2'] = lin(C, C)
    p['ms'] = ms
    return p


def init_params(key, C, num_layers=4):
    k_te, k_sf, k_blk = jax.random.split(key, 3)

    def lin(k, fi, fo):
        kw, kb = jax.random.split(k)
        return (jax.random.normal(kw, (fi, fo), jnp.float32) * 0.02,
                jax.random.normal(kb, (fo,), jnp.float32) * 0.02)

    te1, te2 = jax.random.split(k_te)
    tw1, tb1 = lin(te1, C, 4 * C)
    tw2, tb2 = lin(te2, 4 * C, C)
    sf1, sf2 = jax.random.split(k_sf)
    sw1, sb1 = lin(sf1, 2 * C, C)
    sw2, sb2 = lin(sf2, C, C)

    n_half = num_layers // 2
    block_keys = jax.random.split(k_blk, 2 * n_half)
    coarse = [_init_dit_block(block_keys[i], C) for i in range(n_half)]
    refine = [_init_dit_block(block_keys[n_half + i], C) for i in range(n_half)]

    return {
        'time_emb': {'w1': tw1, 'b1': tb1, 'w2': tw2, 'b2': tb2},
        'coarse': coarse,
        'refine': refine,
        'sf_w1': sw1, 'sf_b1': sb1, 'sf_w2': sw2, 'sf_b2': sb2,
    }


# ----------------------------------------------------------------------------
if __name__ == "__main__":
    B, N, C = 2, 8, 32
    num_layers, num_heads = 4, 8

    key = jax.random.PRNGKey(0)
    kp, kx = jax.random.split(key)
    params = init_params(kp, C, num_layers)
    # One-time parameter prep (outside jit).  Pass jnp.bfloat16 on v6e/v7x to
    # run the matmuls in bf16 with f32 accumulation.
    prep = prepare_params(params, compute_dtype=jnp.float32)

    x = jax.random.normal(kx, (B, N, C), jnp.float32)
    timesteps = jnp.array([17, 503], dtype=jnp.int32)

    m2 = build_interp_matrix(N, N // 2)
    m4 = build_interp_matrix(N, N // 4)

    out = two_stage_diffusion_forward(prep, x, timesteps, m2, m4,
                                      num_heads=num_heads)
    out = jax.block_until_ready(out)
    assert out.shape == (B, N, C) and out.dtype == jnp.float32
    assert bool(jnp.all(jnp.isfinite(out)))
    print("KERNEL_OK")
</pallas_src>

<mosaic_0001>
module attributes {stable_mosaic.version = 11 : i64} {
  func.func @_conditioning_kernel(%arg0: i32, %arg1: memref<2x32xf32, #tpu.memory_space<vmem>>, %arg2: memref<32x128xf32, #tpu.memory_space<vmem>>, %arg3: memref<1x128xf32, #tpu.memory_space<vmem>>, %arg4: memref<128x32xf32, #tpu.memory_space<vmem>>, %arg5: memref<1x32xf32, #tpu.memory_space<vmem>>, %arg6: memref<1x32x32xf32, #tpu.memory_space<vmem>>, %arg7: memref<1x1x32xf32, #tpu.memory_space<vmem>>, %arg8: memref<1x32x32xf32, #tpu.memory_space<vmem>>, %arg9: memref<1x1x32xf32, #tpu.memory_space<vmem>>, %arg10: memref<1x32x32xf32, #tpu.memory_space<vmem>>, %arg11: memref<1x1x32xf32, #tpu.memory_space<vmem>>, %arg12: memref<1x2x32xf32, #tpu.memory_space<vmem>>, %arg13: memref<1x2x32xf32, #tpu.memory_space<vmem>>, %arg14: memref<2x32xf32, #tpu.memory_space<vmem>>) attributes {dimension_semantics = [#tpu.dimension_semantics<arbitrary>], iteration_bounds = array<i64: 4>, scalar_prefetch = 0 : i64, scratch_operands = 1 : i64, tpu.core_type = #tpu.core_type<tc>, window_params = [{pipeline_mode = #tpu.pipeline_mode<synchronous>, transform_indices = @transform_0, window_bounds = array<i64: 2, 32>}, {pipeline_mode = #tpu.pipeline_mode<synchronous>, transform_indices = @transform_1, window_bounds = array<i64: 32, 128>}, {pipeline_mode = #tpu.pipeline_mode<synchronous>, transform_indices = @transform_2, window_bounds = array<i64: 1, 128>}, {pipeline_mode = #tpu.pipeline_mode<synchronous>, transform_indices = @transform_3, window_bounds = array<i64: 128, 32>}, {pipeline_mode = #tpu.pipeline_mode<synchronous>, transform_indices = @transform_4, window_bounds = array<i64: 1, 32>}, {transform_indices = @transform_5, window_bounds = array<i64: 1, 32, 32>}, {transform_indices = @transform_6, window_bounds = array<i64: 1, 1, 32>}, {transform_indices = @transform_7, window_bounds = array<i64: 1, 32, 32>}, {transform_indices = @transform_8, window_bounds = array<i64: 1, 1, 32>}, {transform_indices = @transform_9, window_bounds = array<i64: 1, 32, 32>}, {transform_indices = @transform_10, window_bounds = array<i64: 1, 1, 32>}, {transform_indices = @transform_11, window_bounds = array<i64: 1, 2, 32>}, {transform_indices = @transform_12, window_bounds = array<i64: 1, 2, 32>}]} {
    %c0_i32 = arith.constant 0 : i32
    %0 = arith.cmpi eq, %arg0, %c0_i32 : i32
    %1 = arith.extui %0 : i1 to i32
    %c0_i32_0 = arith.constant 0 : i32
    %2 = arith.cmpi ne, %1, %c0_i32_0 : i32
    scf.if %2 {
      %c0_31 = arith.constant 0 : index
      %c0_32 = arith.constant 0 : index
      %39 = vector.load %arg1[%c0_31, %c0_32] : memref<2x32xf32, #tpu.memory_space<vmem>>, vector<2x32xf32>
      %c0_33 = arith.constant 0 : index
      %c0_34 = arith.constant 0 : index
      %40 = vector.load %arg2[%c0_33, %c0_34] : memref<32x128xf32, #tpu.memory_space<vmem>>, vector<32x128xf32>
      %cst_35 = arith.constant dense<0.000000e+00> : vector<2x128xf32>
      %41 = tpu.matmul %39, %40, %cst_35 {dimension_numbers = #tpu.dot_dimension_numbers<[1], [0], [0], [1], [0, 0, 1, 1], [], []>} : vector<2x32xf32>, vector<32x128xf32>, vector<2x128xf32> -> vector<2x128xf32>
      %c0_36 = arith.constant 0 : index
      %c0_37 = arith.constant 0 : index
      %42 = vector.load %arg3[%c0_36, %c0_37] : memref<1x128xf32, #tpu.memory_space<vmem>>, vector<1x128xf32>
      %43 = vector.broadcast %42 : vector<1x128xf32> to vector<2x128xf32>
      %44 = arith.addf %41, %43 : vector<2x128xf32>
      %cst_38 = arith.constant 5.000000e-01 : f32
      %45 = vector.broadcast %cst_38 : f32 to vector<2x128xf32>
      %46 = arith.mulf %45, %44 : vector<2x128xf32>
      %cst_39 = arith.constant 0.707106769 : f32
      %47 = vector.broadcast %cst_39 : f32 to vector<2x128xf32>
      %48 = arith.mulf %44, %47 : vector<2x128xf32>
      %49 = math.erf %48 : vector<2x128xf32>
      %cst_40 = arith.constant 1.000000e+00 : f32
      %50 = vector.broadcast %cst_40 : f32 to vector<2x128xf32>
      %51 = arith.addf %50, %49 : vector<2x128xf32>
      %52 = arith.mulf %46, %51 : vector<2x128xf32>
      %c0_41 = arith.constant 0 : index
      %c0_42 = arith.constant 0 : index
      %53 = vector.load %arg4[%c0_41, %c0_42] : memref<128x32xf32, #tpu.memory_space<vmem>>, vector<128x32xf32>
      %cst_43 = arith.constant dense<0.000000e+00> : vector<2x32xf32>
      %54 = tpu.matmul %52, %53, %cst_43 {dimension_numbers = #tpu.dot_dimension_numbers<[1], [0], [0], [1], [0, 0, 1, 1], [], []>} : vector<2x128xf32>, vector<128x32xf32>, vector<2x32xf32> -> vector<2x32xf32>
      %c0_44 = arith.constant 0 : index
      %c0_45 = arith.constant 0 : index
      %55 = vector.load %arg5[%c0_44, %c0_45] : memref<1x32xf32, #tpu.memory_space<vmem>>, vector<1x32xf32>
      %56 = vector.broadcast %55 : vector<1x32xf32> to vector<2x32xf32>
      %57 = arith.addf %54, %56 : vector<2x32xf32>
      %c0_46 = arith.constant 0 : index
      %c0_47 = arith.constant 0 : index
      %58 = vector.load %arg14[%c0_46, %c0_47] : memref<2x32xf32, #tpu.memory_space<vmem>>, vector<2x32xf32>
      tpu.vector_store %arg14[%c0_46, %c0_47], %57 {strides = array<i32>} : memref<2x32xf32, #tpu.memory_space<vmem>>, vector<2x32xf32>,
    } else {
    }
    %c0 = arith.constant 0 : index
    %c0_1 = arith.constant 0 : index
    %3 = vector.load %arg14[%c0, %c0_1] : memref<2x32xf32, #tpu.memory_space<vmem>>, vector<2x32xf32>
    %c0_2 = arith.constant 0 : index
    %c0_3 = arith.constant 0 : index
    %c0_4 = arith.constant 0 : index
    %4 = vector.load %arg6[%c0_2, %c0_3, %c0_4] : memref<1x32x32xf32, #tpu.memory_space<vmem>>, vector<1x32x32xf32>
    %5 = vector.shape_cast %4 : vector<1x32x32xf32> to vector<32x32xf32>
    %cst = arith.constant dense<0.000000e+00> : vector<2x32xf32>
    %6 = tpu.matmul %3, %5, %cst {dimension_numbers = #tpu.dot_dimension_numbers<[1], [0], [0], [1], [0, 0, 1, 1], [], []>} : vector<2x32xf32>, vector<32x32xf32>, vector<2x32xf32> -> vector<2x32xf32>
    %c0_5 = arith.constant 0 : index
    %c0_6 = arith.constant 0 : index
    %c0_7 = arith.constant 0 : index
    %7 = vector.load %arg7[%c0_5, %c0_6, %c0_7] : memref<1x1x32xf32, #tpu.memory_space<vmem>>, vector<1x1x32xf32>
    %8 = vector.shape_cast %7 : vector<1x1x32xf32> to vector<1x32xf32>
    %9 = vector.broadcast %8 : vector<1x32xf32> to vector<2x32xf32>
    %10 = arith.addf %6, %9 : vector<2x32xf32>
    %cst_8 = arith.constant 5.000000e-01 : f32
    %11 = vector.broadcast %cst_8 : f32 to vector<2x32xf32>
    %12 = arith.mulf %11, %10 : vector<2x32xf32>
    %cst_9 = arith.constant 0.707106769 : f32
    %13 = vector.broadcast %cst_9 : f32 to vector<2x32xf32>
    %14 = arith.mulf %10, %13 : vector<2x32xf32>
    %15 = math.erf %14 : vector<2x32xf32>
    %cst_10 = arith.constant 1.000000e+00 : f32
    %16 = vector.broadcast %cst_10 : f32 to vector<2x32xf32>
    %17 = arith.addf %16, %15 : vector<2x32xf32>
    %18 = arith.mulf %12, %17 : vector<2x32xf32>
    %c0_11 = arith.constant 0 : index
    %c0_12 = arith.constant 0 : index
    %c0_13 = arith.constant 0 : index
    %19 = vector.load %arg8[%c0_11, %c0_12, %c0_13] : memref<1x32x32xf32, #tpu.memory_space<vmem>>, vector<1x32x32xf32>
    %20 = vector.shape_cast %19 : vector<1x32x32xf32> to vector<32x32xf32>
    %cst_14 = arith.constant dense<0.000000e+00> : vector<2x32xf32>
    %21 = tpu.matmul %18, %20, %cst_14 {dimension_numbers = #tpu.dot_dimension_numbers<[1], [0], [0], [1], [0, 0, 1, 1], [], []>} : vector<2x32xf32>, vector<32x32xf32>, vector<2x32xf32> -> vector<2x32xf32>
    %c0_15 = arith.constant 0 : index
    %c0_16 = arith.constant 0 : index
    %c0_17 = arith.constant 0 : index
    %22 = vector.load %arg9[%c0_15, %c0_16, %c0_17] : memref<1x1x32xf32, #tpu.memory_space<vmem>>, vector<1x1x32xf32>
    %23 = vector.shape_cast %22 : vector<1x1x32xf32> to vector<1x32xf32>
    %24 = vector.broadcast %23 : vector<1x32xf32> to vector<2x32xf32>
    %25 = arith.addf %21, %24 : vector<2x32xf32>
    %c0_18 = arith.constant 0 : index
    %c0_19 = arith.constant 0 : index
    %c0_20 = arith.constant 0 : index
    %26 = vector.load %arg12[%c0_18, %c0_19, %c0_20] : memref<1x2x32xf32, #tpu.memory_space<vmem>>, vector<1x2x32xf32>
    %27 = vector.shape_cast %26 : vector<1x2x32xf32> to vector<2x32xf32>
    %28 = vector.shape_cast %25 : vector<2x32xf32> to vector<1x2x32xf32>
    tpu.vector_store %arg12[%c0_18, %c0_19, %c0_20], %28 {strides = array<i32>} : memref<1x2x32xf32, #tpu.memory_space<vmem>>, vector<1x2x32xf32>,
    %c0_21 = arith.constant 0 : index
    %c0_22 = arith.constant 0 : index
    %c0_23 = arith.constant 0 : index
    %29 = vector.load %arg10[%c0_21, %c0_22, %c0_23] : memref<1x32x32xf32, #tpu.memory_space<vmem>>, vector<1x32x32xf32>
    %30 = vector.shape_cast %29 : vector<1x32x32xf32> to vector<32x32xf32>
    %cst_24 = arith.constant dense<0.000000e+00> : vector<2x32xf32>
    %31 = tpu.matmul %18, %30, %cst_24 {dimension_numbers = #tpu.dot_dimension_numbers<[1], [0], [0], [1], [0, 0, 1, 1], [], []>} : vector<2x32xf32>, vector<32x32xf32>, vector<2x32xf32> -> vector<2x32xf32>
    %c0_25 = arith.constant 0 : index
    %c0_26 = arith.constant 0 : index
    %c0_27 = arith.constant 0 : index
    %32 = vector.load %arg11[%c0_25, %c0_26, %c0_27] : memref<1x1x32xf32, #tpu.memory_space<vmem>>, vector<1x1x32xf32>
    %33 = vector.shape_cast %32 : vector<1x1x32xf32> to vector<1x32xf32>
    %34 = vector.broadcast %33 : vector<1x32xf32> to vector<2x32xf32>
    %35 = arith.addf %31, %34 : vector<2x32xf32>
    %c0_28 = arith.constant 0 : index
    %c0_29 = arith.constant 0 : index
    %c0_30 = arith.constant 0 : index
    %36 = vector.load %arg13[%c0_28, %c0_29, %c0_30] : memref<1x2x32xf32, #tpu.memory_space<vmem>>, vector<1x2x32xf32>
    %37 = vector.shape_cast %36 : vector<1x2x32xf32> to vector<2x32xf32>
    %38 = vector.shape_cast %35 : vector<2x32xf32> to vector<1x2x32xf32>
    tpu.vector_store %arg13[%c0_28, %c0_29, %c0_30], %38 {strides = array<i32>} : memref<1x2x32xf32, #tpu.memory_space<vmem>>, vector<1x2x32xf32>,
    return
  }
  func.func @transform_0(%arg0: i32) -> (i32, i32) {
    %c0_i32 = arith.constant 0 : i32
    %c0_i32_0 = arith.constant 0 : i32
    %c0_i32_1 = arith.constant 0 : i32
    return %c0_i32, %c0_i32_0 : i32, i32
  }
  func.func @transform_1(%arg0: i32) -> (i32, i32) {
    %c0_i32 = arith.constant 0 : i32
    %c0_i32_0 = arith.constant 0 : i32
    %c0_i32_1 = arith.constant 0 : i32
    return %c0_i32, %c0_i32_0 : i32, i32
  }
  func.func @transform_2(%arg0: i32) -> (i32, i32) {
    %c0_i32 = arith.constant 0 : i32
    %c0_i32_0 = arith.constant 0 : i32
    %c0_i32_1 = arith.constant 0 : i32
    return %c0_i32, %c0_i32_0 : i32, i32
  }
  func.func @transform_3(%arg0: i32) -> (i32, i32) {
    %c0_i32 = arith.constant 0 : i32
    %c0_i32_0 = arith.constant 0 : i32
    %c0_i32_1 = arith.constant 0 : i32
    return %c0_i32, %c0_i32_0 : i32, i32
  }
  func.func @transform_4(%arg0: i32) -> (i32, i32) {
    %c0_i32 = arith.constant 0 : i32
    %c0_i32_0 = arith.constant 0 : i32
    %c0_i32_1 = arith.constant 0 : i32
    return %c0_i32, %c0_i32_0 : i32, i32
  }
  func.func @transform_5(%arg0: i32) -> (i32, i32, i32) {
    %c0_i32 = arith.constant 0 : i32
    %c0_i32_0 = arith.constant 0 : i32
    %c0_i32_1 = arith.constant 0 : i32
    return %arg0, %c0_i32, %c0_i32_0 : i32, i32, i32
  }
  func.func @transform_6(%arg0: i32) -> (i32, i32, i32) {
    %c0_i32 = arith.constant 0 : i32
    %c0_i32_0 = arith.constant 0 : i32
    %c0_i32_1 = arith.constant 0 : i32
    return %arg0, %c0_i32, %c0_i32_0 : i32, i32, i32
  }
  func.func @transform_7(%arg0: i32) -> (i32, i32, i32) {
    %c0_i32 = arith.constant 0 : i32
    %c0_i32_0 = arith.constant 0 : i32
    %c0_i32_1 = arith.constant 0 : i32
    return %arg0, %c0_i32, %c0_i32_0 : i32, i32, i32
  }
  func.func @transform_8(%arg0: i32) -> (i32, i32, i32) {
    %c0_i32 = arith.constant 0 : i32
    %c0_i32_0 = arith.constant 0 : i32
    %c0_i32_1 = arith.constant 0 : i32
    return %arg0, %c0_i32, %c0_i32_0 : i32, i32, i32
  }
  func.func @transform_9(%arg0: i32) -> (i32, i32, i32) {
    %c0_i32 = arith.constant 0 : i32
    %c0_i32_0 = arith.constant 0 : i32
    %c0_i32_1 = arith.constant 0 : i32
    return %arg0, %c0_i32, %c0_i32_0 : i32, i32, i32
  }
  func.func @transform_10(%arg0: i32) -> (i32, i32, i32) {
    %c0_i32 = arith.constant 0 : i32
    %c0_i32_0 = arith.constant 0 : i32
    %c0_i32_1 = arith.constant 0 : i32
    return %arg0, %c0_i32, %c0_i32_0 : i32, i32, i32
  }
  func.func @transform_11(%arg0: i32) -> (i32, i32, i32) {
    %c0_i32 = arith.constant 0 : i32
    %c0_i32_0 = arith.constant 0 : i32
    %c0_i32_1 = arith.constant 0 : i32
    return %arg0, %c0_i32, %c0_i32_0 : i32, i32, i32
  }
  func.func @transform_12(%arg0: i32) -> (i32, i32, i32) {
    %c0_i32 = arith.constant 0 : i32
    %c0_i32_0 = arith.constant 0 : i32
    %c0_i32_1 = arith.constant 0 : i32
    return %arg0, %c0_i32, %c0_i32_0 : i32, i32, i32
  }
}

module attributes {stable_mosaic.version = 11 : i64} {
  func.func @_dit_stack_kernel(%arg0: i32, %arg1: i32, %arg2: memref<1x8x32xf32, #tpu.memory_space<vmem>>, %arg3: memref<8x4xf32, #tpu.memory_space<vmem>>, %arg4: memref<8x2xf32, #tpu.memory_space<vmem>>, %arg5: memref<1x1x1x32xf32, #tpu.memory_space<vmem>>, %arg6: memref<1x1x1x32xf32, #tpu.memory_space<vmem>>, %arg7: memref<1x32x32xf32, #tpu.memory_space<vmem>>, %arg8: memref<1x1x32xf32, #tpu.memory_space<vmem>>, %arg9: memref<1x32x32xf32, #tpu.memory_space<vmem>>, %arg10: memref<1x1x32xf32, #tpu.memory_space<vmem>>, %arg11: memref<1x64x32xf32, #tpu.memory_space<vmem>>, %arg12: memref<1x1x32xf32, #tpu.memory_space<vmem>>, %arg13: memref<1x32x32xf32, #tpu.memory_space<vmem>>, %arg14: memref<1x1x32xf32, #tpu.memory_space<vmem>>, %arg15: memref<1x128x32xf32, #tpu.memory_space<vmem>>, %arg16: memref<1x1x32xf32, #tpu.memory_space<vmem>>, %arg17: memref<1x32x32xf32, #tpu.memory_space<vmem>>, %arg18: memref<1x1x32xf32, #tpu.memory_space<vmem>>, %arg19: memref<1x96x32xf32, #tpu.memory_space<vmem>>, %arg20: memref<1x1x32xf32, #tpu.memory_space<vmem>>, %arg21: memref<1x32x32xf32, #tpu.memory_space<vmem>>, %arg22: memref<1x1x32xf32, #tpu.memory_space<vmem>>, %arg23: memref<1x1x32xf32, #tpu.memory_space<vmem>>, %arg24: memref<1x1x32xf32, #tpu.memory_space<vmem>>, %arg25: memref<1x32x96xf32, #tpu.memory_space<vmem>>, %arg26: memref<1x1x96xf32, #tpu.memory_space<vmem>>, %arg27: memref<1x32x32xf32, #tpu.memory_space<vmem>>, %arg28: memref<1x1x32xf32, #tpu.memory_space<vmem>>, %arg29: memref<1x1x32xf32, #tpu.memory_space<vmem>>, %arg30: memref<1x1x32xf32, #tpu.memory_space<vmem>>, %arg31: memref<1x32x128xf32, #tpu.memory_space<vmem>>, %arg32: memref<1x1x128xf32, #tpu.memory_space<vmem>>, %arg33: memref<1x128x32xf32, #tpu.memory_space<vmem>>, %arg34: memref<1x1x32xf32, #tpu.memory_space<vmem>>, %arg35: memref<32x32xf32, #tpu.memory_space<vmem>>, %arg36: memref<32x32xf32, #tpu.memory_space<vmem>>, %arg37: memref<1x32xf32, #tpu.memory_space<vmem>>, %arg38: memref<32x32xf32, #tpu.memory_space<vmem>>, %arg39: memref<1x32xf32, #tpu.memory_space<vmem>>, %arg40: memref<1x8x32xf32, #tpu.memory_space<vmem>>, %arg41: memref<8x32xf32, #tpu.memory_space<vmem>>, %arg42: memref<8x32xf32, #tpu.memory_space<vmem>>) attributes {dimension_semantics = [#tpu.dimension_semantics<parallel>, #tpu.dimension_semantics<arbitrary>], iteration_bounds = array<i64: 2, 4>, scalar_prefetch = 0 : i64, scratch_operands = 2 : i64, tpu.core_type = #tpu.core_type<tc>, window_params = [{transform_indices = @transform_0, window_bounds = array<i64: 1, 8, 32>}, {pipeline_mode = #tpu.pipeline_mode<synchronous>, transform_indices = @transform_1, window_bounds = array<i64: 8, 4>}, {pipeline_mode = #tpu.pipeline_mode<synchronous>, transform_indices = @transform_2, window_bounds = array<i64: 8, 2>}, {transform_indices = @transform_3, window_bounds = array<i64: 1, 1, 1, 32>}, {transform_indices = @transform_4, window_bounds = array<i64: 1, 1, 1, 32>}, {transform_indices = @transform_5, window_bounds = array<i64: 1, 32, 32>}, {transform_indices = @transform_6, window_bounds = array<i64: 1, 1, 32>}, {transform_indices = @transform_7, window_bounds = array<i64: 1, 32, 32>}, {transform_indices = @transform_8, window_bounds = array<i64: 1, 1, 32>}, {transform_indices = @transform_9, window_bounds = array<i64: 1, 64, 32>}, {transform_indices = @transform_10, window_bounds = array<i64: 1, 1, 32>}, {transform_indices = @transform_11, window_bounds = array<i64: 1, 32, 32>}, {transform_indices = @transform_12, window_bounds = array<i64: 1, 1, 32>}, {transform_indices = @transform_13, window_bounds = array<i64: 1, 128, 32>}, {transform_indices = @transform_14, window_bounds = array<i64: 1, 1, 32>}, {transform_indices = @transform_15, window_bounds = array<i64: 1, 32, 32>}, {transform_indices = @transform_16, window_bounds = array<i64: 1, 1, 32>}, {transform_indices = @transform_17, window_bounds = array<i64: 1, 96, 32>}, {transform_indices = @transform_18, window_bounds = array<i64: 1, 1, 32>}, {transform_indices = @transform_19, window_bounds = array<i64: 1, 32, 32>}, {transform_indices = @transform_20, window_bounds = array<i64: 1, 1, 32>}, {transform_indices = @transform_21, window_bounds = array<i64: 1, 1, 32>}, {transform_indices = @transform_22, window_bounds = array<i64: 1, 1, 32>}, {transform_indices = @transform_23, window_bounds = array<i64: 1, 32, 96>}, {transform_indices = @transform_24, window_bounds = array<i64: 1, 1, 96>}, {transform_indices = @transform_25, window_bounds = array<i64: 1, 32, 32>}, {transform_indices = @transform_26, window_bounds = array<i64: 1, 1, 32>}, {transform_indices = @transform_27, window_bounds = array<i64: 1, 1, 32>}, {transform_indices = @transform_28, window_bounds = array<i64: 1, 1, 32>}, {transform_indices = @transform_29, window_bounds = array<i64: 1, 32, 128>}, {transform_indices = @transform_30, window_bounds = array<i64: 1, 1, 128>}, {transform_indices = @transform_31, window_bounds = array<i64: 1, 128, 32>}, {transform_indices = @transform_32, window_bounds = array<i64: 1, 1, 32>}, {pipeline_mode = #tpu.pipeline_mode<synchronous>, transform_indices = @transform_33, window_bounds = array<i64: 32, 32>}, {pipeline_mode = #tpu.pipeline_mode<synchronous>, transform_indices = @transform_34, window_bounds = array<i64: 32, 32>}, {pipeline_mode = #tpu.pipeline_mode<synchronous>, transform_indices = @transform_35, window_bounds = array<i64: 1, 32>}, {pipeline_mode = #tpu.pipeline_mode<synchronous>, transform_indices = @transform_36, window_bounds = array<i64: 32, 32>}, {pipeline_mode = #tpu.pipeline_mode<synchronous>, transform_indices = @transform_37, window_bounds = array<i64: 1, 32>}, {transform_indices = @transform_38, window_bounds = array<i64: 1, 8, 32>}]} {
    %c0_i32 = arith.constant 0 : i32
    %0 = arith.cmpi eq, %arg1, %c0_i32 : i32
    %1 = arith.extui %0 : i1 to i32
    %c0_i32_0 = arith.constant 0 : i32
    %2 = arith.cmpi ne, %1, %c0_i32_0 : i32
    scf.if %2 {
      %c0_196 = arith.constant 0 : index
      %c0_197 = arith.constant 0 : index
      %c0_198 = arith.constant 0 : index
      %368 = vector.load %arg2[%c0_196, %c0_197, %c0_198] : memref<1x8x32xf32, #tpu.memory_space<vmem>>, vector<1x8x32xf32>
      %369 = vector.shape_cast %368 : vector<1x8x32xf32> to vector<8x32xf32>
      %c0_199 = arith.constant 0 : index
      %c0_200 = arith.constant 0 : index
      %370 = vector.load %arg41[%c0_199, %c0_200] : memref<8x32xf32, #tpu.memory_space<vmem>>, vector<8x32xf32>
      tpu.vector_store %arg41[%c0_199, %c0_200], %369 {strides = array<i32>} : memref<8x32xf32, #tpu.memory_space<vmem>>, vector<8x32xf32>,
    } else {
    }
    %c0 = arith.constant 0 : index
    %c0_1 = arith.constant 0 : index
    %3 = vector.load %arg41[%c0, %c0_1] : memref<8x32xf32, #tpu.memory_space<vmem>>, vector<8x32xf32>
    %c0_2 = arith.constant 0 : index
    %c0_3 = arith.constant 0 : index
    %c0_4 = arith.constant 0 : index
    %c0_5 = arith.constant 0 : index
    %4 = vector.load %arg5[%c0_2, %c0_3, %c0_4, %c0_5] : memref<1x1x1x32xf32, #tpu.memory_space<vmem>>, vector<1x1x1x32xf32>
    %5 = vector.shape_cast %4 : vector<1x1x1x32xf32> to vector<1x32xf32>
    %c0_6 = arith.constant 0 : index
    %c0_7 = arith.constant 0 : index
    %c0_8 = arith.constant 0 : index
    %c0_9 = arith.constant 0 : index
    %6 = vector.load %arg6[%c0_6, %c0_7, %c0_8, %c0_9] : memref<1x1x1x32xf32, #tpu.memory_space<vmem>>, vector<1x1x1x32xf32>
    %7 = vector.shape_cast %6 : vector<1x1x1x32xf32> to vector<1x32xf32>
    %c0_10 = arith.constant 0 : index
    %c0_11 = arith.constant 0 : index
    %c0_12 = arith.constant 0 : index
    %8 = vector.load %arg7[%c0_10, %c0_11, %c0_12] : memref<1x32x32xf32, #tpu.memory_space<vmem>>, vector<1x32x32xf32>
    %9 = vector.shape_cast %8 : vector<1x32x32xf32> to vector<32x32xf32>
    %c0_13 = arith.constant 0 : index
    %c0_14 = arith.constant 0 : index
    %c0_15 = arith.constant 0 : index
    %10 = vector.load %arg8[%c0_13, %c0_14, %c0_15] : memref<1x1x32xf32, #tpu.memory_space<vmem>>, vector<1x1x32xf32>
    %11 = vector.shape_cast %10 : vector<1x1x32xf32> to vector<1x32xf32>
    %cst = arith.constant dense<0.000000e+00> : vector<8x32xf32>
    %12 = tpu.matmul %3, %9, %cst {dimension_numbers = #tpu.dot_dimension_numbers<[1], [0], [0], [1], [0, 0, 1, 1], [], []>} : vector<8x32xf32>, vector<32x32xf32>, vector<8x32xf32> -> vector<8x32xf32>
    %13 = vector.broadcast %11 : vector<1x32xf32> to vector<8x32xf32>
    %14 = arith.addf %13, %12 : vector<8x32xf32>
    %cst_16 = arith.constant 5.000000e-01 : f32
    %15 = vector.broadcast %cst_16 : f32 to vector<8x32xf32>
    %16 = arith.mulf %15, %14 : vector<8x32xf32>
    %cst_17 = arith.constant 0.707106769 : f32
    %17 = vector.broadcast %cst_17 : f32 to vector<8x32xf32>
    %18 = arith.mulf %14, %17 : vector<8x32xf32>
    %19 = math.erf %18 : vector<8x32xf32>
    %cst_18 = arith.constant 1.000000e+00 : f32
    %20 = vector.broadcast %cst_18 : f32 to vector<8x32xf32>
    %21 = arith.addf %20, %19 : vector<8x32xf32>
    %22 = arith.mulf %16, %21 : vector<8x32xf32>
    %c0_19 = arith.constant 0 : index
    %c0_20 = arith.constant 0 : index
    %c0_21 = arith.constant 0 : index
    %23 = vector.load %arg9[%c0_19, %c0_20, %c0_21] : memref<1x32x32xf32, #tpu.memory_space<vmem>>, vector<1x32x32xf32>
    %24 = vector.shape_cast %23 : vector<1x32x32xf32> to vector<32x32xf32>
    %cst_22 = arith.constant dense<0.000000e+00> : vector<8x32xf32>
    %25 = tpu.matmul %22, %24, %cst_22 {dimension_numbers = #tpu.dot_dimension_numbers<[1], [0], [0], [1], [0, 0, 1, 1], [], []>} : vector<8x32xf32>, vector<32x32xf32>, vector<8x32xf32> -> vector<8x32xf32>
    %c0_23 = arith.constant 0 : index
    %c0_24 = arith.constant 0 : index
    %c0_25 = arith.constant 0 : index
    %26 = vector.load %arg10[%c0_23, %c0_24, %c0_25] : memref<1x1x32xf32, #tpu.memory_space<vmem>>, vector<1x1x32xf32>
    %27 = vector.shape_cast %26 : vector<1x1x32xf32> to vector<1x32xf32>
    %28 = vector.broadcast %27 : vector<1x32xf32> to vector<8x32xf32>
    %29 = arith.addf %25, %28 : vector<8x32xf32>
    %c0_26 = arith.constant 0 : index
    %c0_27 = arith.constant 0 : index
    %30 = vector.load %arg3[%c0_26, %c0_27] : memref<8x4xf32, #tpu.memory_space<vmem>>, vector<8x4xf32>
    %c0_28 = arith.constant 0 : index
    %c0_29 = arith.constant 0 : index
    %c0_30 = arith.constant 0 : index
    %31 = vector.load %arg11[%c0_28, %c0_29, %c0_30] : memref<1x64x32xf32, #tpu.memory_space<vmem>>, vector<1x64x32xf32>
    %32 = vector.shape_cast %31 : vector<1x64x32xf32> to vector<64x32xf32>
    %c0_31 = arith.constant 0 : index
    %c0_32 = arith.constant 0 : index
    %c0_33 = arith.constant 0 : index
    %33 = vector.load %arg12[%c0_31, %c0_32, %c0_33] : memref<1x1x32xf32, #tpu.memory_space<vmem>>, vector<1x1x32xf32>
    %34 = vector.shape_cast %33 : vector<1x1x32xf32> to vector<1x32xf32>
    %c0_34 = arith.constant 0 : index
    %c0_35 = arith.constant 0 : index
    %35 = tpu.strided_load %arg41[%c0_34, %c0_35] {strides = array<i32: 2, 1>} : memref<8x32xf32, #tpu.memory_space<vmem>>, vector<4x32xf32>
    %36 = vector.extract_strided_slice %32 {offsets = [0, 0], sizes = [32, 32], strides = [1, 1]} : vector<64x32xf32> to vector<32x32xf32>
    %cst_36 = arith.constant dense<0.000000e+00> : vector<4x32xf32>
    %37 = tpu.matmul %35, %36, %cst_36 {dimension_numbers = #tpu.dot_dimension_numbers<[1], [0], [0], [1], [0, 0, 1, 1], [], []>} : vector<4x32xf32>, vector<32x32xf32>, vector<4x32xf32> -> vector<4x32xf32>
    %38 = vector.broadcast %34 : vector<1x32xf32> to vector<4x32xf32>
    %39 = arith.addf %38, %37 : vector<4x32xf32>
    %c1 = arith.constant 1 : index
    %c0_37 = arith.constant 0 : index
    %40 = tpu.strided_load %arg41[%c1, %c0_37] {strides = array<i32: 2, 1>} : memref<8x32xf32, #tpu.memory_space<vmem>>, vector<4x32xf32>
    %41 = vector.extract_strided_slice %32 {offsets = [32, 0], sizes = [32, 32], strides = [1, 1]} : vector<64x32xf32> to vector<32x32xf32>
    %cst_38 = arith.constant dense<0.000000e+00> : vector<4x32xf32>
    %42 = tpu.matmul %40, %41, %cst_38 {dimension_numbers = #tpu.dot_dimension_numbers<[1], [0], [0], [1], [0, 0, 1, 1], [], []>} : vector<4x32xf32>, vector<32x32xf32>, vector<4x32xf32> -> vector<4x32xf32>
    %43 = arith.addf %39, %42 : vector<4x32xf32>
    %cst_39 = arith.constant 5.000000e-01 : f32
    %44 = vector.broadcast %cst_39 : f32 to vector<4x32xf32>
    %45 = arith.mulf %44, %43 : vector<4x32xf32>
    %cst_40 = arith.constant 0.707106769 : f32
    %46 = vector.broadcast %cst_40 : f32 to vector<4x32xf32>
    %47 = arith.mulf %43, %46 : vector<4x32xf32>
    %48 = math.erf %47 : vector<4x32xf32>
    %cst_41 = arith.constant 1.000000e+00 : f32
    %49 = vector.broadcast %cst_41 : f32 to vector<4x32xf32>
    %50 = arith.addf %49, %48 : vector<4x32xf32>
    %51 = arith.mulf %45, %50 : vector<4x32xf32>
    %c0_42 = arith.constant 0 : index
    %c0_43 = arith.constant 0 : index
    %c0_44 = arith.constant 0 : index
    %52 = vector.load %arg13[%c0_42, %c0_43, %c0_44] : memref<1x32x32xf32, #tpu.memory_space<vmem>>, vector<1x32x32xf32>
    %53 = vector.shape_cast %52 : vector<1x32x32xf32> to vector<32x32xf32>
    %cst_45 = arith.constant dense<0.000000e+00> : vector<4x32xf32>
    %54 = tpu.matmul %51, %53, %cst_45 {dimension_numbers = #tpu.dot_dimension_numbers<[1], [0], [0], [1], [0, 0, 1, 1], [], []>} : vector<4x32xf32>, vector<32x32xf32>, vector<4x32xf32> -> vector<4x32xf32>
    %c0_46 = arith.constant 0 : index
    %c0_47 = arith.constant 0 : index
    %c0_48 = arith.constant 0 : index
    %55 = vector.load %arg14[%c0_46, %c0_47, %c0_48] : memref<1x1x32xf32, #tpu.memory_space<vmem>>, vector<1x1x32xf32>
    %56 = vector.shape_cast %55 : vector<1x1x32xf32> to vector<1x32xf32>
    %57 = vector.broadcast %56 : vector<1x32xf32> to vector<4x32xf32>
    %58 = arith.addf %54, %57 : vector<4x32xf32>
    %cst_49 = arith.constant dense<0.000000e+00> : vector<8x32xf32>
    %59 = tpu.matmul %30, %58, %cst_49 {dimension_numbers = #tpu.dot_dimension_numbers<[1], [0], [0], [1], [0, 0, 1, 1], [], []>} : vector<8x4xf32>, vector<4x32xf32>, vector<8x32xf32> -> vector<8x32xf32>
    %c0_50 = arith.constant 0 : index
    %c0_51 = arith.constant 0 : index
    %60 = vector.load %arg4[%c0_50, %c0_51] : memref<8x2xf32, #tpu.memory_space<vmem>>, vector<8x2xf32>
    %c0_52 = arith.constant 0 : index
    %c0_53 = arith.constant 0 : index
    %c0_54 = arith.constant 0 : index
    %61 = vector.load %arg15[%c0_52, %c0_53, %c0_54] : memref<1x128x32xf32, #tpu.memory_space<vmem>>, vector<1x128x32xf32>
    %62 = vector.shape_cast %61 : vector<1x128x32xf32> to vector<128x32xf32>
    %c0_55 = arith.constant 0 : index
    %c0_56 = arith.constant 0 : index
    %c0_57 = arith.constant 0 : index
    %63 = vector.load %arg16[%c0_55, %c0_56, %c0_57] : memref<1x1x32xf32, #tpu.memory_space<vmem>>, vector<1x1x32xf32>
    %64 = vector.shape_cast %63 : vector<1x1x32xf32> to vector<1x32xf32>
    %c0_58 = arith.constant 0 : index
    %c0_59 = arith.constant 0 : index
    %65 = tpu.strided_load %arg41[%c0_58, %c0_59] {strides = array<i32: 4, 1>} : memref<8x32xf32, #tpu.memory_space<vmem>>, vector<2x32xf32>
    %66 = vector.extract_strided_slice %62 {offsets = [0, 0], sizes = [32, 32], strides = [1, 1]} : vector<128x32xf32> to vector<32x32xf32>
    %cst_60 = arith.constant dense<0.000000e+00> : vector<2x32xf32>
    %67 = tpu.matmul %65, %66, %cst_60 {dimension_numbers = #tpu.dot_dimension_numbers<[1], [0], [0], [1], [0, 0, 1, 1], [], []>} : vector<2x32xf32>, vector<32x32xf32>, vector<2x32xf32> -> vector<2x32xf32>
    %68 = vector.broadcast %64 : vector<1x32xf32> to vector<2x32xf32>
    %69 = arith.addf %68, %67 : vector<2x32xf32>
    %c1_61 = arith.constant 1 : index
    %c0_62 = arith.constant 0 : index
    %70 = tpu.strided_load %arg41[%c1_61, %c0_62] {strides = array<i32: 4, 1>} : memref<8x32xf32, #tpu.memory_space<vmem>>, vector<2x32xf32>
    %71 = vector.extract_strided_slice %62 {offsets = [32, 0], sizes = [32, 32], strides = [1, 1]} : vector<128x32xf32> to vector<32x32xf32>
    %cst_63 = arith.constant dense<0.000000e+00> : vector<2x32xf32>
    %72 = tpu.matmul %70, %71, %cst_63 {dimension_numbers = #tpu.dot_dimension_numbers<[1], [0], [0], [1], [0, 0, 1, 1], [], []>} : vector<2x32xf32>, vector<32x32xf32>, vector<2x32xf32> -> vector<2x32xf32>
    %73 = arith.addf %69, %72 : vector<2x32xf32>
    %c2 = arith.constant 2 : index
    %c0_64 = arith.constant 0 : index
    %74 = tpu.strided_load %arg41[%c2, %c0_64] {strides = array<i32: 4, 1>} : memref<8x32xf32, #tpu.memory_space<vmem>>, vector<2x32xf32>
    %75 = vector.extract_strided_slice %62 {offsets = [64, 0], sizes = [32, 32], strides = [1, 1]} : vector<128x32xf32> to vector<32x32xf32>
    %cst_65 = arith.constant dense<0.000000e+00> : vector<2x32xf32>
    %76 = tpu.matmul %74, %75, %cst_65 {dimension_numbers = #tpu.dot_dimension_numbers<[1], [0], [0], [1], [0, 0, 1, 1], [], []>} : vector<2x32xf32>, vector<32x32xf32>, vector<2x32xf32> -> vector<2x32xf32>
    %77 = arith.addf %73, %76 : vector<2x32xf32>
    %c3 = arith.constant 3 : index
    %c0_66 = arith.constant 0 : index
    %78 = tpu.strided_load %arg41[%c3, %c0_66] {strides = array<i32: 4, 1>} : memref<8x32xf32, #tpu.memory_space<vmem>>, vector<2x32xf32>
    %79 = vector.extract_strided_slice %62 {offsets = [96, 0], sizes = [32, 32], strides = [1, 1]} : vector<128x32xf32> to vector<32x32xf32>
    %cst_67 = arith.constant dense<0.000000e+00> : vector<2x32xf32>
    %80 = tpu.matmul %78, %79, %cst_67 {dimension_numbers = #tpu.dot_dimension_numbers<[1], [0], [0], [1], [0, 0, 1, 1], [], []>} : vector<2x32xf32>, vector<32x32xf32>, vector<2x32xf32> -> vector<2x32xf32>
    %81 = arith.addf %77, %80 : vector<2x32xf32>
    %cst_68 = arith.constant 5.000000e-01 : f32
    %82 = vector.broadcast %cst_68 : f32 to vector<2x32xf32>
    %83 = arith.mulf %82, %81 : vector<2x32xf32>
    %cst_69 = arith.constant 0.707106769 : f32
    %84 = vector.broadcast %cst_69 : f32 to vector<2x32xf32>
    %85 = arith.mulf %81, %84 : vector<2x32xf32>
    %86 = math.erf %85 : vector<2x32xf32>
    %cst_70 = arith.constant 1.000000e+00 : f32
    %87 = vector.broadcast %cst_70 : f32 to vector<2x32xf32>
    %88 = arith.addf %87, %86 : vector<2x32xf32>
    %89 = arith.mulf %83, %88 : vector<2x32xf32>
    %c0_71 = arith.constant 0 : index
    %c0_72 = arith.constant 0 : index
    %c0_73 = arith.constant 0 : index
    %90 = vector.load %arg17[%c0_71, %c0_72, %c0_73] : memref<1x32x32xf32, #tpu.memory_space<vmem>>, vector<1x32x32xf32>
    %91 = vector.shape_cast %90 : vector<1x32x32xf32> to vector<32x32xf32>
    %cst_74 = arith.constant dense<0.000000e+00> : vector<2x32xf32>
    %92 = tpu.matmul %89, %91, %cst_74 {dimension_numbers = #tpu.dot_dimension_numbers<[1], [0], [0], [1], [0, 0, 1, 1], [], []>} : vector<2x32xf32>, vector<32x32xf32>, vector<2x32xf32> -> vector<2x32xf32>
    %c0_75 = arith.constant 0 : index
    %c0_76 = arith.constant 0 : index
    %c0_77 = arith.constant 0 : index
    %93 = vector.load %arg18[%c0_75, %c0_76, %c0_77] : memref<1x1x32xf32, #tpu.memory_space<vmem>>, vector<1x1x32xf32>
    %94 = vector.shape_cast %93 : vector<1x1x32xf32> to vector<1x32xf32>
    %95 = vector.broadcast %94 : vector<1x32xf32> to vector<2x32xf32>
    %96 = arith.addf %92, %95 : vector<2x32xf32>
    %cst_78 = arith.constant dense<0.000000e+00> : vector<8x32xf32>
    %97 = tpu.matmul %60, %96, %cst_78 {dimension_numbers = #tpu.dot_dimension_numbers<[1], [0], [0], [1], [0, 0, 1, 1], [], []>} : vector<8x2xf32>, vector<2x32xf32>, vector<8x32xf32> -> vector<8x32xf32>
    %c0_79 = arith.constant 0 : index
    %c0_80 = arith.constant 0 : index
    %c0_81 = arith.constant 0 : index
    %98 = vector.load %arg19[%c0_79, %c0_80, %c0_81] : memref<1x96x32xf32, #tpu.memory_space<vmem>>, vector<1x96x32xf32>
    %99 = vector.shape_cast %98 : vector<1x96x32xf32> to vector<96x32xf32>
    %100 = vector.extract_strided_slice %99 {offsets = [0, 0], sizes = [32, 32], strides = [1, 1]} : vector<96x32xf32> to vector<32x32xf32>
    %cst_82 = arith.constant dense<0.000000e+00> : vector<8x32xf32>
    %101 = tpu.matmul %29, %100, %cst_82 {dimension_numbers = #tpu.dot_dimension_numbers<[1], [0], [0], [1], [0, 0, 1, 1], [], []>} : vector<8x32xf32>, vector<32x32xf32>, vector<8x32xf32> -> vector<8x32xf32>
    %102 = vector.extract_strided_slice %99 {offsets = [32, 0], sizes = [32, 32], strides = [1, 1]} : vector<96x32xf32> to vector<32x32xf32>
    %cst_83 = arith.constant dense<0.000000e+00> : vector<8x32xf32>
    %103 = tpu.matmul %59, %102, %cst_83 {dimension_numbers = #tpu.dot_dimension_numbers<[1], [0], [0], [1], [0, 0, 1, 1], [], []>} : vector<8x32xf32>, vector<32x32xf32>, vector<8x32xf32> -> vector<8x32xf32>
    %104 = arith.addf %101, %103 : vector<8x32xf32>
    %105 = vector.extract_strided_slice %99 {offsets = [64, 0], sizes = [32, 32], strides = [1, 1]} : vector<96x32xf32> to vector<32x32xf32>
    %cst_84 = arith.constant dense<0.000000e+00> : vector<8x32xf32>
    %106 = tpu.matmul %97, %105, %cst_84 {dimension_numbers = #tpu.dot_dimension_numbers<[1], [0], [0], [1], [0, 0, 1, 1], [], []>} : vector<8x32xf32>, vector<32x32xf32>, vector<8x32xf32> -> vector<8x32xf32>
    %107 = arith.addf %104, %106 : vector<8x32xf32>
    %c0_85 = arith.constant 0 : index
    %c0_86 = arith.constant 0 : index
    %c0_87 = arith.constant 0 : index
    %108 = vector.load %arg20[%c0_85, %c0_86, %c0_87] : memref<1x1x32xf32, #tpu.memory_space<vmem>>, vector<1x1x32xf32>
    %109 = vector.shape_cast %108 : vector<1x1x32xf32> to vector<1x32xf32>
    %110 = vector.broadcast %109 : vector<1x32xf32> to vector<8x32xf32>
    %111 = arith.addf %107, %110 : vector<8x32xf32>
    %cst_88 = arith.constant 5.000000e-01 : f32
    %112 = vector.broadcast %cst_88 : f32 to vector<8x32xf32>
    %113 = arith.mulf %112, %111 : vector<8x32xf32>
    %cst_89 = arith.constant 0.707106769 : f32
    %114 = vector.broadcast %cst_89 : f32 to vector<8x32xf32>
    %115 = arith.mulf %111, %114 : vector<8x32xf32>
    %116 = math.erf %115 : vector<8x32xf32>
    %cst_90 = arith.constant 1.000000e+00 : f32
    %117 = vector.broadcast %cst_90 : f32 to vector<8x32xf32>
    %118 = arith.addf %117, %116 : vector<8x32xf32>
    %119 = arith.mulf %113, %118 : vector<8x32xf32>
    %c0_91 = arith.constant 0 : index
    %c0_92 = arith.constant 0 : index
    %c0_93 = arith.constant 0 : index
    %120 = vector.load %arg21[%c0_91, %c0_92, %c0_93] : memref<1x32x32xf32, #tpu.memory_space<vmem>>, vector<1x32x32xf32>
    %121 = vector.shape_cast %120 : vector<1x32x32xf32> to vector<32x32xf32>
    %cst_94 = arith.constant dense<0.000000e+00> : vector<8x32xf32>
    %122 = tpu.matmul %119, %121, %cst_94 {dimension_numbers = #tpu.dot_dimension_numbers<[1], [0], [0], [1], [0, 0, 1, 1], [], []>} : vector<8x32xf32>, vector<32x32xf32>, vector<8x32xf32> -> vector<8x32xf32>
    %c0_95 = arith.constant 0 : index
    %c0_96 = arith.constant 0 : index
    %c0_97 = arith.constant 0 : index
    %123 = vector.load %arg22[%c0_95, %c0_96, %c0_97] : memref<1x1x32xf32, #tpu.memory_space<vmem>>, vector<1x1x32xf32>
    %124 = vector.shape_cast %123 : vector<1x1x32xf32> to vector<1x32xf32>
    %125 = vector.broadcast %124 : vector<1x32xf32> to vector<8x32xf32>
    %126 = arith.addf %122, %125 : vector<8x32xf32>
    %127 = arith.addf %126, %3 : vector<8x32xf32>
    %cst_98 = arith.constant 1.000000e+00 : f32
    %128 = vector.broadcast %cst_98 : f32 to vector<1x32xf32>
    %129 = arith.addf %128, %5 : vector<1x32xf32>
    %130 = vector.broadcast %129 : vector<1x32xf32> to vector<8x32xf32>
    %131 = arith.mulf %127, %130 : vector<8x32xf32>
    %132 = vector.broadcast %7 : vector<1x32xf32> to vector<8x32xf32>
    %133 = arith.addf %131, %132 : vector<8x32xf32>
    %c0_99 = arith.constant 0 : index
    %c0_100 = arith.constant 0 : index
    %c0_101 = arith.constant 0 : index
    %134 = vector.load %arg23[%c0_99, %c0_100, %c0_101] : memref<1x1x32xf32, #tpu.memory_space<vmem>>, vector<1x1x32xf32>
    %135 = vector.shape_cast %134 : vector<1x1x32xf32> to vector<1x32xf32>
    %c0_102 = arith.constant 0 : index
    %c0_103 = arith.constant 0 : index
    %c0_104 = arith.constant 0 : index
    %136 = vector.load %arg24[%c0_102, %c0_103, %c0_104] : memref<1x1x32xf32, #tpu.memory_space<vmem>>, vector<1x1x32xf32>
    %137 = vector.shape_cast %136 : vector<1x1x32xf32> to vector<1x32xf32>
    %cst_105 = arith.constant dense<0.000000e+00> : vector<8xf32>
    %138 = vector.multi_reduction <add>, %133, %cst_105 [1] : vector<8x32xf32> to vector<8xf32>
    %139 = vector.shape_cast %138 : vector<8xf32> to vector<8x1xf32>
    %cst_106 = arith.constant 3.200000e+01 : f32
    %140 = vector.broadcast %cst_106 : f32 to vector<8x1xf32>
    %141 = arith.divf %139, %140 : vector<8x1xf32>
    %142 = vector.broadcast %141 : vector<8x1xf32> to vector<8x32xf32>
    %143 = arith.subf %133, %142 : vector<8x32xf32>
    %144 = arith.mulf %143, %143 : vector<8x32xf32>
    %cst_107 = arith.constant dense<0.000000e+00> : vector<8xf32>
    %145 = vector.multi_reduction <add>, %144, %cst_107 [1] : vector<8x32xf32> to vector<8xf32>
    %146 = vector.shape_cast %145 : vector<8xf32> to vector<8x1xf32>
    %cst_108 = arith.constant 3.200000e+01 : f32
    %147 = vector.broadcast %cst_108 : f32 to vector<8x1xf32>
    %148 = arith.divf %146, %147 : vector<8x1xf32>
    %149 = vector.broadcast %141 : vector<8x1xf32> to vector<8x32xf32>
    %150 = arith.subf %133, %149 : vector<8x32xf32>
    %cst_109 = arith.constant 9.99999974E-6 : f32
    %151 = vector.broadcast %cst_109 : f32 to vector<8x1xf32>
    %152 = arith.addf %148, %151 : vector<8x1xf32>
    %153 = math.rsqrt %152 : vector<8x1xf32>
    %154 = vector.broadcast %153 : vector<8x1xf32> to vector<8x32xf32>
    %155 = arith.mulf %150, %154 : vector<8x32xf32>
    %156 = vector.broadcast %135 : vector<1x32xf32> to vector<8x32xf32>
    %157 = arith.mulf %155, %156 : vector<8x32xf32>
    %158 = vector.broadcast %137 : vector<1x32xf32> to vector<8x32xf32>
    %159 = arith.addf %157, %158 : vector<8x32xf32>
    %c0_110 = arith.constant 0 : index
    %c0_111 = arith.constant 0 : index
    %c0_112 = arith.constant 0 : index
    %160 = vector.load %arg25[%c0_110, %c0_111, %c0_112] : memref<1x32x96xf32, #tpu.memory_space<vmem>>, vector<1x32x96xf32>
    %161 = vector.shape_cast %160 : vector<1x32x96xf32> to vector<32x96xf32>
    %cst_113 = arith.constant dense<0.000000e+00> : vector<8x96xf32>
    %162 = tpu.matmul %159, %161, %cst_113 {dimension_numbers = #tpu.dot_dimension_numbers<[1], [0], [0], [1], [0, 0, 1, 1], [], []>} : vector<8x32xf32>, vector<32x96xf32>, vector<8x96xf32> -> vector<8x96xf32>
    %c0_114 = arith.constant 0 : index
    %c0_115 = arith.constant 0 : index
    %c0_116 = arith.constant 0 : index
    %163 = vector.load %arg26[%c0_114, %c0_115, %c0_116] : memref<1x1x96xf32, #tpu.memory_space<vmem>>, vector<1x1x96xf32>
    %164 = vector.shape_cast %163 : vector<1x1x96xf32> to vector<1x96xf32>
    %165 = vector.broadcast %164 : vector<1x96xf32> to vector<8x96xf32>
    %166 = arith.addf %162, %165 : vector<8x96xf32>
    %167 = vector.extract_strided_slice %166 {offsets = [0, 0], sizes = [8, 4], strides = [1, 1]} : vector<8x96xf32> to vector<8x4xf32>
    %168 = vector.extract_strided_slice %166 {offsets = [0, 32], sizes = [8, 4], strides = [1, 1]} : vector<8x96xf32> to vector<8x4xf32>
    %169 = vector.extract_strided_slice %166 {offsets = [0, 64], sizes = [8, 4], strides = [1, 1]} : vector<8x96xf32> to vector<8x4xf32>
    %cst_117 = arith.constant dense<0.000000e+00> : vector<8x8xf32>
    %170 = tpu.matmul %167, %168, %cst_117 {dimension_numbers = #tpu.dot_dimension_numbers<[1], [1], [0], [0], [0, 0, 1, 0], [], []>} : vector<8x4xf32>, vector<8x4xf32>, vector<8x8xf32> -> vector<8x8xf32>
    %cst_118 = arith.constant 5.000000e-01 : f32
    %171 = vector.broadcast %cst_118 : f32 to vector<8x8xf32>
    %172 = arith.mulf %170, %171 : vector<8x8xf32>
    %cst_119 = arith.constant dense<0xFF800000> : vector<8xf32>
    %173 = vector.multi_reduction <maximumf>, %172, %cst_119 [1] : vector<8x8xf32> to vector<8xf32>
    %174 = vector.shape_cast %173 : vector<8xf32> to vector<8x1xf32>
    %175 = vector.broadcast %174 : vector<8x1xf32> to vector<8x8xf32>
    %176 = arith.subf %172, %175 : vector<8x8xf32>
    %177 = math.exp %176 : vector<8x8xf32>
    %cst_120 = arith.constant dense<0.000000e+00> : vector<8xf32>
    %178 = vector.multi_reduction <add>, %177, %cst_120 [1] : vector<8x8xf32> to vector<8xf32>
    %179 = vector.shape_cast %178 : vector<8xf32> to vector<8x1xf32>
    %180 = tpu.reciprocal %179 {approx = true} : vector<8x1xf32> -> vector<8x1xf32>
    %181 = vector.broadcast %180 : vector<8x1xf32> to vector<8x8xf32>
    %182 = arith.mulf %177, %181 : vector<8x8xf32>
    %cst_121 = arith.constant dense<0.000000e+00> : vector<8x4xf32>
    %183 = tpu.matmul %182, %169, %cst_121 {dimension_numbers = #tpu.dot_dimension_numbers<[1], [0], [0], [1], [0, 0, 1, 1], [], []>} : vector<8x8xf32>, vector<8x4xf32>, vector<8x4xf32> -> vector<8x4xf32>
    %184 = vector.extract_strided_slice %166 {offsets = [0, 4], sizes = [8, 4], strides = [1, 1]} : vector<8x96xf32> to vector<8x4xf32>
    %185 = vector.extract_strided_slice %166 {offsets = [0, 36], sizes = [8, 4], strides = [1, 1]} : vector<8x96xf32> to vector<8x4xf32>
    %186 = vector.extract_strided_slice %166 {offsets = [0, 68], sizes = [8, 4], strides = [1, 1]} : vector<8x96xf32> to vector<8x4xf32>
    %cst_122 = arith.constant dense<0.000000e+00> : vector<8x8xf32>
    %187 = tpu.matmul %184, %185, %cst_122 {dimension_numbers = #tpu.dot_dimension_numbers<[1], [1], [0], [0], [0, 0, 1, 0], [], []>} : vector<8x4xf32>, vector<8x4xf32>, vector<8x8xf32> -> vector<8x8xf32>
    %cst_123 = arith.constant 5.000000e-01 : f32
    %188 = vector.broadcast %cst_123 : f32 to vector<8x8xf32>
    %189 = arith.mulf %187, %188 : vector<8x8xf32>
    %cst_124 = arith.constant dense<0xFF800000> : vector<8xf32>
    %190 = vector.multi_reduction <maximumf>, %189, %cst_124 [1] : vector<8x8xf32> to vector<8xf32>
    %191 = vector.shape_cast %190 : vector<8xf32> to vector<8x1xf32>
    %192 = vector.broadcast %191 : vector<8x1xf32> to vector<8x8xf32>
    %193 = arith.subf %189, %192 : vector<8x8xf32>
    %194 = math.exp %193 : vector<8x8xf32>
    %cst_125 = arith.constant dense<0.000000e+00> : vector<8xf32>
    %195 = vector.multi_reduction <add>, %194, %cst_125 [1] : vector<8x8xf32> to vector<8xf32>
    %196 = vector.shape_cast %195 : vector<8xf32> to vector<8x1xf32>
    %197 = tpu.reciprocal %196 {approx = true} : vector<8x1xf32> -> vector<8x1xf32>
    %198 = vector.broadcast %197 : vector<8x1xf32> to vector<8x8xf32>
    %199 = arith.mulf %194, %198 : vector<8x8xf32>
    %cst_126 = arith.constant dense<0.000000e+00> : vector<8x4xf32>
    %200 = tpu.matmul %199, %186, %cst_126 {dimension_numbers = #tpu.dot_dimension_numbers<[1], [0], [0], [1], [0, 0, 1, 1], [], []>} : vector<8x8xf32>, vector<8x4xf32>, vector<8x4xf32> -> vector<8x4xf32>
    %201 = vector.extract_strided_slice %166 {offsets = [0, 8], sizes = [8, 4], strides = [1, 1]} : vector<8x96xf32> to vector<8x4xf32>
    %202 = vector.extract_strided_slice %166 {offsets = [0, 40], sizes = [8, 4], strides = [1, 1]} : vector<8x96xf32> to vector<8x4xf32>
    %203 = vector.extract_strided_slice %166 {offsets = [0, 72], sizes = [8, 4], strides = [1, 1]} : vector<8x96xf32> to vector<8x4xf32>
    %cst_127 = arith.constant dense<0.000000e+00> : vector<8x8xf32>
    %204 = tpu.matmul %201, %202, %cst_127 {dimension_numbers = #tpu.dot_dimension_numbers<[1], [1], [0], [0], [0, 0, 1, 0], [], []>} : vector<8x4xf32>, vector<8x4xf32>, vector<8x8xf32> -> vector<8x8xf32>
    %cst_128 = arith.constant 5.000000e-01 : f32
    %205 = vector.broadcast %cst_128 : f32 to vector<8x8xf32>
    %206 = arith.mulf %204, %205 : vector<8x8xf32>
    %cst_129 = arith.constant dense<0xFF800000> : vector<8xf32>
    %207 = vector.multi_reduction <maximumf>, %206, %cst_129 [1] : vector<8x8xf32> to vector<8xf32>
    %208 = vector.shape_cast %207 : vector<8xf32> to vector<8x1xf32>
    %209 = vector.broadcast %208 : vector<8x1xf32> to vector<8x8xf32>
    %210 = arith.subf %206, %209 : vector<8x8xf32>
    %211 = math.exp %210 : vector<8x8xf32>
    %cst_130 = arith.constant dense<0.000000e+00> : vector<8xf32>
    %212 = vector.multi_reduction <add>, %211, %cst_130 [1] : vector<8x8xf32> to vector<8xf32>
    %213 = vector.shape_cast %212 : vector<8xf32> to vector<8x1xf32>
    %214 = tpu.reciprocal %213 {approx = true} : vector<8x1xf32> -> vector<8x1xf32>
    %215 = vector.broadcast %214 : vector<8x1xf32> to vector<8x8xf32>
    %216 = arith.mulf %211, %215 : vector<8x8xf32>
    %cst_131 = arith.constant dense<0.000000e+00> : vector<8x4xf32>
    %217 = tpu.matmul %216, %203, %cst_131 {dimension_numbers = #tpu.dot_dimension_numbers<[1], [0], [0], [1], [0, 0, 1, 1], [], []>} : vector<8x8xf32>, vector<8x4xf32>, vector<8x4xf32> -> vector<8x4xf32>
    %218 = vector.extract_strided_slice %166 {offsets = [0, 12], sizes = [8, 4], strides = [1, 1]} : vector<8x96xf32> to vector<8x4xf32>
    %219 = vector.extract_strided_slice %166 {offsets = [0, 44], sizes = [8, 4], strides = [1, 1]} : vector<8x96xf32> to vector<8x4xf32>
    %220 = vector.extract_strided_slice %166 {offsets = [0, 76], sizes = [8, 4], strides = [1, 1]} : vector<8x96xf32> to vector<8x4xf32>
    %cst_132 = arith.constant dense<0.000000e+00> : vector<8x8xf32>
    %221 = tpu.matmul %218, %219, %cst_132 {dimension_numbers = #tpu.dot_dimension_numbers<[1], [1], [0], [0], [0, 0, 1, 0], [], []>} : vector<8x4xf32>, vector<8x4xf32>, vector<8x8xf32> -> vector<8x8xf32>
    %cst_133 = arith.constant 5.000000e-01 : f32
    %222 = vector.broadcast %cst_133 : f32 to vector<8x8xf32>
    %223 = arith.mulf %221, %222 : vector<8x8xf32>
    %cst_134 = arith.constant dense<0xFF800000> : vector<8xf32>
    %224 = vector.multi_reduction <maximumf>, %223, %cst_134 [1] : vector<8x8xf32> to vector<8xf32>
    %225 = vector.shape_cast %224 : vector<8xf32> to vector<8x1xf32>
    %226 = vector.broadcast %225 : vector<8x1xf32> to vector<8x8xf32>
    %227 = arith.subf %223, %226 : vector<8x8xf32>
    %228 = math.exp %227 : vector<8x8xf32>
    %cst_135 = arith.constant dense<0.000000e+00> : vector<8xf32>
    %229 = vector.multi_reduction <add>, %228, %cst_135 [1] : vector<8x8xf32> to vector<8xf32>
    %230 = vector.shape_cast %229 : vector<8xf32> to vector<8x1xf32>
    %231 = tpu.reciprocal %230 {approx = true} : vector<8x1xf32> -> vector<8x1xf32>
    %232 = vector.broadcast %231 : vector<8x1xf32> to vector<8x8xf32>
    %233 = arith.mulf %228, %232 : vector<8x8xf32>
    %cst_136 = arith.constant dense<0.000000e+00> : vector<8x4xf32>
    %234 = tpu.matmul %233, %220, %cst_136 {dimension_numbers = #tpu.dot_dimension_numbers<[1], [0], [0], [1], [0, 0, 1, 1], [], []>} : vector<8x8xf32>, vector<8x4xf32>, vector<8x4xf32> -> vector<8x4xf32>
    %235 = vector.extract_strided_slice %166 {offsets = [0, 16], sizes = [8, 4], strides = [1, 1]} : vector<8x96xf32> to vector<8x4xf32>
    %236 = vector.extract_strided_slice %166 {offsets = [0, 48], sizes = [8, 4], strides = [1, 1]} : vector<8x96xf32> to vector<8x4xf32>
    %237 = vector.extract_strided_slice %166 {offsets = [0, 80], sizes = [8, 4], strides = [1, 1]} : vector<8x96xf32> to vector<8x4xf32>
    %cst_137 = arith.constant dense<0.000000e+00> : vector<8x8xf32>
    %238 = tpu.matmul %235, %236, %cst_137 {dimension_numbers = #tpu.dot_dimension_numbers<[1], [1], [0], [0], [0, 0, 1, 0], [], []>} : vector<8x4xf32>, vector<8x4xf32>, vector<8x8xf32> -> vector<8x8xf32>
    %cst_138 = arith.constant 5.000000e-01 : f32
    %239 = vector.broadcast %cst_138 : f32 to vector<8x8xf32>
    %240 = arith.mulf %238, %239 : vector<8x8xf32>
    %cst_139 = arith.constant dense<0xFF800000> : vector<8xf32>
    %241 = vector.multi_reduction <maximumf>, %240, %cst_139 [1] : vector<8x8xf32> to vector<8xf32>
    %242 = vector.shape_cast %241 : vector<8xf32> to vector<8x1xf32>
    %243 = vector.broadcast %242 : vector<8x1xf32> to vector<8x8xf32>
    %244 = arith.subf %240, %243 : vector<8x8xf32>
    %245 = math.exp %244 : vector<8x8xf32>
    %cst_140 = arith.constant dense<0.000000e+00> : vector<8xf32>
    %246 = vector.multi_reduction <add>, %245, %cst_140 [1] : vector<8x8xf32> to vector<8xf32>
    %247 = vector.shape_cast %246 : vector<8xf32> to vector<8x1xf32>
    %248 = tpu.reciprocal %247 {approx = true} : vector<8x1xf32> -> vector<8x1xf32>
    %249 = vector.broadcast %248 : vector<8x1xf32> to vector<8x8xf32>
    %250 = arith.mulf %245, %249 : vector<8x8xf32>
    %cst_141 = arith.constant dense<0.000000e+00> : vector<8x4xf32>
    %251 = tpu.matmul %250, %237, %cst_141 {dimension_numbers = #tpu.dot_dimension_numbers<[1], [0], [0], [1], [0, 0, 1, 1], [], []>} : vector<8x8xf32>, vector<8x4xf32>, vector<8x4xf32> -> vector<8x4xf32>
    %252 = vector.extract_strided_slice %166 {offsets = [0, 20], sizes = [8, 4], strides = [1, 1]} : vector<8x96xf32> to vector<8x4xf32>
    %253 = vector.extract_strided_slice %166 {offsets = [0, 52], sizes = [8, 4], strides = [1, 1]} : vector<8x96xf32> to vector<8x4xf32>
    %254 = vector.extract_strided_slice %166 {offsets = [0, 84], sizes = [8, 4], strides = [1, 1]} : vector<8x96xf32> to vector<8x4xf32>
    %cst_142 = arith.constant dense<0.000000e+00> : vector<8x8xf32>
    %255 = tpu.matmul %252, %253, %cst_142 {dimension_numbers = #tpu.dot_dimension_numbers<[1], [1], [0], [0], [0, 0, 1, 0], [], []>} : vector<8x4xf32>, vector<8x4xf32>, vector<8x8xf32> -> vector<8x8xf32>
    %cst_143 = arith.constant 5.000000e-01 : f32
    %256 = vector.broadcast %cst_143 : f32 to vector<8x8xf32>
    %257 = arith.mulf %255, %256 : vector<8x8xf32>
    %cst_144 = arith.constant dense<0xFF800000> : vector<8xf32>
    %258 = vector.multi_reduction <maximumf>, %257, %cst_144 [1] : vector<8x8xf32> to vector<8xf32>
    %259 = vector.shape_cast %258 : vector<8xf32> to vector<8x1xf32>
    %260 = vector.broadcast %259 : vector<8x1xf32> to vector<8x8xf32>
    %261 = arith.subf %257, %260 : vector<8x8xf32>
    %262 = math.exp %261 : vector<8x8xf32>
    %cst_145 = arith.constant dense<0.000000e+00> : vector<8xf32>
    %263 = vector.multi_reduction <add>, %262, %cst_145 [1] : vector<8x8xf32> to vector<8xf32>
    %264 = vector.shape_cast %263 : vector<8xf32> to vector<8x1xf32>
    %265 = tpu.reciprocal %264 {approx = true} : vector<8x1xf32> -> vector<8x1xf32>
    %266 = vector.broadcast %265 : vector<8x1xf32> to vector<8x8xf32>
    %267 = arith.mulf %262, %266 : vector<8x8xf32>
    %cst_146 = arith.constant dense<0.000000e+00> : vector<8x4xf32>
    %268 = tpu.matmul %267, %254, %cst_146 {dimension_numbers = #tpu.dot_dimension_numbers<[1], [0], [0], [1], [0, 0, 1, 1], [], []>} : vector<8x8xf32>, vector<8x4xf32>, vector<8x4xf32> -> vector<8x4xf32>
    %269 = vector.extract_strided_slice %166 {offsets = [0, 24], sizes = [8, 4], strides = [1, 1]} : vector<8x96xf32> to vector<8x4xf32>
    %270 = vector.extract_strided_slice %166 {offsets = [0, 56], sizes = [8, 4], strides = [1, 1]} : vector<8x96xf32> to vector<8x4xf32>
    %271 = vector.extract_strided_slice %166 {offsets = [0, 88], sizes = [8, 4], strides = [1, 1]} : vector<8x96xf32> to vector<8x4xf32>
    %cst_147 = arith.constant dense<0.000000e+00> : vector<8x8xf32>
    %272 = tpu.matmul %269, %270, %cst_147 {dimension_numbers = #tpu.dot_dimension_numbers<[1], [1], [0], [0], [0, 0, 1, 0], [], []>} : vector<8x4xf32>, vector<8x4xf32>, vector<8x8xf32> -> vector<8x8xf32>
    %cst_148 = arith.constant 5.000000e-01 : f32
    %273 = vector.broadcast %cst_148 : f32 to vector<8x8xf32>
    %274 = arith.mulf %272, %273 : vector<8x8xf32>
    %cst_149 = arith.constant dense<0xFF800000> : vector<8xf32>
    %275 = vector.multi_reduction <maximumf>, %274, %cst_149 [1] : vector<8x8xf32> to vector<8xf32>
    %276 = vector.shape_cast %275 : vector<8xf32> to vector<8x1xf32>
    %277 = vector.broadcast %276 : vector<8x1xf32> to vector<8x8xf32>
    %278 = arith.subf %274, %277 : vector<8x8xf32>
    %279 = math.exp %278 : vector<8x8xf32>
    %cst_150 = arith.constant dense<0.000000e+00> : vector<8xf32>
    %280 = vector.multi_reduction <add>, %279, %cst_150 [1] : vector<8x8xf32> to vector<8xf32>
    %281 = vector.shape_cast %280 : vector<8xf32> to vector<8x1xf32>
    %282 = tpu.reciprocal %281 {approx = true} : vector<8x1xf32> -> vector<8x1xf32>
    %283 = vector.broadcast %282 : vector<8x1xf32> to vector<8x8xf32>
    %284 = arith.mulf %279, %283 : vector<8x8xf32>
    %cst_151 = arith.constant dense<0.000000e+00> : vector<8x4xf32>
    %285 = tpu.matmul %284, %271, %cst_151 {dimension_numbers = #tpu.dot_dimension_numbers<[1], [0], [0], [1], [0, 0, 1, 1], [], []>} : vector<8x8xf32>, vector<8x4xf32>, vector<8x4xf32> -> vector<8x4xf32>
    %286 = vector.extract_strided_slice %166 {offsets = [0, 28], sizes = [8, 4], strides = [1, 1]} : vector<8x96xf32> to vector<8x4xf32>
    %287 = vector.extract_strided_slice %166 {offsets = [0, 60], sizes = [8, 4], strides = [1, 1]} : vector<8x96xf32> to vector<8x4xf32>
    %288 = vector.extract_strided_slice %166 {offsets = [0, 92], sizes = [8, 4], strides = [1, 1]} : vector<8x96xf32> to vector<8x4xf32>
    %cst_152 = arith.constant dense<0.000000e+00> : vector<8x8xf32>
    %289 = tpu.matmul %286, %287, %cst_152 {dimension_numbers = #tpu.dot_dimension_numbers<[1], [1], [0], [0], [0, 0, 1, 0], [], []>} : vector<8x4xf32>, vector<8x4xf32>, vector<8x8xf32> -> vector<8x8xf32>
    %cst_153 = arith.constant 5.000000e-01 : f32
    %290 = vector.broadcast %cst_153 : f32 to vector<8x8xf32>
    %291 = arith.mulf %289, %290 : vector<8x8xf32>
    %cst_154 = arith.constant dense<0xFF800000> : vector<8xf32>
    %292 = vector.multi_reduction <maximumf>, %291, %cst_154 [1] : vector<8x8xf32> to vector<8xf32>
    %293 = vector.shape_cast %292 : vector<8xf32> to vector<8x1xf32>
    %294 = vector.broadcast %293 : vector<8x1xf32> to vector<8x8xf32>
    %295 = arith.subf %291, %294 : vector<8x8xf32>
    %296 = math.exp %295 : vector<8x8xf32>
    %cst_155 = arith.constant dense<0.000000e+00> : vector<8xf32>
    %297 = vector.multi_reduction <add>, %296, %cst_155 [1] : vector<8x8xf32> to vector<8xf32>
    %298 = vector.shape_cast %297 : vector<8xf32> to vector<8x1xf32>
    %299 = tpu.reciprocal %298 {approx = true} : vector<8x1xf32> -> vector<8x1xf32>
    %300 = vector.broadcast %299 : vector<8x1xf32> to vector<8x8xf32>
    %301 = arith.mulf %296, %300 : vector<8x8xf32>
    %cst_156 = arith.constant dense<0.000000e+00> : vector<8x4xf32>
    %302 = tpu.matmul %301, %288, %cst_156 {dimension_numbers = #tpu.dot_dimension_numbers<[1], [0], [0], [1], [0, 0, 1, 1], [], []>} : vector<8x8xf32>, vector<8x4xf32>, vector<8x4xf32> -> vector<8x4xf32>
    %303 = tpu.concatenate %183, %200, %217, %234, %251, %268, %285, %302 in 1 : vector<8x4xf32>, vector<8x4xf32>, vector<8x4xf32>, vector<8x4xf32>, vector<8x4xf32>, vector<8x4xf32>, vector<8x4xf32>, vector<8x4xf32> -> vector<8x32xf32>
    %c0_157 = arith.constant 0 : index
    %c0_158 = arith.constant 0 : index
    %c0_159 = arith.constant 0 : index
    %304 = vector.load %arg27[%c0_157, %c0_158, %c0_159] : memref<1x32x32xf32, #tpu.memory_space<vmem>>, vector<1x32x32xf32>
    %305 = vector.shape_cast %304 : vector<1x32x32xf32> to vector<32x32xf32>
    %cst_160 = arith.constant dense<0.000000e+00> : vector<8x32xf32>
    %306 = tpu.matmul %303, %305, %cst_160 {dimension_numbers = #tpu.dot_dimension_numbers<[1], [0], [0], [1], [0, 0, 1, 1], [], []>} : vector<8x32xf32>, vector<32x32xf32>, vector<8x32xf32> -> vector<8x32xf32>
    %c0_161 = arith.constant 0 : index
    %c0_162 = arith.constant 0 : index
    %c0_163 = arith.constant 0 : index
    %307 = vector.load %arg28[%c0_161, %c0_162, %c0_163] : memref<1x1x32xf32, #tpu.memory_space<vmem>>, vector<1x1x32xf32>
    %308 = vector.shape_cast %307 : vector<1x1x32xf32> to vector<1x32xf32>
    %309 = vector.broadcast %308 : vector<1x32xf32> to vector<8x32xf32>
    %310 = arith.addf %306, %309 : vector<8x32xf32>
    %311 = arith.addf %3, %310 : vector<8x32xf32>
    %c0_164 = arith.constant 0 : index
    %c0_165 = arith.constant 0 : index
    %c0_166 = arith.constant 0 : index
    %312 = vector.load %arg29[%c0_164, %c0_165, %c0_166] : memref<1x1x32xf32, #tpu.memory_space<vmem>>, vector<1x1x32xf32>
    %313 = vector.shape_cast %312 : vector<1x1x32xf32> to vector<1x32xf32>
    %c0_167 = arith.constant 0 : index
    %c0_168 = arith.constant 0 : index
    %c0_169 = arith.constant 0 : index
    %314 = vector.load %arg30[%c0_167, %c0_168, %c0_169] : memref<1x1x32xf32, #tpu.memory_space<vmem>>, vector<1x1x32xf32>
    %315 = vector.shape_cast %314 : vector<1x1x32xf32> to vector<1x32xf32>
    %cst_170 = arith.constant dense<0.000000e+00> : vector<8xf32>
    %316 = vector.multi_reduction <add>, %311, %cst_170 [1] : vector<8x32xf32> to vector<8xf32>
    %317 = vector.shape_cast %316 : vector<8xf32> to vector<8x1xf32>
    %cst_171 = arith.constant 3.200000e+01 : f32
    %318 = vector.broadcast %cst_171 : f32 to vector<8x1xf32>
    %319 = arith.divf %317, %318 : vector<8x1xf32>
    %320 = vector.broadcast %319 : vector<8x1xf32> to vector<8x32xf32>
    %321 = arith.subf %311, %320 : vector<8x32xf32>
    %322 = arith.mulf %321, %321 : vector<8x32xf32>
    %cst_172 = arith.constant dense<0.000000e+00> : vector<8xf32>
    %323 = vector.multi_reduction <add>, %322, %cst_172 [1] : vector<8x32xf32> to vector<8xf32>
    %324 = vector.shape_cast %323 : vector<8xf32> to vector<8x1xf32>
    %cst_173 = arith.constant 3.200000e+01 : f32
    %325 = vector.broadcast %cst_173 : f32 to vector<8x1xf32>
    %326 = arith.divf %324, %325 : vector<8x1xf32>
    %327 = vector.broadcast %319 : vector<8x1xf32> to vector<8x32xf32>
    %328 = arith.subf %311, %327 : vector<8x32xf32>
    %cst_174 = arith.constant 9.99999974E-6 : f32
    %329 = vector.broadcast %cst_174 : f32 to vector<8x1xf32>
    %330 = arith.addf %326, %329 : vector<8x1xf32>
    %331 = math.rsqrt %330 : vector<8x1xf32>
    %332 = vector.broadcast %331 : vector<8x1xf32> to vector<8x32xf32>
    %333 = arith.mulf %328, %332 : vector<8x32xf32>
    %334 = vector.broadcast %313 : vector<1x32xf32> to vector<8x32xf32>
    %335 = arith.mulf %333, %334 : vector<8x32xf32>
    %336 = vector.broadcast %315 : vector<1x32xf32> to vector<8x32xf32>
    %337 = arith.addf %335, %336 : vector<8x32xf32>
    %c0_175 = arith.constant 0 : index
    %c0_176 = arith.constant 0 : index
    %c0_177 = arith.constant 0 : index
    %338 = vector.load %arg31[%c0_175, %c0_176, %c0_177] : memref<1x32x128xf32, #tpu.memory_space<vmem>>, vector<1x32x128xf32>
    %339 = vector.shape_cast %338 : vector<1x32x128xf32> to vector<32x128xf32>
    %cst_178 = arith.constant dense<0.000000e+00> : vector<8x128xf32>
    %340 = tpu.matmul %337, %339, %cst_178 {dimension_numbers = #tpu.dot_dimension_numbers<[1], [0], [0], [1], [0, 0, 1, 1], [], []>} : vector<8x32xf32>, vector<32x128xf32>, vector<8x128xf32> -> vector<8x128xf32>
    %c0_179 = arith.constant 0 : index
    %c0_180 = arith.constant 0 : index
    %c0_181 = arith.constant 0 : index
    %341 = vector.load %arg32[%c0_179, %c0_180, %c0_181] : memref<1x1x128xf32, #tpu.memory_space<vmem>>, vector<1x1x128xf32>
    %342 = vector.shape_cast %341 : vector<1x1x128xf32> to vector<1x128xf32>
    %343 = vector.broadcast %342 : vector<1x128xf32> to vector<8x128xf32>
    %344 = arith.addf %340, %343 : vector<8x128xf32>
    %cst_182 = arith.constant 5.000000e-01 : f32
    %345 = vector.broadcast %cst_182 : f32 to vector<8x128xf32>
    %346 = arith.mulf %345, %344 : vector<8x128xf32>
    %cst_183 = arith.constant 0.707106769 : f32
    %347 = vector.broadcast %cst_183 : f32 to vector<8x128xf32>
    %348 = arith.mulf %344, %347 : vector<8x128xf32>
    %349 = math.erf %348 : vector<8x128xf32>
    %cst_184 = arith.constant 1.000000e+00 : f32
    %350 = vector.broadcast %cst_184 : f32 to vector<8x128xf32>
    %351 = arith.addf %350, %349 : vector<8x128xf32>
    %352 = arith.mulf %346, %351 : vector<8x128xf32>
    %c0_185 = arith.constant 0 : index
    %c0_186 = arith.constant 0 : index
    %c0_187 = arith.constant 0 : index
    %353 = vector.load %arg33[%c0_185, %c0_186, %c0_187] : memref<1x128x32xf32, #tpu.memory_space<vmem>>, vector<1x128x32xf32>
    %354 = vector.shape_cast %353 : vector<1x128x32xf32> to vector<128x32xf32>
    %cst_188 = arith.constant dense<0.000000e+00> : vector<8x32xf32>
    %355 = tpu.matmul %352, %354, %cst_188 {dimension_numbers = #tpu.dot_dimension_numbers<[1], [0], [0], [1], [0, 0, 1, 1], [], []>} : vector<8x128xf32>, vector<128x32xf32>, vector<8x32xf32> -> vector<8x32xf32>
    %356 = arith.addf %311, %355 : vector<8x32xf32>
    %c0_189 = arith.constant 0 : index
    %c0_190 = arith.constant 0 : index
    %c0_191 = arith.constant 0 : index
    %357 = vector.load %arg34[%c0_189, %c0_190, %c0_191] : memref<1x1x32xf32, #tpu.memory_space<vmem>>, vector<1x1x32xf32>
    %358 = vector.shape_cast %357 : vector<1x1x32xf32> to vector<1x32xf32>
    %359 = vector.broadcast %358 : vector<1x32xf32> to vector<8x32xf32>
    %360 = arith.addf %356, %359 : vector<8x32xf32>
    %c0_192 = arith.constant 0 : index
    %c0_193 = arith.constant 0 : index
    %361 = vector.load %arg41[%c0_192, %c0_193] : memref<8x32xf32, #tpu.memory_space<vmem>>, vector<8x32xf32>
    tpu.vector_store %arg41[%c0_192, %c0_193], %360 {strides = array<i32>} : memref<8x32xf32, #tpu.memory_space<vmem>>, vector<8x32xf32>,
    %c1_i32 = arith.constant 1 : i32
    %362 = arith.cmpi eq, %arg1, %c1_i32 : i32
    %363 = arith.extui %362 : i1 to i32
    %c0_i32_194 = arith.constant 0 : i32
    %364 = arith.cmpi ne, %363, %c0_i32_194 : i32
    scf.if %364 {
      %c0_196 = arith.constant 0 : index
      %c0_197 = arith.constant 0 : index
      %368 = vector.load %arg42[%c0_196, %c0_197] : memref<8x32xf32, #tpu.memory_space<vmem>>, vector<8x32xf32>
      tpu.vector_store %arg42[%c0_196, %c0_197], %360 {strides = array<i32>} : memref<8x32xf32, #tpu.memory_space<vmem>>, vector<8x32xf32>,
    } else {
    }
    %c3_i32 = arith.constant 3 : i32
    %365 = arith.cmpi eq, %arg1, %c3_i32 : i32
    %366 = arith.extui %365 : i1 to i32
    %c0_i32_195 = arith.constant 0 : i32
    %367 = arith.cmpi ne, %366, %c0_i32_195 : i32
    scf.if %367 {
      %c0_196 = arith.constant 0 : index
      %c0_197 = arith.constant 0 : index
      %368 = vector.load %arg42[%c0_196, %c0_197] : memref<8x32xf32, #tpu.memory_space<vmem>>, vector<8x32xf32>
      %c0_198 = arith.constant 0 : index
      %c0_199 = arith.constant 0 : index
      %369 = vector.load %arg35[%c0_198, %c0_199] : memref<32x32xf32, #tpu.memory_space<vmem>>, vector<32x32xf32>
      %cst_200 = arith.constant dense<0.000000e+00> : vector<8x32xf32>
      %370 = tpu.matmul %368, %369, %cst_200 {dimension_numbers = #tpu.dot_dimension_numbers<[1], [0], [0], [1], [0, 0, 1, 1], [], []>} : vector<8x32xf32>, vector<32x32xf32>, vector<8x32xf32> -> vector<8x32xf32>
      %c0_201 = arith.constant 0 : index
      %c0_202 = arith.constant 0 : index
      %371 = vector.load %arg36[%c0_201, %c0_202] : memref<32x32xf32, #tpu.memory_space<vmem>>, vector<32x32xf32>
      %cst_203 = arith.constant dense<0.000000e+00> : vector<8x32xf32>
      %372 = tpu.matmul %360, %371, %cst_203 {dimension_numbers = #tpu.dot_dimension_numbers<[1], [0], [0], [1], [0, 0, 1, 1], [], []>} : vector<8x32xf32>, vector<32x32xf32>, vector<8x32xf32> -> vector<8x32xf32>
      %373 = arith.addf %370, %372 : vector<8x32xf32>
      %c0_204 = arith.constant 0 : index
      %c0_205 = arith.constant 0 : index
      %374 = vector.load %arg37[%c0_204, %c0_205] : memref<1x32xf32, #tpu.memory_space<vmem>>, vector<1x32xf32>
      %375 = vector.broadcast %374 : vector<1x32xf32> to vector<8x32xf32>
      %376 = arith.addf %373, %375 : vector<8x32xf32>
      %cst_206 = arith.constant 5.000000e-01 : f32
      %377 = vector.broadcast %cst_206 : f32 to vector<8x32xf32>
      %378 = arith.mulf %377, %376 : vector<8x32xf32>
      %cst_207 = arith.constant 0.707106769 : f32
      %379 = vector.broadcast %cst_207 : f32 to vector<8x32xf32>
      %380 = arith.mulf %376, %379 : vector<8x32xf32>
      %381 = math.erf %380 : vector<8x32xf32>
      %cst_208 = arith.constant 1.000000e+00 : f32
      %382 = vector.broadcast %cst_208 : f32 to vector<8x32xf32>
      %383 = arith.addf %382, %381 : vector<8x32xf32>
      %384 = arith.mulf %378, %383 : vector<8x32xf32>
      %c0_209 = arith.constant 0 : index
      %c0_210 = arith.constant 0 : index
      %385 = vector.load %arg38[%c0_209, %c0_210] : memref<32x32xf32, #tpu.memory_space<vmem>>, vector<32x32xf32>
      %cst_211 = arith.constant dense<0.000000e+00> : vector<8x32xf32>
      %386 = tpu.matmul %384, %385, %cst_211 {dimension_numbers = #tpu.dot_dimension_numbers<[1], [0], [0], [1], [0, 0, 1, 1], [], []>} : vector<8x32xf32>, vector<32x32xf32>, vector<8x32xf32> -> vector<8x32xf32>
      %c0_212 = arith.constant 0 : index
      %c0_213 = arith.constant 0 : index
      %387 = vector.load %arg39[%c0_212, %c0_213] : memref<1x32xf32, #tpu.memory_space<vmem>>, vector<1x32xf32>
      %388 = vector.broadcast %387 : vector<1x32xf32> to vector<8x32xf32>
      %389 = arith.addf %386, %388 : vector<8x32xf32>
      %c0_214 = arith.constant 0 : index
      %c0_215 = arith.constant 0 : index
      %c0_216 = arith.constant 0 : index
      %390 = vector.load %arg40[%c0_214, %c0_215, %c0_216] : memref<1x8x32xf32, #tpu.memory_space<vmem>>, vector<1x8x32xf32>
      %391 = vector.shape_cast %390 : vector<1x8x32xf32> to vector<8x32xf32>
      %392 = vector.shape_cast %389 : vector<8x32xf32> to vector<1x8x32xf32>
      tpu.vector_store %arg40[%c0_214, %c0_215, %c0_216], %392 {strides = array<i32>} : memref<1x8x32xf32, #tpu.memory_space<vmem>>, vector<1x8x32xf32>,
    } else {
    }
    return
  }
  func.func @transform_0(%arg0: i32, %arg1: i32) -> (i32, i32, i32) {
    %c0_i32 = arith.constant 0 : i32
    %c0_i32_0 = arith.constant 0 : i32
    %c0_i32_1 = arith.constant 0 : i32
    return %arg0, %c0_i32, %c0_i32_0 : i32, i32, i32
  }
  func.func @transform_1(%arg0: i32, %arg1: i32) -> (i32, i32) {
    %c0_i32 = arith.constant 0 : i32
    %c0_i32_0 = arith.constant 0 : i32
    %c0_i32_1 = arith.constant 0 : i32
    return %c0_i32, %c0_i32_0 : i32, i32
  }
  func.func @transform_2(%arg0: i32, %arg1: i32) -> (i32, i32) {
    %c0_i32 = arith.constant 0 : i32
    %c0_i32_0 = arith.constant 0 : i32
    %c0_i32_1 = arith.constant 0 : i32
    return %c0_i32, %c0_i32_0 : i32, i32
  }
  func.func @transform_3(%arg0: i32, %arg1: i32) -> (i32, i32, i32, i32) {
    %c0_i32 = arith.constant 0 : i32
    %c0_i32_0 = arith.constant 0 : i32
    %c0_i32_1 = arith.constant 0 : i32
    return %arg1, %arg0, %c0_i32, %c0_i32_0 : i32, i32, i32, i32
  }
  func.func @transform_4(%arg0: i32, %arg1: i32) -> (i32, i32, i32, i32) {
    %c0_i32 = arith.constant 0 : i32
    %c0_i32_0 = arith.constant 0 : i32
    %c0_i32_1 = arith.constant 0 : i32
    return %arg1, %arg0, %c0_i32, %c0_i32_0 : i32, i32, i32, i32
  }
  func.func @transform_5(%arg0: i32, %arg1: i32) -> (i32, i32, i32) {
    %c0_i32 = arith.constant 0 : i32
    %c0_i32_0 = arith.constant 0 : i32
    %c0_i32_1 = arith.constant 0 : i32
    return %arg1, %c0_i32, %c0_i32_0 : i32, i32, i32
  }
  func.func @transform_6(%arg0: i32, %arg1: i32) -> (i32, i32, i32) {
    %c0_i32 = arith.constant 0 : i32
    %c0_i32_0 = arith.constant 0 : i32
    %c0_i32_1 = arith.constant 0 : i32
    return %arg1, %c0_i32, %c0_i32_0 : i32, i32, i32
  }
  func.func @transform_7(%arg0: i32, %arg1: i32) -> (i32, i32, i32) {
    %c0_i32 = arith.constant 0 : i32
    %c0_i32_0 = arith.constant 0 : i32
    %c0_i32_1 = arith.constant 0 : i32
    return %arg1, %c0_i32, %c0_i32_0 : i32, i32, i32
  }
  func.func @transform_8(%arg0: i32, %arg1: i32) -> (i32, i32, i32) {
    %c0_i32 = arith.constant 0 : i32
    %c0_i32_0 = arith.constant 0 : i32
    %c0_i32_1 = arith.constant 0 : i32
    return %arg1, %c0_i32, %c0_i32_0 : i32, i32, i32
  }
  func.func @transform_9(%arg0: i32, %arg1: i32) -> (i32, i32, i32) {
    %c0_i32 = arith.constant 0 : i32
    %c0_i32_0 = arith.constant 0 : i32
    %c0_i32_1 = arith.constant 0 : i32
    return %arg1, %c0_i32, %c0_i32_0 : i32, i32, i32
  }
  func.func @transform_10(%arg0: i32, %arg1: i32) -> (i32, i32, i32) {
    %c0_i32 = arith.constant 0 : i32
    %c0_i32_0 = arith.constant 0 : i32
    %c0_i32_1 = arith.constant 0 : i32
    return %arg1, %c0_i32, %c0_i32_0 : i32, i32, i32
  }
  func.func @transform_11(%arg0: i32, %arg1: i32) -> (i32, i32, i32) {
    %c0_i32 = arith.constant 0 : i32
    %c0_i32_0 = arith.constant 0 : i32
    %c0_i32_1 = arith.constant 0 : i32
    return %arg1, %c0_i32, %c0_i32_0 : i32, i32, i32
  }
  func.func @transform_12(%arg0: i32, %arg1: i32) -> (i32, i32, i32) {
    %c0_i32 = arith.constant 0 : i32
    %c0_i32_0 = arith.constant 0 : i32
    %c0_i32_1 = arith.constant 0 : i32
    return %arg1, %c0_i32, %c0_i32_0 : i32, i32, i32
  }
  func.func @transform_13(%arg0: i32, %arg1: i32) -> (i32, i32, i32) {
    %c0_i32 = arith.constant 0 : i32
    %c0_i32_0 = arith.constant 0 : i32
    %c0_i32_1 = arith.constant 0 : i32
    return %arg1, %c0_i32, %c0_i32_0 : i32, i32, i32
  }
  func.func @transform_14(%arg0: i32, %arg1: i32) -> (i32, i32, i32) {
    %c0_i32 = arith.constant 0 : i32
    %c0_i32_0 = arith.constant 0 : i32
    %c0_i32_1 = arith.constant 0 : i32
    return %arg1, %c0_i32, %c0_i32_0 : i32, i32, i32
  }
  func.func @transform_15(%arg0: i32, %arg1: i32) -> (i32, i32, i32) {
    %c0_i32 = arith.constant 0 : i32
    %c0_i32_0 = arith.constant 0 : i32
    %c0_i32_1 = arith.constant 0 : i32
    return %arg1, %c0_i32, %c0_i32_0 : i32, i32, i32
  }
  func.func @transform_16(%arg0: i32, %arg1: i32) -> (i32, i32, i32) {
    %c0_i32 = arith.constant 0 : i32
    %c0_i32_0 = arith.constant 0 : i32
    %c0_i32_1 = arith.constant 0 : i32
    return %arg1, %c0_i32, %c0_i32_0 : i32, i32, i32
  }
  func.func @transform_17(%arg0: i32, %arg1: i32) -> (i32, i32, i32) {
    %c0_i32 = arith.constant 0 : i32
    %c0_i32_0 = arith.constant 0 : i32
    %c0_i32_1 = arith.constant 0 : i32
    return %arg1, %c0_i32, %c0_i32_0 : i32, i32, i32
  }
  func.func @transform_18(%arg0: i32, %arg1: i32) -> (i32, i32, i32) {
    %c0_i32 = arith.constant 0 : i32
    %c0_i32_0 = arith.constant 0 : i32
    %c0_i32_1 = arith.constant 0 : i32
    return %arg1, %c0_i32, %c0_i32_0 : i32, i32, i32
  }
  func.func @transform_19(%arg0: i32, %arg1: i32) -> (i32, i32, i32) {
    %c0_i32 = arith.constant 0 : i32
    %c0_i32_0 = arith.constant 0 : i32
    %c0_i32_1 = arith.constant 0 : i32
    return %arg1, %c0_i32, %c0_i32_0 : i32, i32, i32
  }
  func.func @transform_20(%arg0: i32, %arg1: i32) -> (i32, i32, i32) {
    %c0_i32 = arith.constant 0 : i32
    %c0_i32_0 = arith.constant 0 : i32
    %c0_i32_1 = arith.constant 0 : i32
    return %arg1, %c0_i32, %c0_i32_0 : i32, i32, i32
  }
  func.func @transform_21(%arg0: i32, %arg1: i32) -> (i32, i32, i32) {
    %c0_i32 = arith.constant 0 : i32
    %c0_i32_0 = arith.constant 0 : i32
    %c0_i32_1 = arith.constant 0 : i32
    return %arg1, %c0_i32, %c0_i32_0 : i32, i32, i32
  }
  func.func @transform_22(%arg0: i32, %arg1: i32) -> (i32, i32, i32) {
    %c0_i32 = arith.constant 0 : i32
    %c0_i32_0 = arith.constant 0 : i32
    %c0_i32_1 = arith.constant 0 : i32
    return %arg1, %c0_i32, %c0_i32_0 : i32, i32, i32
  }
  func.func @transform_23(%arg0: i32, %arg1: i32) -> (i32, i32, i32) {
    %c0_i32 = arith.constant 0 : i32
    %c0_i32_0 = arith.constant 0 : i32
    %c0_i32_1 = arith.constant 0 : i32
    return %arg1, %c0_i32, %c0_i32_0 : i32, i32, i32
  }
  func.func @transform_24(%arg0: i32, %arg1: i32) -> (i32, i32, i32) {
    %c0_i32 = arith.constant 0 : i32
    %c0_i32_0 = arith.constant 0 : i32
    %c0_i32_1 = arith.constant 0 : i32
    return %arg1, %c0_i32, %c0_i32_0 : i32, i32, i32
  }
  func.func @transform_25(%arg0: i32, %arg1: i32) -> (i32, i32, i32) {
    %c0_i32 = arith.constant 0 : i32
    %c0_i32_0 = arith.constant 0 : i32
    %c0_i32_1 = arith.constant 0 : i32
    return %arg1, %c0_i32, %c0_i32_0 : i32, i32, i32
  }
  func.func @transform_26(%arg0: i32, %arg1: i32) -> (i32, i32, i32) {
    %c0_i32 = arith.constant 0 : i32
    %c0_i32_0 = arith.constant 0 : i32
    %c0_i32_1 = arith.constant 0 : i32
    return %arg1, %c0_i32, %c0_i32_0 : i32, i32, i32
  }
  func.func @transform_27(%arg0: i32, %arg1: i32) -> (i32, i32, i32) {
    %c0_i32 = arith.constant 0 : i32
    %c0_i32_0 = arith.constant 0 : i32
    %c0_i32_1 = arith.constant 0 : i32
    return %arg1, %c0_i32, %c0_i32_0 : i32, i32, i32
  }
  func.func @transform_28(%arg0: i32, %arg1: i32) -> (i32, i32, i32) {
    %c0_i32 = arith.constant 0 : i32
    %c0_i32_0 = arith.constant 0 : i32
    %c0_i32_1 = arith.constant 0 : i32
    return %arg1, %c0_i32, %c0_i32_0 : i32, i32, i32
  }
  func.func @transform_29(%arg0: i32, %arg1: i32) -> (i32, i32, i32) {
    %c0_i32 = arith.constant 0 : i32
    %c0_i32_0 = arith.constant 0 : i32
    %c0_i32_1 = arith.constant 0 : i32
    return %arg1, %c0_i32, %c0_i32_0 : i32, i32, i32
  }
  func.func @transform_30(%arg0: i32, %arg1: i32) -> (i32, i32, i32) {
    %c0_i32 = arith.constant 0 : i32
    %c0_i32_0 = arith.constant 0 : i32
    %c0_i32_1 = arith.constant 0 : i32
    return %arg1, %c0_i32, %c0_i32_0 : i32, i32, i32
  }
  func.func @transform_31(%arg0: i32, %arg1: i32) -> (i32, i32, i32) {
    %c0_i32 = arith.constant 0 : i32
    %c0_i32_0 = arith.constant 0 : i32
    %c0_i32_1 = arith.constant 0 : i32
    return %arg1, %c0_i32, %c0_i32_0 : i32, i32, i32
  }
  func.func @transform_32(%arg0: i32, %arg1: i32) -> (i32, i32, i32) {
    %c0_i32 = arith.constant 0 : i32
    %c0_i32_0 = arith.constant 0 : i32
    %c0_i32_1 = arith.constant 0 : i32
    return %arg1, %c0_i32, %c0_i32_0 : i32, i32, i32
  }
  func.func @transform_33(%arg0: i32, %arg1: i32) -> (i32, i32) {
    %c0_i32 = arith.constant 0 : i32
    %c0_i32_0 = arith.constant 0 : i32
    %c0_i32_1 = arith.constant 0 : i32
    return %c0_i32, %c0_i32_0 : i32, i32
  }
  func.func @transform_34(%arg0: i32, %arg1: i32) -> (i32, i32) {
    %c0_i32 = arith.constant 0 : i32
    %c0_i32_0 = arith.constant 0 : i32
    %c0_i32_1 = arith.constant 0 : i32
    return %c0_i32, %c0_i32_0 : i32, i32
  }
  func.func @transform_35(%arg0: i32, %arg1: i32) -> (i32, i32) {
    %c0_i32 = arith.constant 0 : i32
    %c0_i32_0 = arith.constant 0 : i32
    %c0_i32_1 = arith.constant 0 : i32
    return %c0_i32, %c0_i32_0 : i32, i32
  }
  func.func @transform_36(%arg0: i32, %arg1: i32) -> (i32, i32) {
    %c0_i32 = arith.constant 0 : i32
    %c0_i32_0 = arith.constant 0 : i32
    %c0_i32_1 = arith.constant 0 : i32
    return %c0_i32, %c0_i32_0 : i32, i32
  }
  func.func @transform_37(%arg0: i32, %arg1: i32) -> (i32, i32) {
    %c0_i32 = arith.constant 0 : i32
    %c0_i32_0 = arith.constant 0 : i32
    %c0_i32_1 = arith.constant 0 : i32
    return %c0_i32, %c0_i32_0 : i32, i32
  }
  func.func @transform_38(%arg0: i32, %arg1: i32) -> (i32, i32, i32) {
    %c0_i32 = arith.constant 0 : i32
    %c0_i32_0 = arith.constant 0 : i32
    %c0_i32_1 = arith.constant 0 : i32
    return %arg0, %c0_i32, %c0_i32_0 : i32, i32, i32
  }
}

</mosaic_0001>

<bundles_post_ra>
// kernel: two_stage_diffusion_forward.2
= control target key start
LH: loop header
LB: loop body
LE: loop exit
PB: predicated region body
PF: predicated region fallthrough
CT: control target
= control target key end

     0   :  { %s2152_s0 = inlined_call_operand.vmem [shape: f32[2,32], index: 0, kind: input, shape index: {}]   ;;  %s2153_s1 = inlined_call_operand.hbm [shape: f32[32,128], index: 1, kind: input, shape index: {}]   ;;  %s2154_s2 = inlined_call_operand.hbm [shape: f32[1,128], index: 2, kind: input, shape index: {}]   ;;  %s2155_s3 = inlined_call_operand.vmem [shape: f32[128,32], index: 3, kind: input, shape index: {}]   ;;  %s2156_s4 = inlined_call_operand.hbm [shape: f32[1,32], index: 4, kind: input, shape index: {}]   ;;  %s2157_s5 = inlined_call_operand.vmem [shape: f32[4,32,32], index: 5, kind: input, shape index: {}]   ;;  %s2158_s6 = inlined_call_operand.hbm [shape: f32[4,1,32], index: 6, kind: input, shape index: {}]   ;;  %s2159_s7 = inlined_call_operand.vmem [shape: f32[4,32,32], index: 7, kind: input, shape index: {}]   ;;  %s2160_s8 = inlined_call_operand.vmem [shape: f32[4,1,32], index: 8, kind: input, shape index: {}]   ;;  %s2161_s9 = inlined_call_operand.hbm [shape: f32[4,32,32], index: 9, kind: input, shape index: {}]   ;;  %s2162_s10 = inlined_call_operand.hbm [shape: f32[4,1,32], index: 10, kind: input, shape index: {}]   ;;  %s2163_s11 = inlined_call_operand.vmem [shape: f32[4,2,32], index: 11, kind: output, shape index: {0}]   ;;  %s2164_s12 = inlined_call_operand.vmem [shape: f32[4,2,32], index: 12, kind: output, shape index: {1}]  }
   0x1   :  { %2180 = sst [smem:[#allocation20_spill]] %s2152_s0 }
   0x2   :  { %2181 = sst [smem:[#allocation21_spill]] %s2153_s1 }
   0x3   :  { %2182 = sst [smem:[#allocation22_spill]] %s2154_s2 }
   0x4   :  { %2183 = sst [smem:[#allocation23_spill]] %s2155_s3 }
   0x5   :  { %18 = vsyncpa [#allocation4], 0 }
   0x6   :  { %19 = vsyncpa [#allocation6], 0 }
   0x7   :  { %20 = vsyncpa [#allocation9], 0 }
   0x8   :  { %22 = vsyncpa [#allocation9 + $0x1], 0 }
   0x9   :  { %23 = vsyncpa [#allocation12], 0 }
   0xa   :  { %25 = vsyncpa [#allocation12 + $0x1], 0  ;;  %s1778_s21 = smov 0   ;;  %s1780_s22 = smov 0  }
   0xb   :  { %s1782_s23 = smov 0   ;;  %s1784_s24 = smov 0  }
   0xc LB: > { %2184 = sst [smem:[#allocation17_spill]] %s1695_s23  ;;  %s1797_s25 = sadd.s32 4294967295, %s1699_s24   ;;  %s1699_s24 = sphi %s1784_s24, %s2213_s24   ;;  %s1695_s23 = sphi %s1782_s23, %s2215_s23   ;;  %s1691_s22 = sphi %s1780_s22, %s2217_s22   ;;  %s1687_s21 = sphi %s1778_s21, %s2216_s21  }
   0xd   : > { %p182_p0 = scmp.ne.s32.totalorder %s1691_s22, %s1687_s21  ;;  %p2170_p1 = scmp.eq.s32.totalorder %s1797_s25, 0 }
   0xe   : > { %p1249_p2 = scmp.ge.s32.totalorder %s1699_s24, 1  ;;  %p349_p3 = scmp.lt.s32.totalorder %s1699_s24, 5 }
   0xf   : > { %p1806_p5 = por %p2170_p1, %p182_p0  ;;  %s1701_s28 = smov [#allocation5]  }
  0x10   : > { %p1810_p6 = pnand %p1249_p2, %p349_p3  ;;  %s378_s29 = sshll.u32 %s1701_s28, 4  ;;  %s379_s29 = int_to_ptr.vmem [resolvable:$true] %s378_s29 }
  0x11   : > { %s2185_s26 = scalar_select %p1806_p5, 1, 0 }
  0x12   : > { %s2186_s27 = scalar_select %p1810_p6, 1, 0 }
  0x13   : > { %p1419_p7 = pneg %p1810_p6  ;;  %s1817_s30 = sadd.s32 1, %s1699_s24  }
  0x14   : > { %2187 = sst [smem:[#allocation18_spill]] %s1817_s30  ;;  %s166_s14 = ssub.s32 %s1699_s24, %s1817_s30 }
  0x15   : > { %p1821_p8 = pnand %p1419_p7, %p2170_p1  ;;  %p1827_p9 = scmp.eq.s32.totalorder %s166_s14, 0 }
  0x16   : > { %s169_s16 = sadd.s32 1, %s1695_s23  ;;  %p176_p10 = scmp.ne.s32.totalorder %s1695_s23, %s1691_s22 }
  0x17   : > { %s2188_s13 = scalar_select %p1821_p8, 1, 0 }
  0x18   : > { %p2171_p11 = pneg %p1821_p8  ;;  %s1502_s17 = scalar_lea.vmem %s379_s29, 16 }
  0x19   : > { %p1503_p12 = scmp.ne.s32.totalorder %s379_s29, %s1502_s17  ;;  %s1509_s18 = scalar_lea.vmem %s379_s29, 32 }
  0x1a   : > { %p1510_p2 = scmp.lt.s32.totalorder %s379_s29, %s379_s29  ;;  %p1511_p3 = scmp.lt.s32.totalorder %s1509_s18, %s1502_s17 }
  0x1b   : > { %p1505_p13 = pnand %p1503_p12, %p2171_p11 }
  0x1c   : > { %p1512_p7 = por %p1511_p3, %p1510_p2 }
  0x1d   : > { %p1506_p0 = pneg %p1505_p13 }
  0x1f   : > { %p1513_p4 = pnand %p1512_p7, %p1506_p0 }
  0x21   : > { %1516 = shalt.err (!%p1513_p4)
}
  0x22   : > { %s2190_s2 = sld [smem:[#allocation22_spill]]  ;;  %p177_p4 = scmp.eq.s32.totalorder %s1699_s24, 0 }
  0x23   : > { %s1847_s21 = scalar_select %p1827_p9, %s1695_s23, %s169_s16  }
  0x24   : > { %p1442_p12 = scmp.lt.s32.totalorder %s1699_s24, 4  ;;  %s411_s28 = sand.u32 1, %s1699_s24  }
  0x25   : > { %2191 = sst [smem:[#allocation19_spill]] %s1847_s21  ;;  %s1853_s14 = sand.u32 1, %s1695_s23  }
  0x26   : > { %p178_p13 = por %p177_p4, %p176_p10  ;;  %s2168_s17 = sshll.u32 %s1699_s24, 4 }
  0x27   : > { %s1864_s20 = scalar_lea.hbm %s2158_s6, %s2168_s17  ;;  %s1702_s21 = smov [#allocation3]  }
  0x28   : > { %1425 = dma.hbm_to_vmem [thread:$0]  (!%p1821_p8), %s2190_s2, 16, %s379_s29, [#allocation6]  }
  0x29   : > { %s414_s29 = scalar_lea.vmem [#allocation8], %s1853_s14  ;;  %p1869_p9 = pnand %p1442_p12, %p178_p13 }
  0x2a   : > { %s421_s15 = sshll.u32 %s414_s29, 4  ;;  %s364_s23 = sshll.u32 %s1702_s21, 4  ;;  %s1867_s15 = int_to_ptr.vmem [resolvable:$true] %s421_s15  ;;  %s365_s23 = int_to_ptr.vmem [resolvable:$true] %s364_s23 }
  0x2b   : > { %s1874_s30 = scalar_lea.sflag [#allocation9], %s411_s28  ;;  %s1517_s18 = scalar_lea.hbm %s1864_s20, 16 }
  0x2c   : > { %p1518_p10 = scmp.ne.s32.totalorder %s1864_s20, %s1517_s18  ;;  %p1880_p0 = pneg %p1869_p9 }
  0x2d   : > { %s1522_s0 = scalar_lea.hbm %s2158_s6, 64  ;;  %p1523_p7 = scmp.lt.s32.totalorder %s1864_s20, %s2158_s6 }
  0x2e   : > { %s2193_s19 = scalar_select %p1880_p0, 1, 0 }
  0x2f   : > { %p1520_p2 = pnand %p1880_p0, %p1518_p10  ;;  %p1524_p4 = scmp.lt.s32.totalorder %s1522_s0, %s1517_s18 }
  0x31   : > { %p1521_p3 = pneg %p1520_p2  ;;  %p1525_p12 = por %p1524_p4, %p1523_p7 }
  0x33   : > { %p1526_p13 = pnand %p1525_p12, %p1521_p3 }
  0x35   : > { %1529 = shalt.err (!%p1526_p13)
}
  0x36   : > { %s1530_s21 = scalar_lea.vmem %s1867_s15, 16  ;;  %s1703_s28 = smov [#allocation8]  }
  0x37   : > { %p1531_p1 = scmp.ne.s32.totalorder %s1867_s15, %s1530_s21  ;;  %s1535_s17 = sshll.u32 %s1703_s28, 4  ;;  %s1536_s17 = int_to_ptr.vmem [resolvable:$false] %s1535_s17 }
  0x38   : > { %s1537_s29 = scalar_lea.vmem %s1536_s17, 32  ;;  %p1538_p11 = scmp.lt.s32.totalorder %s1867_s15, %s1536_s17 }
  0x39   : > { %p1533_p10 = pnand %p1531_p1, %p1880_p0  ;;  %p1539_p5 = scmp.lt.s32.totalorder %s1537_s29, %s1530_s21 }
  0x3b   : > { %p1534_p2 = pneg %p1533_p10  ;;  %p1540_p6 = por %p1539_p5, %p1538_p11 }
  0x3d   : > { %p1541_p8 = pnand %p1540_p6, %p1534_p2 }
  0x3f   : > { %1544 = shalt.err (!%p1541_p8)
}
  0x40   : > { %1432 = dma.hbm_to_vmem [thread:$0]  (!%p1869_p9), %s1864_s20, 16, %s1867_s15, %s1874_s30  }
  0x41   : > { %s1556_s0 = scalar_lea.vmem %s365_s23, 512  ;;  %p2194_p3 = scmp.ne.s32.totalorder %s2188_s13, 0 }
  0x42   : > { %p1557_p1 = scmp.ne.s32.totalorder %s365_s23, %s1556_s0  ;;  %p1564_p13 = scmp.lt.s32.totalorder %s365_s23, %s365_s23 }
  0x43   : > { %p2195_p7 = pneg %p2194_p3  ;;  %p1565_p10 = scmp.lt.s32.totalorder %s1556_s0, %s1556_s0 }
  0x45   : > { %p1559_p4 = pnand %p1557_p1, %p2195_p7  ;;  %p1566_p0 = por %p1565_p10, %p1564_p13 }
  0x47   : > { %p1560_p12 = pneg %p1559_p4 }
  0x49   : > { %p1567_p5 = pnand %p1566_p0, %p1560_p12 }
  0x4b   : > { %1570 = shalt.err (!%p1567_p5)
}
  0x4c   : > { %s2178_s2 = smov 128   ;;  %s2179_s3 = smov 8  }
  0x4d   : > { %s2196_s1 = sld [smem:[#allocation21_spill]]  ;;  %s1706_s18 = smov [#allocation7]  }
  0x4e   : > { %s392_s21 = sshll.u32 %s1706_s18, 4  ;;  %s1282_s28 = sshll.u32 %s1699_s24, 9  ;;  %s393_s21 = int_to_ptr.vmem [resolvable:$true] %s392_s21 }
  0x4f   : > { %s1582_s17 = scalar_lea.vmem %s393_s21, 16  ;;  %p2197_p8 = pmov %p2195_p7 }
  0x50   : > { %p1583_p6 = scmp.ne.s32.totalorder %s393_s21, %s1582_s17  ;;  %s1589_s29 = scalar_lea.vmem %s393_s21, 32 }
  0x51   : > { %p1590_p2 = scmp.lt.s32.totalorder %s393_s21, %s393_s21  ;;  %p1591_p1 = scmp.lt.s32.totalorder %s1589_s29, %s1582_s17 }
  0x52   : > { %p1585_p11 = pnand %p1583_p6, %p2197_p8 }
  0x53   : > { %1422 = dma.hbm_to_vmem [thread:$0]  (!%p2194_p3), %s2196_s1, 512, %s365_s23, [#allocation4], %s2178_s2, %s2178_s2, %s2179_s3  }
  0x54   : > { %p1586_p0 = pneg %p1585_p11  ;;  %p1592_p7 = por %p1591_p1, %p1590_p2 }
  0x56   : > { %p1593_p4 = pnand %p1592_p7, %p1586_p0 }
  0x58   : > { %1596 = shalt.err (!%p1593_p4)
}
  0x59   : > { %1428 = dma.hbm_to_vmem [thread:$0]  (!%p2194_p3), %s2156_s4, 16, %s393_s21, [#allocation6]  }
  0x5a   : > { %s1926_s18 = scalar_lea.hbm %s2161_s9, %s1282_s28  ;;  %s2198_s2 = sshll.u32 %s1853_s14, 5 }
  0x5b   : > { %s446_s17 = scalar_lea.vmem [#allocation10], %s2198_s2  ;;  %s1597_s3 = scalar_lea.hbm %s1926_s18, 512 }
  0x5c   : > { %s453_s29 = sshll.u32 %s446_s17, 4  ;;  %p1598_p12 = scmp.ne.s32.totalorder %s1926_s18, %s1597_s3  ;;  %s454_s29 = int_to_ptr.vmem [resolvable:$true] %s453_s29 }
  0x5d   : > { %p2199_p13 = scmp.ne.s32.totalorder %s2193_s19, 0  ;;  %s1602_s21 = scalar_lea.hbm %s2161_s9, 2048 }
  0x5e   : > { %p1603_p3 = scmp.lt.s32.totalorder %s1926_s18, %s2161_s9  ;;  %p1604_p6 = scmp.lt.s32.totalorder %s1602_s21, %s1597_s3 }
  0x5f   : > { %p1600_p10 = pnand %p1598_p12, %p2199_p13 }
  0x60   : > { %p1605_p8 = por %p1604_p6, %p1603_p3 }
  0x61   : > { %p1601_p5 = pneg %p1600_p10 }
  0x63   : > { %p1606_p11 = pnand %p1605_p8, %p1601_p5 }
  0x65   : > { %1609 = shalt.err (!%p1606_p11)
}
  0x66   : > { %s1610_s2 = scalar_lea.vmem %s454_s29, 512  ;;  %s1707_s28 = smov [#allocation10]  }
  0x67   : > { %p1611_p0 = scmp.ne.s32.totalorder %s454_s29, %s1610_s2  ;;  %s1615_s15 = sshll.u32 %s1707_s28, 4  ;;  %s1616_s15 = int_to_ptr.vmem [resolvable:$false] %s1615_s15 }
  0x68   : > { %s1617_s17 = scalar_lea.vmem %s1616_s15, 1024  ;;  %p1618_p7 = scmp.lt.s32.totalorder %s454_s29, %s1616_s15 }
  0x69   : > { %p1613_p2 = pnand %p1611_p0, %p2199_p13  ;;  %p1619_p4 = scmp.lt.s32.totalorder %s1617_s17, %s1610_s2 }
  0x6b   : > { %p1614_p1 = pneg %p1613_p2  ;;  %p1620_p12 = por %p1619_p4, %p1618_p7 }
  0x6d   : > { %p1621_p10 = pnand %p1620_p12, %p1614_p1 }
  0x6f   : > { %1624 = shalt.err (!%p1621_p10)
}
  0x70   : > { %s2200_s3 = smov 8   ;;  %s2201_s13 = smov 128  }
  0x71   : > { %1435 = dma.hbm_to_vmem [thread:$0]  (!%p1869_p9), %s1926_s18, 512, %s454_s29, %s1874_s30, %s2201_s13, %s2201_s13, %s2200_s3  }
  0x72   : > { %s2202_s0 = sshll.u32 %s1699_s24, 4  ;;  %s466_s2 = scalar_lea.vmem [#allocation11], %s1853_s14 }
  0x73   : > { %s1955_s20 = scalar_lea.hbm %s2162_s10, %s2202_s0  ;;  %s473_s28 = sshll.u32 %s466_s2, 4  ;;  %s474_s28 = int_to_ptr.vmem [resolvable:$true] %s473_s28 }
  0x74   : > { %s464_s15 = scalar_lea.sflag [#allocation12], %s1853_s14  ;;  %s1625_s17 = scalar_lea.hbm %s1955_s20, 16 }
  0x75   : > { %p1626_p5 = scmp.ne.s32.totalorder %s1955_s20, %s1625_s17  ;;  %s1630_s24 = scalar_lea.hbm %s2162_s10, 64 }
  0x76   : > { %p1631_p8 = scmp.lt.s32.totalorder %s1955_s20, %s2162_s10  ;;  %p1632_p11 = scmp.lt.s32.totalorder %s1630_s24, %s1625_s17 }
  0x77   : > { %p1628_p3 = pnand %p1626_p5, %p2199_p13 }
  0x78   : > { %p1633_p0 = por %p1632_p11, %p1631_p8 }
  0x79   : > { %p1629_p6 = pneg %p1628_p3 }
  0x7b   : > { %p1634_p2 = pnand %p1633_p0, %p1629_p6 }
  0x7d   : > { %1637 = shalt.err (!%p1634_p2)
}
  0x7e   : > { %s1638_s3 = scalar_lea.vmem %s474_s28, 16  ;;  %s1708_s14 = smov [#allocation11]  }
  0x7f   : > { %p1639_p1 = scmp.ne.s32.totalorder %s474_s28, %s1638_s3  ;;  %s1643_s13 = sshll.u32 %s1708_s14, 4  ;;  %s1644_s13 = int_to_ptr.vmem [resolvable:$false] %s1643_s13 }
  0x80   : > { %s1645_s0 = scalar_lea.vmem %s1644_s13, 32  ;;  %p1646_p12 = scmp.lt.s32.totalorder %s474_s28, %s1644_s13 }
  0x81   : > { %p1641_p7 = pnand %p1639_p1, %p2199_p13  ;;  %p1647_p10 = scmp.lt.s32.totalorder %s1645_s0, %s1638_s3 }
  0x83   : > { %p1642_p4 = pneg %p1641_p7  ;;  %p1648_p5 = por %p1647_p10, %p1646_p12 }
  0x85   : > { %p1649_p3 = pnand %p1648_p5, %p1642_p4 }
  0x87   : > { %1652 = shalt.err (!%p1649_p3)
}
  0x88   : > { %1438 = dma.hbm_to_vmem [thread:$0]  (!%p1869_p9), %s1955_s20, 16, %s474_s28, %s464_s15  }
  0x89   : > { %p2203_p6 = scmp.ne.s32.totalorder %s2186_s27, 0 }
  0x8a   : > { %p2204_p8 = scmp.eq.s32.totalorder (!%p2203_p6), %s1797_s25, 0 }
  0x8b   : > { %482 = sbr.rel (%p2203_p6) target bundleno = 1004 (0x3ec), region = 64 }
  0x90   : > { %1670 = dma.done.wait (%p2204_p8), [#allocation4], 512   ;;  %p2205_p13 = pmov %p2204_p8 }
  0x91   : > { %p2206_p11 = pmov %p2204_p8 }
  0x92   : > { %1672 = vsyncadd (%p2205_p13), [#allocation4], 4294966784 }
  0x93   : > { %1674 = dma.done.wait (%p2206_p11), [#allocation6], 32   ;;  %p2207_p0 = pmov %p2204_p8 }
  0x94   : > { %s496_s1 = sand.u32 1, %s1797_s25   ;;  %s1987_s16 = sand.u32 1, %s1691_s22  }
  0x95   : > { %1676 = vsyncadd (%p2207_p0), [#allocation6], 4294967264  ;;  %s497_s27 = scalar_lea.sflag [#allocation9], %s496_s1  ;;  %s499_s19 = scalar_lea.vmem [#allocation8], %s1987_s16 }
  0x96   : > { %p2208_p9 = scmp.ne.s32.totalorder %s2185_s26, 0 }
  0x98   : > { %1678 = dma.done.wait (%p2208_p9), %s497_s27, 528  }
  0x99   : > { %1680 = vsyncadd (%p2208_p9), %s497_s27, 4294966768  ;;  %s1263_s21 = sshll.u32 %s1987_s16, 5  ;;  %s514_s20 = scalar_lea.sflag [#allocation12], %s1987_s16 }
  0x9a   : > { %s1995_s23 = scalar_lea.vmem [#allocation10], %s1263_s21 }
  0x9b   : > { %1682 = dma.done.wait (%p2208_p9), %s514_s20, 16  }
  0x9c   : > { %1684 = vsyncadd (%p2208_p9), %s514_s20, 4294967280  ;;  %p581_p2 = scmp.lt.s32.totalorder %s1797_s25, 3  ;;  %p2209_p1 = scmp.ne.s32.totalorder %s1797_s25, 0 }
  0x9d   : > { %s2210_s18 = sld [smem:[#allocation23_spill]] (!%p2209_p1) }
  0x9e   : > { %s2005_s28 = scalar_select %p581_p2, %s1797_s25, 3 }
  0x9f   : > { %605 = sbr.rel (%p2209_p1) target bundleno = 584 (0x248), region = 92  ;;  %s2211_s1 = sld [smem:[#allocation20_spill]] (!%p2209_p1) }
  0xa0   : > { %s1283_s15 = sshll.u32 %s2005_s28, 5  ;;  %s593_s24 = scalar_lea.vmem %s2160_s8, %s2005_s28 }
  0xa1   : > { %s2015_s3 = scalar_lea.vmem %s2157_s5, %s1283_s15  ;;  %s2020_s13 = scalar_lea.vmem %s2159_s7, %s1283_s15 }
  0xa2   : > { %s1268_s0 = sshll.u32 %s2005_s28, 1 }
  0xa3   : > { %s2026_s21 = scalar_lea.vmem %s2163_s11, %s1268_s0  ;;  %s2031_s17 = scalar_lea.vmem %s2164_s12, %s1268_s0 }
  0xa4   : > { %v610_v0 = vld [vmem:[#allocation3 + $0x18] sm:$0xff]  ;;  %v1709_v1 = vmov 0.0   ;;  %v609_v2 = vld [vmem:[#allocation3 + $0x10] sm:$0xff]  ;;  %vm1710_vm0 = vmmov 0   ;;  %v608_v5 = vld [vmem:[#allocation3 + $0x8] sm:$0xff]  ;;  %vm618_vm1 = vcmask 261120  }
  0xa5   : > { %1322 = vmatprep.subr.mxu0 %v1709_v1  ;;  %1330 = vmatprep.mubr.msk.f32.mxu0 %vm1710_vm0, %v1709_v1  ;;  %v712_v3 = vld [vmem:[%s2210_s18 + $0x78] sm:$0xff]  ;;  %v711_v4 = vld [vmem:[%s2210_s18 + $0x70] sm:$0xff]  ;;  %v710_v6 = vld [vmem:[%s2210_s18 + $0x68] sm:$0xff]  ;;  %vm790_vm2 = vcmask 254976  }
  0xa6   : > { %1323 = vmatpush3.msra.mxu0 %v610_v0  ;;  %1333 = vmatprep.subr.mxu1 %v1709_v1  ;;  %v607_v7 = vld [vmem:[#allocation3] sm:$0xff]  ;;  %v606_v8 = vld [vmem:[%s2211_s1] sm:$0x3]  ;;  %v708_v10 = vld [vmem:[%s2210_s18 + $0x58] sm:$0xff] }
  0xa7   : > { %1324 = vmatprep.subr.mxu0 %v1709_v1  ;;  %1334 = vmatpush3.msra.mxu1 %v712_v3  ;;  %v709_v9 = vld [vmem:[%s2210_s18 + $0x60] sm:$0xff]  ;;  %v707_v11 = vld [vmem:[%s2210_s18 + $0x50] sm:$0xff]  ;;  %v706_v12 = vld [vmem:[%s2210_s18 + $0x48] sm:$0xff] }
  0xa8   : > { %1325 = vmatpush3.msra.mxu0 %v609_v2  ;;  %1335 = vmatprep.subr.mxu1 %v1709_v1  ;;  %v705_v13 = vld [vmem:[%s2210_s18 + $0x40] sm:$0xff]  ;;  %v704_v14 = vld [vmem:[%s2210_s18 + $0x38] sm:$0xff]  ;;  %v703_v15 = vld [vmem:[%s2210_s18 + $0x30] sm:$0xff] }
  0xa9   : > { %1326 = vmatprep.subr.mxu0 %v1709_v1  ;;  %1336 = vmatpush3.msra.mxu1 %v711_v4  ;;  %v702_v16 = vld [vmem:[%s2210_s18 + $0x28] sm:$0xff]  ;;  %v701_v17 = vld [vmem:[%s2210_s18 + $0x20] sm:$0xff]  ;;  %v700_v18 = vld [vmem:[%s2210_s18 + $0x18] sm:$0xff] }
  0xaa   : > { %1327 = vmatpush3.msra.mxu0 %v608_v5  ;;  %1337 = vmatprep.subr.mxu1 %v1709_v1  ;;  %v699_v19 = vld [vmem:[%s2210_s18 + $0x10] sm:$0xff]  ;;  %v698_v20 = vld [vmem:[%s2210_s18 + $0x8] sm:$0xff]  ;;  %v697_v21 = vld [vmem:[%s2210_s18] sm:$0xff] }
  0xab   : > { %1328 = vmatprep.subr.mxu0 %v1709_v1  ;;  %1338 = vmatpush3.msra.mxu1 %v710_v6  ;;  %v1271_v22 = vld [vmem:[#allocation5] ss:$0 sm:$0xff]  ;;  %v1273_v31 = vld [vmem:[#allocation7] ss:$0 sm:$0xff] }
  0xac   : > { %1329 = vmatpush3.msra.mxu0 %v607_v7  ;;  %1339 = vmatprep.subr.mxu1 %v1709_v1 }
  0xad   : > { %1331 = vmatmul.mubr.msk.f32.vlgmr.msra.gmra.mxu0 %vm618_vm1, %v606_v8  ;;  %1340 = vmatpush3.msra.mxu1 %v709_v9 }
  0xae   : > { %1341 = vmatprep.subr.mxu1 %v1709_v1  ;;  %1365 = vmatprep.mubr.msk.f32.mxu1 %vm1710_vm0, %v1709_v1 }
  0xaf   : > { %1342 = vmatpush3.msra.mxu1 %v708_v10 }
  0xb0   : > { %1343 = vmatprep.subr.mxu1 %v1709_v1 }
  0xb1   : > { %1344 = vmatpush3.msra.mxu1 %v707_v11 }
  0xb2   : > { %1345 = vmatprep.subr.mxu1 %v1709_v1 }
  0xb3   : > { %1346 = vmatpush3.msra.mxu1 %v706_v12 }
  0xb4   : > { %1347 = vmatprep.subr.mxu1 %v1709_v1 }
  0xb5   : > { %1348 = vmatpush3.msra.mxu1 %v705_v13 }
  0xb6   : > { %1349 = vmatprep.subr.mxu1 %v1709_v1 }
  0xb7   : > { %1350 = vmatpush3.msra.mxu1 %v704_v14 }
  0xb8   : > { %1351 = vmatprep.subr.mxu1 %v1709_v1 }
  0xb9   : > { %1352 = vmatpush3.msra.mxu1 %v703_v15 }
  0xba   : > { %1353 = vmatprep.subr.mxu1 %v1709_v1 }
  0xbb   : > { %1354 = vmatpush3.msra.mxu1 %v702_v16 }
  0xbc   : > { %1355 = vmatprep.subr.mxu1 %v1709_v1 }
  0xbd   : > { %1356 = vmatpush3.msra.mxu1 %v701_v17 }
  0xbe   : > { %1357 = vmatprep.subr.mxu1 %v1709_v1 }
  0xbf   : > { %1358 = vmatpush3.msra.mxu1 %v700_v18 }
  0xc0   : > { %1359 = vmatprep.subr.mxu1 %v1709_v1 }
  0xc1   : > { %1360 = vmatpush3.msra.mxu1 %v699_v19 }
  0xc2   : > { %1361 = vmatprep.subr.mxu1 %v1709_v1 }
  0xc3   : > { %1362 = vmatpush3.msra.mxu1 %v698_v20 }
  0xc4   : > { %1363 = vmatprep.subr.mxu1 %v1709_v1 }
  0xc5   : > { %1364 = vmatpush3.msra.mxu1 %v697_v21 }
 0x16d   : > { %v688_v23 = vpop.f32.mrf.mxu0 }
 0x16e   : > { %v689_v24 = vadd.f32 %v1271_v22, %v688_v23 }
 0x16f   : > { %v1332_v25 = vpop.f32.mrf.mxu0 }
 0x170   : > { %v693_v26 = vmul.f32 0.70710677, %v689_v24  ;;  %v692_v28 = vmul.f32 0.5, %v689_v24 }
 0x172   : > { %1487 = verf.f32 %v693_v26 }
 0x17f   : > { %v1488_v27 = vpop.eup %1487 }
 0x180   : > { %v695_v29 = vadd.f32 1.0, %v1488_v27 }
 0x182   : > { %v696_v30 = vmul.f32 %v695_v29, %v692_v28 }
 0x184   : > { %1366 = vmatmul.mubr.f32.vlgmr.msra.gmra.mxu1 %v696_v30 }
 0x244   : > { %v786_v32 = vpop.f32.mrf.mxu1 }
 0x245   : > { %v787_v33 = vadd.f32 %v1273_v31, %v786_v32 }
 0x246   : > { %v1367_v34 = vpop.f32.mrf.mxu1 }
 0x247   : > { %791 = vst.msk [vmem:[#allocation2] sm:$0x3] %vm790_vm2, %v787_v33 }
 0x248 PF: > { %v796_v35 = vld [vmem:[%s2015_s3 + $0x18] sm:$0xff]  ;;  %v1711_v36 = vmov 0.0   ;;  %v795_v37 = vld [vmem:[%s2015_s3 + $0x10] sm:$0xff]  ;;  %vm1712_vm3 = vmmov 0   ;;  %v794_v38 = vld [vmem:[%s2015_s3 + $0x8] sm:$0xff]  ;;  %vm804_vm4 = vcmask 261120  }
 0x249   : > { %1368 = vmatprep.subr.mxu0 %v1711_v36  ;;  %1376 = vmatprep.mubr.msk.f32.mxu0 %vm1712_vm3, %v1711_v36  ;;  %v793_v39 = vld [vmem:[%s2015_s3] sm:$0xff]  ;;  %v886_v41 = vld [vmem:[%s2020_s13 + $0x18] sm:$0xff]  ;;  %v885_v43 = vld [vmem:[%s2020_s13 + $0x10] sm:$0xff]  ;;  %vm967_vm5 = vcmask 254976  }
 0x24a   : > { %1369 = vmatpush3.msra.mxu0 %v796_v35  ;;  %1379 = vmatprep.subr.mxu1 %v1711_v36  ;;  %v972_v42 = vld [vmem:[%s1995_s23 + $0x18] sm:$0xff]  ;;  %v971_v44 = vld [vmem:[%s1995_s23 + $0x10] sm:$0xff]  ;;  %v884_v45 = vld [vmem:[%s2020_s13 + $0x8] sm:$0xff] }
 0x24b   : > { %1370 = vmatprep.subr.mxu0 %v1711_v36  ;;  %1387 = vmatprep.mubr.msk.f32.mxu1 %vm1712_vm3, %v1711_v36  ;;  %v970_v46 = vld [vmem:[%s1995_s23 + $0x8] sm:$0xff]  ;;  %v883_v47 = vld [vmem:[%s2020_s13] sm:$0xff]  ;;  %v969_v48 = vld [vmem:[%s1995_s23] sm:$0xff] }
 0x24c   : > { %1371 = vmatpush3.msra.mxu0 %v795_v37  ;;  %1380 = vmatpush3.msra.mxu1 %v886_v41  ;;  %v1274_v49 = vld [vmem:[%s499_s19] ss:$0 sm:$0xff]  ;;  %s2212_s19 = scalar_lea.vmem [#allocation11], %s1987_s16 }
 0x24d   : > { %1372 = vmatprep.subr.mxu0 %v1711_v36  ;;  %1381 = vmatprep.subr.mxu1 %v1711_v36  ;;  %v1276_v58 = vld [vmem:[%s593_s24] ss:$0 sm:$0xff] }
 0x24e   : > { %1373 = vmatpush3.msra.mxu0 %v794_v38  ;;  %v792_v40 = vld [vmem:[#allocation2] sm:$0x3]  ;;  %1382 = vmatpush3.msra.mxu1 %v885_v43 }
 0x24f   : > { %1374 = vmatprep.subr.mxu0 %v1711_v36  ;;  %1383 = vmatprep.subr.mxu1 %v1711_v36  ;;  %v1278_v59 = vld [vmem:[%s2212_s19] ss:$0 sm:$0xff] }
 0x250   : > { %1375 = vmatpush3.msra.mxu0 %v793_v39  ;;  %1384 = vmatpush3.msra.mxu1 %v884_v45 }
 0x251   : > { %1377 = vmatmul.mubr.msk.f32.vlgmr.msra.gmra.mxu0 %vm804_vm4, %v792_v40  ;;  %1390 = vmatprep.subr.mxu0 %v1711_v36 }
 0x252   : > { %1398 = vmatprep.mubr.msk.f32.mxu0 %vm1712_vm3, %v1711_v36  ;;  %1391 = vmatpush3.msra.mxu0 %v972_v42 }
 0x253   : > { %1392 = vmatprep.subr.mxu0 %v1711_v36  ;;  %1385 = vmatprep.subr.mxu1 %v1711_v36 }
 0x254   : > { %1393 = vmatpush3.msra.mxu0 %v971_v44  ;;  %1386 = vmatpush3.msra.mxu1 %v883_v47 }
 0x255   : > { %1394 = vmatprep.subr.mxu0 %v1711_v36 }
 0x256   : > { %1395 = vmatpush3.msra.mxu0 %v970_v46 }
 0x257   : > { %1396 = vmatprep.subr.mxu0 %v1711_v36 }
 0x258   : > { %1397 = vmatpush3.msra.mxu0 %v969_v48 }
 0x311   : > { %v874_v50 = vpop.f32.mrf.mxu0 }
 0x312   : > { %v875_v51 = vadd.f32 %v1274_v49, %v874_v50 }
 0x313   : > { %v1378_v52 = vpop.f32.mrf.mxu0 }
 0x314   : > { %v879_v53 = vmul.f32 0.70710677, %v875_v51  ;;  %v878_v55 = vmul.f32 0.5, %v875_v51 }
 0x316   : > { %1489 = verf.f32 %v879_v53 }
 0x323   : > { %v1490_v54 = vpop.eup %1489 }
 0x324   : > { %v881_v56 = vadd.f32 1.0, %v1490_v54 }
 0x326   : > { %v882_v57 = vmul.f32 %v881_v56, %v878_v55 }
 0x328   : > { %1388 = vmatmul.mubr.msk.f32.vlgmr.msra.gmra.mxu1 %vm804_vm4, %v882_v57  ;;  %1399 = vmatmul.mubr.msk.f32.vlgmr.msra.gmra.mxu0 %vm804_vm4, %v882_v57 }
 0x3e8   : > { %v963_v60 = vpop.f32.mrf.mxu1  ;;  %v1046_v61 = vpop.f32.mrf.mxu0 }
 0x3e9   : > { %v964_v62 = vadd.f32 %v1276_v58, %v963_v60  ;;  %v1047_v63 = vadd.f32 %v1278_v59, %v1046_v61 }
 0x3ea   : > { %v1389_v0 = vpop.f32.mrf.mxu1  ;;  %v1400_v1 = vpop.f32.mrf.mxu0 }
 0x3eb   : > { %968 = vst.msk [vmem:[%s2026_s21] sm:$0x3] %vm967_vm5, %v964_v62  ;;  %1050 = vst.msk [vmem:[%s2031_s17] sm:$0x3] %vm967_vm5, %v1047_v63 }
 0x3ec PF: > { %s2213_s24 = sld [smem:[#allocation18_spill]]  ;;  %s2216_s21 = smov %s1691_s22 }
 0x3ed   : > { %s2214_s13 = sld [smem:[#allocation17_spill]] }
 0x3ee   : > { %s2215_s23 = sld [smem:[#allocation19_spill]] }
 0x3f2   : > { %p28_p7 = scmp.ge.s32.totalorder %s2213_s24, 6  }
 0x3f3   : > { %s2217_s22 = smov %s2214_s13 }
 0x3f4   :  { %30 = sbr.rel (!%p28_p7) target bundleno = 12 (0xc), region = 166 }
 0x3f9   :  { %1084 = vsyncpa [#allocation4], 1 }
 0x3fa   :  { %1086 = vsyncpa [#allocation4 + $0x1], 1 }
 0x3fb   :  { %1087 = vsyncpa [#allocation6], 1 }
 0x3fc   :  { %1088 = vsyncpa [#allocation9], 1 }
 0x3fd   :  { %1090 = vsyncpa [#allocation9 + $0x1], 1 }
 0x3fe   :  { %1091 = vsyncpa [#allocation12], 1 }
 0x3ff   :  { %1093 = vsyncpa [#allocation12 + $0x1], 1 }

// kernel: two_stage_diffusion_forward.3
= control target key start
LH: loop header
LB: loop body
LE: loop exit
PB: predicated region body
PF: predicated region fallthrough
CT: control target
= control target key end

     0   :  { %s6424_s6 = smov 1   ;;  %s6425_s10 = smov 2   ;;  %s7381_s0 = inlined_call_operand.smem [shape: u32[39], index: -1, kind: input, shape index: {}] }
   0x1   :  { %s6505_s5 = sld [smem:[%s7381_s0]]   ;;  %s6426_s14 = smov 3  }
   0x2   :  { %s6510_s9 = sld [smem:[%s7381_s0 + %s6424_s6]]   ;;  %s6427_s18 = smov 4  }
   0x3   :  { %s6515_s13 = sld [smem:[%s7381_s0 + %s6425_s10]]   ;;  %s6428_s22 = smov 5  }
   0x4   :  { %s6520_s17 = sld [smem:[%s7381_s0 + %s6426_s14]]   ;;  %s6429_s26 = smov 6  }
   0x5   :  { %s6525_s21 = sld [smem:[%s7381_s0 + %s6427_s18]]   ;;  %s6430_s30 = smov 7  }
   0x6   :  { %s6530_s25 = sld [smem:[%s7381_s0 + %s6428_s22]]   ;;  %s6431_s4 = smov 8  }
   0x7   :  { %7409 = sst [smem:[#allocation7_spill]] %s6505_s5  ;;  %s6432_s10 = smov 9  }
   0x8   :  { %7410 = sst [smem:[#allocation8_spill]] %s6510_s9  ;;  %s6433_s15 = smov 10  }
   0x9   :  { %7411 = sst [smem:[#allocation9_spill]] %s6515_s13  ;;  %s6434_s20 = smov 11  }
   0xa   :  { %7412 = sst [smem:[#allocation10_spill]] %s6520_s17  ;;  %s6436_s1 = smov 13  }
   0xb   :  { %7413 = sst [smem:[#allocation11_spill]] %s6525_s21  ;;  %s6437_s7 = smov 14  }
   0xc   :  { %7414 = sst [smem:[#allocation12_spill]] %s6530_s25  ;;  %s6439_s22 = smov 16  }
   0xd   :  { %s6535_s29 = sld [smem:[%s7381_s0 + %s6429_s26]]   ;;  %s6435_s26 = smov 12  }
   0xe   :  { %s6540_s3 = sld [smem:[%s7381_s0 + %s6430_s30]]   ;;  %s6440_s28 = smov 17  }
   0xf   :  { %s6545_s8 = sld [smem:[%s7381_s0 + %s6431_s4]]  }
  0x10   :  { %s6550_s14 = sld [smem:[%s7381_s0 + %s6432_s10]]  }
  0x11   :  { %s6555_s19 = sld [smem:[%s7381_s0 + %s6433_s15]]   ;;  %s6438_s15 = smov 15  }
  0x12   :  { %s6560_s24 = sld [smem:[%s7381_s0 + %s6434_s20]]  }
  0x13   :  { %7415 = sst [smem:[#allocation13_spill]] %s6535_s29 }
  0x14   :  { %7416 = sst [smem:[#allocation14_spill]] %s6540_s3 }
  0x15   :  { %7417 = sst [smem:[#allocation15_spill]] %s6545_s8 }
  0x16   :  { %7418 = sst [smem:[#allocation16_spill]] %s6550_s14 }
  0x17   :  { %7419 = sst [smem:[#allocation17_spill]] %s6555_s19 }
  0x18   :  { %7420 = sst [smem:[#allocation18_spill]] %s6560_s24 }
  0x19   :  { %s6565_s30 = sld [smem:[%s7381_s0 + %s6435_s26]]  }
  0x1a   :  { %s6570_s6 = sld [smem:[%s7381_s0 + %s6436_s1]]  }
  0x1b   :  { %s6575_s12 = sld [smem:[%s7381_s0 + %s6437_s7]]   ;;  %s6441_s7 = smov 18  }
  0x1c   :  { %s6580_s20 = sld [smem:[%s7381_s0 + %s6438_s15]]   ;;  %s6442_s15 = smov 19  }
  0x1d   :  { %s6585_s27 = sld [smem:[%s7381_s0 + %s6439_s22]]   ;;  %s6443_s22 = smov 20  }
  0x1e   :  { %s6590_s4 = sld [smem:[%s7381_s0 + %s6440_s28]]   ;;  %s6444_s28 = smov 21  }
  0x1f   :  { %7421 = sst [smem:[#allocation19_spill]] %s6565_s30 }
  0x20   :  { %7422 = sst [smem:[#allocation20_spill]] %s6570_s6 }
  0x21   :  { %7423 = sst [smem:[#allocation21_spill]] %s6575_s12 }
  0x22   :  { %7424 = sst [smem:[#allocation22_spill]] %s6580_s20 }
  0x23   :  { %7425 = sst [smem:[#allocation23_spill]] %s6585_s27 }
  0x24   :  { %7426 = sst [smem:[#allocation24_spill]] %s6590_s4 }
  0x25   :  { %s6595_s13 = sld [smem:[%s7381_s0 + %s6441_s7]]   ;;  %s6445_s7 = smov 22  }
  0x26   :  { %s6600_s9 = sld [smem:[%s7381_s0 + %s6442_s15]]   ;;  %s6446_s15 = smov 23  }
  0x27   :  { %s6605_s27 = sld [smem:[%s7381_s0 + %s6443_s22]]   ;;  %s6447_s22 = smov 24  }
  0x28   :  { %s6610_s4 = sld [smem:[%s7381_s0 + %s6444_s28]]   ;;  %s6448_s28 = smov 25  }
  0x2b   :  { %7427 = sst [smem:[#allocation25_spill]] %s6595_s13 }
  0x2c   :  { %7428 = sst [smem:[#allocation26_spill]] %s6600_s9 }
  0x2d   :  { %7429 = sst [smem:[#allocation27_spill]] %s6605_s27 }
  0x2e   :  { %7430 = sst [smem:[#allocation28_spill]] %s6610_s4 }
  0x2f   :  { %s6615_s13 = sld [smem:[%s7381_s0 + %s6445_s7]]   ;;  %s6449_s7 = smov 26  }
  0x30   :  { %s6620_s9 = sld [smem:[%s7381_s0 + %s6446_s15]]   ;;  %s6450_s15 = smov 27  }
  0x31   :  { %s6625_s27 = sld [smem:[%s7381_s0 + %s6447_s22]]   ;;  %s6451_s22 = smov 28  }
  0x32   :  { %s6630_s4 = sld [smem:[%s7381_s0 + %s6448_s28]]   ;;  %s6452_s28 = smov 29  }
  0x35   :  { %7431 = sst [smem:[#allocation29_spill]] %s6615_s13 }
  0x36   :  { %7432 = sst [smem:[#allocation30_spill]] %s6620_s9 }
  0x37   :  { %7433 = sst [smem:[#allocation31_spill]] %s6625_s27 }
  0x38   :  { %7434 = sst [smem:[#allocation32_spill]] %s6630_s4 }
  0x39   :  { %s6635_s13 = sld [smem:[%s7381_s0 + %s6449_s7]]   ;;  %s6453_s7 = smov 30  }
  0x3a   :  { %s6640_s9 = sld [smem:[%s7381_s0 + %s6450_s15]]   ;;  %s6454_s15 = smov 31  }
  0x3b   :  { %s6645_s27 = sld [smem:[%s7381_s0 + %s6451_s22]]   ;;  %s6455_s22 = smov 32  }
  0x3c   :  { %s6650_s4 = sld [smem:[%s7381_s0 + %s6452_s28]]   ;;  %s6456_s28 = smov 33  }
  0x3f   :  { %7435 = sst [smem:[#allocation33_spill]] %s6635_s13 }
  0x40   :  { %7436 = sst [smem:[#allocation34_spill]] %s6640_s9 }
  0x41   :  { %7437 = sst [smem:[#allocation35_spill]] %s6645_s27 }
  0x42   :  { %7438 = sst [smem:[#allocation36_spill]] %s6650_s4 }
  0x43   :  { %s6655_s13 = sld [smem:[%s7381_s0 + %s6453_s7]]   ;;  %s6457_s7 = smov 34  }
  0x44   :  { %s6660_s9 = sld [smem:[%s7381_s0 + %s6454_s15]]   ;;  %s6458_s15 = smov 35  }
  0x45   :  { %s6665_s27 = sld [smem:[%s7381_s0 + %s6455_s22]]   ;;  %s6459_s22 = smov 36  }
  0x46   :  { %s6670_s4 = sld [smem:[%s7381_s0 + %s6456_s28]]   ;;  %s6460_s28 = smov 37  }
  0x49   :  { %7439 = sst [smem:[#allocation37_spill]] %s6655_s13 }
  0x4a   :  { %7440 = sst [smem:[#allocation38_spill]] %s6660_s9 }
  0x4b   :  { %7441 = sst [smem:[#allocation39_spill]] %s6665_s27 }
  0x4c   :  { %7442 = sst [smem:[#allocation40_spill]] %s6670_s4 }
  0x4d   :  { %s6675_s13 = sld [smem:[%s7381_s0 + %s6457_s7]]   ;;  %s6461_s7 = smov 38  }
  0x4e   :  { %s6680_s9 = sld [smem:[%s7381_s0 + %s6458_s15]]  }
  0x4f   :  { %s6685_s27 = sld [smem:[%s7381_s0 + %s6459_s22]]  }
  0x50   :  { %s6690_s4 = sld [smem:[%s7381_s0 + %s6460_s28]]  }
  0x53   :  { %7443 = sst [smem:[#allocation41_spill]] %s6675_s13 }
  0x54   :  { %7444 = sst [smem:[#allocation42_spill]] %s6680_s9 }
  0x55   :  { %7445 = sst [smem:[#allocation43_spill]] %s6685_s27 }
  0x56   :  { %7446 = sst [smem:[#allocation44_spill]] %s6690_s4 }
  0x57   :  { %s6695_s13 = sld [smem:[%s7381_s0 + %s6461_s7]]  }
  0x5d   :  { %7447 = sst [smem:[#allocation45_spill]] %s6695_s13 }
  0x5e   :  { %82 = vsyncpa [#allocation5], 0 }
  0x5f   :  { %84 = vsyncpa [#allocation5 + $0x1], 0  ;;  %s6697_s15 = smov 0   ;;  %s6699_s16 = smov 0  }
  0x60   :  { %s6701_s18 = smov 0   ;;  %s6703_s22 = smov 0  }
  0x61   :  { %s6705_s23 = smov 0   ;;  %s6707_s26 = smov 0  }
  0x62   :  { %s6709_s28 = smov 0   ;;  %s6711_s1 = smov 0  }
  0x63 LB: > { %7448 = sst [smem:[#allocation46_spill]] %s6394_s15  ;;  %s5522_s0 = sadd.s32 4294967295, %s6422_s1   ;;  %s6422_s1 = sphi %s6711_s1, %s90_s1   ;;  %s6418_s28 = sphi %s6709_s28, %s7570_s28   ;;  %s6414_s26 = sphi %s6707_s26, %s7569_s26   ;;  %s6410_s23 = sphi %s6705_s23, %s7568_s23   ;;  %s6406_s22 = sphi %s6703_s22, %s7567_s22   ;;  %s6402_s18 = sphi %s6701_s18, %s7566_s18   ;;  %s6398_s16 = sphi %s6699_s16, %s7565_s16   ;;  %s6394_s15 = sphi %s6697_s15, %s7564_s15  }
  0x64   : > { %7449 = sst [smem:[#allocation47_spill]] %s6398_s16  ;;  %s5523_s2 = sadd.s32 4294967294, %s6422_s1  }
  0x65   : > { %7450 = sst [smem:[#allocation48_spill]] %s6402_s18  ;;  %s99_s7 = sadd.s32 1, %s6414_s26 }
  0x66   : > { %7451 = sst [smem:[#allocation49_spill]] %s6406_s22  ;;  %p100_p0 = scmp.ge.s32.totalorder %s99_s7, 4 }
  0x67   : > { %7452 = sst [smem:[#allocation50_spill]] %s6410_s23  ;;  %s102_s10 = sadd.s32 1, %s6418_s28 }
  0x68   : > { %7453 = sst [smem:[#allocation51_spill]] %s6414_s26  ;;  %p1076_p1 = scmp.ne.s32.totalorder %s6402_s18, %s6398_s16 }
  0x69   : > { %7454 = sst [smem:[#allocation52_spill]] %s6418_s28  ;;  %p1077_p2 = scmp.eq.s32.totalorder %s5522_s0, 7 }
  0x6a   : > { %7455 = sst [smem:[#allocation53_spill]] %s6422_s1  ;;  %s7572_s7 = smov (%p100_p0, %s99_s7), 0 }
  0x6b   : > { %7456 = sst [smem:[#allocation54_spill]] %s7572_s7  ;;  %s7574_s10 = smov (!%p100_p0, %s102_s10), %s6418_s28 }
  0x6c   : > { %p6746_p3 = por %p1077_p2, %p1076_p1  ;;  %p1082_p4 = scmp.ne.s32.totalorder %s6398_s16, %s6394_s15 }
  0x6d   : > { %p104_p5 = scmp.ge.s32.totalorder %s7574_s10, 2  ;;  %p1083_p6 = scmp.eq.s32.totalorder %s5523_s2, 7 }
  0x6e   : > { %s7457_s11 = scalar_select %p6746_p3, 1, 0 }
  0x6f   : > { %p5526_p7 = scmp.ge.s32.totalorder %s6422_s1, 1  ;;  %p1341_p8 = scmp.lt.s32.totalorder %s6422_s1, 9 }
  0x70   : > { %7458 = sst [smem:[#allocation55_spill]] %s7457_s11  ;;  %s7576_s10 = smov (%p104_p5, %s7574_s10), 0 }
  0x71   : > { %7459 = sst [smem:[#allocation56_spill]] %s7576_s10  ;;  %p6756_p9 = por %p1083_p6, %p1082_p4 }
  0x72   : > { %p1342_p10 = pnand %p5526_p7, %p1341_p8  ;;  %s1063_s0 = ssub.s32 %s6418_s28, %s7576_s10 }
  0x73   : > { %s7460_s26 = scalar_select %p6756_p9, 1, 0 }
  0x74   : > { %s1066_s7 = sadd.s32 1, %s6402_s18  ;;  %p1064_p11 = scmp.eq.s32.totalorder %s1063_s0, 0 }
  0x75   : > { %7461 = sst [smem:[#allocation57_spill]] %s7460_s26  ;;  %1345 = sbr.rel (%p1342_p10) target bundleno = 4763 (0x129b), region = 172 }
  0x76   : > { %s6764_s13 = scalar_select %p1064_p11, %s6402_s18, %s1066_s7  }
  0x78   : > { %7462 = sst [smem:[#allocation58_spill]] %s6764_s13 }
  0x7a   : > { %s7463_s5 = sld [smem:[#allocation7_spill]]  ;;  %s7388_s2 = sand.u32 1, %s6398_s16  }
  0x7b   : > { %s7466_s25 = sld [smem:[#allocation12_spill]]  ;;  %p1556_p12 = scmp.lt.s32.totalorder %s6410_s23, 1 }
  0x7c   : > { %s7468_s3 = sld [smem:[#allocation14_spill]]  ;;  %s6770_s0 = sshll.u32 %s7388_s2, 3 }
  0x7d   : > { %7470 = sst [smem:[#allocation59_spill]] %s6770_s0  ;;  %p1560_p13 = scmp.lt.s32.totalorder %s6406_s22, 3 }
  0x7e   : > { %s7472_s14 = sld [smem:[#allocation16_spill]] }
  0x7f   : > { %s1557_s7 = scalar_select %p1556_p12, %s6410_s23, 1 }
  0x80   : > { %s7473_s24 = sld [smem:[#allocation18_spill]] }
  0x81   : > { %s6775_s10 = scalar_select %p1560_p13, %s6406_s22, 3 }
  0x82   : > { %s5528_s28 = sshll.u32 %s1557_s7, 3  ;;  %s7476_s6 = sld [smem:[#allocation20_spill]] }
  0x83   : > { %s6778_s13 = scalar_lea.vmem %s7463_s5, %s5528_s28  ;;  %s5529_s2 = sshll.u32 %s6775_s10, 1 }
  0x84   : > { %7475 = sst [smem:[#allocation60_spill]] %s6778_s13  ;;  %s6781_s18 = sadd.s32 %s5529_s2, %s1557_s7 }
  0x85   : > { %7478 = sst [smem:[#allocation61_spill]] %s6781_s18  ;;  %s6784_s26 = sshll.u32 %s6775_s10, 5 }
  0x86   : > { %s7479_s20 = sld [smem:[#allocation22_spill]]  ;;  %s6792_s11 = scalar_lea.vmem %s7466_s25, %s6784_s26 }
  0x87   : > { %7482 = sst [smem:[#allocation62_spill]] %s6792_s11  ;;  %s6798_s23 = scalar_lea.vmem %s7468_s3, %s6784_s26 }
  0x88   : > { %s7483_s2 = sld [smem:[#allocation26_spill]]  ;;  %s5630_s13 = sshll.u32 %s6775_s10, 6 }
  0x89   : > { %7485 = sst [smem:[#allocation63_spill]] %s6798_s23  ;;  %s6806_s21 = scalar_lea.vmem %s7472_s14, %s5630_s13 }
  0x8a   : > { %s7486_s4 = sld [smem:[#allocation24_spill]]  ;;  %s6810_s18 = scalar_lea.vmem %s7473_s24, %s6784_s26 }
  0x8b   : > { %s7487_s27 = sld [smem:[#allocation28_spill]]  ;;  %s5632_s9 = sshll.u32 %s6775_s10, 7 }
  0x8c   : > { %s7488_s1 = sld [smem:[#allocation29_spill]]  ;;  %s6816_s23 = scalar_lea.vmem %s7476_s6, %s5632_s9 }
  0x8d   : > { %s7489_s28 = sld [smem:[#allocation30_spill]]  ;;  %s6822_s19 = scalar_lea.vmem %s7479_s20, %s6784_s26 }
  0x8e   : > { %7490 = sst [smem:[#allocation64_spill]] %s6806_s21  ;;  %s6831_s30 = scalar_lea.vmem %s7483_s2, %s6784_s26 }
  0x8f   : > { %s7491_s25 = sld [smem:[#allocation31_spill]]  ;;  %s7504_s6 = smov %s6770_s0 }
  0x90   : > { %7492 = sst [smem:[#allocation65_spill]] %s6810_s18  ;;  %s6137_s18 = smul.u32 96, %s6775_s10 }
  0x91   : > { %s7493_s7 = sld [smem:[#allocation32_spill]]  ;;  %s1640_s11 = scalar_lea.vmem %s7487_s27, %s6775_s10 }
  0x92   : > { %s7494_s29 = sld [smem:[#allocation33_spill]]  ;;  %s1643_s12 = scalar_lea.vmem %s7488_s1, %s6775_s10 }
  0x93   : > { %s7495_s8 = sld [smem:[#allocation34_spill]]  ;;  %s6844_s20 = scalar_lea.vmem %s7489_s28, %s6784_s26 }
  0x94   : > { %7496 = sst [smem:[#allocation66_spill]] %s6816_s23  ;;  %s6836_s23 = scalar_lea.vmem %s7486_s4, %s6137_s18 }
  0x95   : > { %s7497_s17 = sld [smem:[#allocation35_spill]]  ;;  %s1555_s4 = scalar_lea.vmem [#allocation4], %s7504_s6 }
  0x96   : > { %7498 = sst [smem:[#allocation67_spill]] %s6822_s19  ;;  %s1651_s19 = scalar_lea.vmem %s7491_s25, %s6775_s10 }
  0x97   : > { %s7499_s14 = sld [smem:[#allocation36_spill]]  ;;  %s6850_s15 = scalar_lea.vmem %s7493_s7, %s6784_s26 }
  0x98   : > { %s7500_s24 = sld [smem:[#allocation37_spill]]  ;;  %s1659_s13 = scalar_lea.vmem %s7494_s29, %s6775_s10 }
  0x99   : > { %s7501_s21 = sld [smem:[#allocation38_spill]]  ;;  %s1662_s3 = scalar_lea.vmem %s7495_s8, %s6775_s10 }
  0x9a   : > { %7502 = sst [smem:[#allocation68_spill]] %s6831_s30 }
  0x9b   : > { %s7503_s22 = sld [smem:[#allocation39_spill]]  ;;  %s1665_s5 = scalar_lea.vmem %s7497_s17, %s6775_s10 }
  0x9c   : > { %s7505_s18 = sld [smem:[#allocation49_spill]] }
  0x9d   : > { %s6860_s2 = scalar_lea.vmem %s7499_s14, %s6784_s26 }
  0x9e   : > { %s1673_s30 = scalar_lea.vmem %s7500_s24, %s6775_s10 }
  0x9f   : > { %s6865_s0 = scalar_lea.vmem %s7501_s21, %s5632_s9 }
  0xa1   : > { %s1681_s16 = scalar_lea.vmem %s7503_s22, %s6775_s10 }
  0xa2   : > { %p5554_p0 = scmp.ne.s32.totalorder %s7505_s18, 0 }
  0xa3   : > { %s7506_s27 = sld [smem:[#allocation60_spill]] (!%p5554_p0) }
  0xa4   : > { %1685 = sbr.rel (%p5554_p0) target bundleno = 171 (0xab), region = 176 }
  0xa9   : > { %v1686_v0 = vld [vmem:[%s7506_s27] sm:$0xff]  ;;  %vm1687_vm0 = vcmask 261120  }
  0xaa   : > { %1688 = vst.msk [vmem:[#allocation2] sm:$0xff] %vm1687_vm0, %v1686_v0 }
  0xab PF: > { %s7507_s25 = sld [smem:[#allocation62_spill]]  ;;  %v6462_v2 = vmov 0.0   ;;  %vm6463_vm1 = vmmov 0   ;;  %vm1697_vm2 = vcmask 261120   ;;  %vm2127_vm3 = vcmask 1043456  }
  0xac   : > { %5792 = vmatprep.subr.mxu1 %v6462_v2  ;;  %5800 = vmatprep.mubr.msk.f32.mxu1 %vm6463_vm1, %v6462_v2  ;;  %s7508_s9 = sld [smem:[#allocation63_spill]]  ;;  %vm2123_vm4 = vcmask 31744   ;;  %vm2620_vm5 = vcmask 1041408   ;;  %vm2616_vm6 = vcmask 15360   ;;  %vm3231_vm7 = vcmask 64512  }
  0xad   : > { %5836 = vmatprep.subr.mxu0 %v6462_v2  ;;  %5844 = vmatprep.mubr.msk.f32.mxu0 %vm6463_vm1, %v6462_v2  ;;  %s7509_s17 = sld [smem:[#allocation13_spill]]  ;;  %vm4511_vm8 = vcmask 97280   ;;  %vm4513_vm9 = vcmask 130048   ;;  %vm4515_vm10 = vcmask 162816   ;;  %vm4517_vm11 = vcmask 195584  }
  0xae   : > { %s7510_s21 = sld [smem:[#allocation64_spill]]  ;;  %vm4519_vm12 = vcmask 228352  }
  0xaf   : > { %s7512_s8 = sld [smem:[#allocation65_spill]] }
  0xb0   : > { %s7513_s14 = sld [smem:[#allocation17_spill]] }
  0xb1   : > { %v1695_v1 = vld [vmem:[%s7507_s25 + $0x18] sm:$0xff]  ;;  %v1694_v3 = vld [vmem:[%s7507_s25 + $0x10] sm:$0xff]  ;;  %v1693_v4 = vld [vmem:[%s7507_s25 + $0x8] sm:$0xff]  ;;  %s7514_s24 = sld [smem:[#allocation66_spill]] }
  0xb2   : > { %5793 = vmatpush3.msra.mxu1 %v1695_v1  ;;  %v1692_v5 = vld [vmem:[%s7507_s25] sm:$0xff]  ;;  %v1786_v7 = vld [vmem:[%s7508_s9 + $0x18] sm:$0xff]  ;;  %v1785_v8 = vld [vmem:[%s7508_s9 + $0x10] sm:$0xff]  ;;  %s7516_s22 = sld [smem:[#allocation19_spill]] }
  0xb3   : > { %5794 = vmatprep.subr.mxu1 %v6462_v2  ;;  %v6884_v6 = vld [vmem:[#allocation2] sm:$0xff]  ;;  %v1784_v9 = vld [vmem:[%s7508_s9 + $0x8] sm:$0xff]  ;;  %s7511_s29 = scalar_lea.vmem %s7509_s17, %s6775_s10  ;;  %s7517_s26 = sld [smem:[#allocation8_spill]] }
  0xb4   : > { %5795 = vmatpush3.msra.mxu1 %v1694_v3  ;;  %v1783_v10 = vld [vmem:[%s7508_s9] sm:$0xff]  ;;  %v1871_v20 = vld [vmem:[%s7510_s21 + $0x18] sm:$0xff]  ;;  %v1870_v21 = vld [vmem:[%s7510_s21 + $0x10] sm:$0xff]  ;;  %s7519_s28 = sld [smem:[#allocation67_spill]] }
  0xb5   : > { %5796 = vmatprep.subr.mxu1 %v6462_v2  ;;  %v5556_v11 = vld [vmem:[%s7511_s29] ss:$0 sm:$0xff]  ;;  %v1869_v22 = vld [vmem:[%s7510_s21 + $0x8] sm:$0xff]  ;;  %v1875_v25 = vld [vmem:[%s7510_s21 + $0x38] sm:$0xff]  ;;  %s7520_s7 = sld [smem:[#allocation21_spill]] }
  0xb6   : > { %5797 = vmatpush3.msra.mxu1 %v1693_v4  ;;  %v1868_v23 = vld [vmem:[%s7510_s21] sm:$0xff]  ;;  %v1874_v26 = vld [vmem:[%s7510_s21 + $0x30] sm:$0xff]  ;;  %v1873_v27 = vld [vmem:[%s7510_s21 + $0x28] sm:$0xff]  ;;  %s7515_s6 = scalar_lea.vmem %s7513_s14, %s6775_s10  ;;  %s7522_s27 = sld [smem:[#allocation15_spill]] }
  0xb7   : > { %5798 = vmatprep.subr.mxu1 %v6462_v2  ;;  %v1877_v24 = vld [vmem:[#allocation2] ss:$2 sm:$0xf]  ;;  %v1959_v29 = vld [vmem:[#allocation2 + $0x1] ss:$2 sm:$0xf] }
  0xb8   : > { %5799 = vmatpush3.msra.mxu1 %v1692_v5  ;;  %v1872_v28 = vld [vmem:[%s7510_s21 + $0x20] sm:$0xff]  ;;  %v2042_v30 = vld [vmem:[%s7512_s8 + $0x18] sm:$0xff]  ;;  %v2041_v31 = vld [vmem:[%s7512_s8 + $0x10] sm:$0xff]  ;;  %s7518_s1 = scalar_lea.vmem %s7516_s22, %s6775_s10  ;;  %s7523_s25 = sld [smem:[#allocation23_spill]] }
  0xb9   : > { %5801 = vmatmul.mubr.msk.f32.vlgmr.msra.gmra.mxu1 %vm1697_vm2, %v6884_v6  ;;  %5803 = vmatprep.subr.mxu1 %v6462_v2  ;;  %v2040_v32 = vld [vmem:[%s7512_s8 + $0x8] sm:$0xff]  ;;  %v2039_v33 = vld [vmem:[%s7512_s8] sm:$0xff]  ;;  %v2209_v48 = vld [vmem:[%s7514_s24 + $0x38] sm:$0xff]  ;;  %s7525_s17 = sld [smem:[#allocation9_spill]] }
  0xba   : > { %5811 = vmatprep.mubr.msk.f32.mxu1 %vm6463_vm1, %v6462_v2  ;;  %5804 = vmatpush3.msra.mxu1 %v1786_v7  ;;  %v5560_v38 = vld [vmem:[%s7515_s6] ss:$0 sm:$0xff]  ;;  %v2208_v49 = vld [vmem:[%s7514_s24 + $0x30] sm:$0xff]  ;;  %v2207_v50 = vld [vmem:[%s7514_s24 + $0x28] sm:$0xff]  ;;  %s7527_s29 = sld [smem:[#allocation68_spill]] }
  0xbb   : > { %5805 = vmatprep.subr.mxu1 %v6462_v2  ;;  %5837 = vmatpush3.msra.mxu0 %v2042_v30  ;;  %v2206_v51 = vld [vmem:[%s7514_s24 + $0x20] sm:$0xff]  ;;  %v2217_v53 = vld [vmem:[%s7514_s24 + $0x78] sm:$0xff]  ;;  %v2216_v54 = vld [vmem:[%s7514_s24 + $0x70] sm:$0xff]  ;;  %s7521_s18 = scalar_lea.vmem %s7520_s7, %s6775_s10  ;;  %s7528_s8 = sld [smem:[#allocation25_spill]] }
  0xbc   : > { %5806 = vmatpush3.msra.mxu1 %v1785_v8  ;;  %5838 = vmatprep.subr.mxu0 %v6462_v2  ;;  %v2300_v52 = vld [vmem:[#allocation2 + $0x1] ss:$4 sm:$0x3]  ;;  %v2215_v55 = vld [vmem:[%s7514_s24 + $0x68] sm:$0xff]  ;;  %v5562_v58 = vld [vmem:[%s7518_s1] ss:$0 sm:$0xff]  ;;  %s7524_s9 = scalar_lea.vmem %s7522_s27, %s6775_s10 }
  0xbd   : > { %5807 = vmatprep.subr.mxu1 %v6462_v2  ;;  %5839 = vmatpush3.msra.mxu0 %v2041_v31  ;;  %v2214_v56 = vld [vmem:[%s7514_s24 + $0x60] sm:$0xff]  ;;  %v2205_v63 = vld [vmem:[%s7514_s24 + $0x18] sm:$0xff]  ;;  %v2204_v0 = vld [vmem:[%s7514_s24 + $0x10] sm:$0xff]  ;;  %s7530_s14 = sld [smem:[#allocation61_spill]]  ;;  %s6482_s7 = smov 56  }
  0xbe   : > { %5808 = vmatpush3.msra.mxu1 %v1784_v9  ;;  %5840 = vmatprep.subr.mxu0 %v6462_v2  ;;  %v2452_v57 = vld [vmem:[#allocation2 + $0x3] ss:$4 sm:$0x3]  ;;  %v2203_v1 = vld [vmem:[%s7514_s24 + $0x8] sm:$0xff]  ;;  %v2213_v5 = vld [vmem:[%s7514_s24 + $0x58] sm:$0xff]  ;;  %s7526_s21 = scalar_lea.vmem %s7523_s25, %s6775_s10  ;;  %s7532_s6 = sld [smem:[#allocation27_spill]] }
  0xbf   : > { %5809 = vmatprep.subr.mxu1 %v6462_v2  ;;  %5841 = vmatpush3.msra.mxu0 %v2040_v32  ;;  %v1867_v61 = vld [vmem:[%s7517_s26] sm:$0xff]  ;;  %v2212_v7 = vld [vmem:[%s7514_s24 + $0x50] sm:$0xff]  ;;  %v2211_v8 = vld [vmem:[%s7514_s24 + $0x48] sm:$0xff]  ;;  %s7533_s22 = sld [smem:[#allocation11_spill]]  ;;  %s6467_s25 = smov 92  }
  0xc0   : > { %5810 = vmatpush3.msra.mxu1 %v1783_v10  ;;  %5842 = vmatprep.subr.mxu0 %v6462_v2  ;;  %v2202_v3 = vld [vmem:[%s7514_s24] sm:$0xff]  ;;  %s6484_s27 = smov 48  }
  0xc1   : > { %5814 = vmatprep.subr.mxu1 %v6462_v2  ;;  %5843 = vmatpush3.msra.mxu0 %v2039_v33  ;;  %v2219_v4 = vld [vmem:[#allocation2] ss:$4 sm:$0x3]  ;;  %v2376_v10 = vld [vmem:[#allocation2 + $0x2] ss:$4 sm:$0x3] }
  0xc2   : > { %5863 = vmatprep.subr.mxu0 %v6462_v2  ;;  %v2210_v9 = vld [vmem:[%s7514_s24 + $0x40] sm:$0xff]  ;;  %s7531_s24 = scalar_lea.vmem %s7528_s8, %s6775_s10  ;;  %s6473_s8 = smov 84  }
  0xc4   : > { %s7535_s1 = scalar_lea.vmem %s7532_s6, %s6775_s10  ;;  %s6477_s6 = smov 108  }
 0x179   : > { %v1767_v12 = vpop.f32.mrf.mxu1 }
 0x17a   : > { %v1777_v13 = vadd.f32 %v5556_v11, %v1767_v12 }
 0x17b   : > { %v5802_v14 = vpop.f32.mrf.mxu1 }
 0x17c   : > { %v1779_v15 = vmul.f32 0.70710677, %v1777_v13  ;;  %v1778_v17 = vmul.f32 0.5, %v1777_v13 }
 0x17e   : > { %6281 = verf.f32 %v1779_v15  ;;  %v2535_v15 = vld [vmem:[%s7519_s28 + $0x18] sm:$0xff] }
 0x18b   : > { %v6282_v16 = vpop.eup %6281 }
 0x18c   : > { %v1781_v18 = vadd.f32 1.0, %v6282_v16  ;;  %v2534_v16 = vld [vmem:[%s7519_s28 + $0x10] sm:$0xff] }
 0x18e   : > { %v1782_v19 = vmul.f32 %v1781_v18, %v1778_v17  ;;  %v2533_v17 = vld [vmem:[%s7519_s28 + $0x8] sm:$0xff]  ;;  %v2532_v18 = vld [vmem:[%s7519_s28] sm:$0xff]  ;;  %s7536_s28 = scalar_lea.vmem %s7533_s22, %s7530_s14  ;;  %s6478_s22 = smov 104  }
 0x190   : > { %5812 = vmatmul.mubr.msk.f32.vlgmr.msra.gmra.mxu1 %vm1697_vm2, %v1782_v19 }
 0x191   : > { %5815 = vmatpush3.msra.mxu1 %v1871_v20  ;;  %5822 = vmatprep.mubr.msk.f32.mxu1 %vm6463_vm1, %v6462_v2 }
 0x192   : > { %5816 = vmatprep.subr.mxu1 %v6462_v2 }
 0x193   : > { %5817 = vmatpush3.msra.mxu1 %v1870_v21  ;;  %v5567_v21 = vld [vmem:[%s7521_s18] ss:$0 sm:$0xff]  ;;  %s6483_s18 = smov 44  }
 0x194   : > { %5818 = vmatprep.subr.mxu1 %v6462_v2 }
 0x195   : > { %5819 = vmatpush3.msra.mxu1 %v1869_v22 }
 0x196   : > { %5820 = vmatprep.subr.mxu1 %v6462_v2 }
 0x197   : > { %5821 = vmatpush3.msra.mxu1 %v1868_v23 }
 0x198   : > { %5823 = vmatmul.mubr.msk.f32.vlgmr.msra.gmra.mxu1 %vm1697_vm2, %v1877_v24  ;;  %5825 = vmatprep.subr.mxu1 %v6462_v2 }
 0x199   : > { %5826 = vmatpush3.msra.mxu1 %v1875_v25  ;;  %5833 = vmatprep.mubr.msk.f32.mxu1 %vm6463_vm1, %v6462_v2 }
 0x19a   : > { %5827 = vmatprep.subr.mxu1 %v6462_v2 }
 0x19b   : > { %5828 = vmatpush3.msra.mxu1 %v1874_v26 }
 0x19c   : > { %5829 = vmatprep.subr.mxu1 %v6462_v2 }
 0x19d   : > { %5830 = vmatpush3.msra.mxu1 %v1873_v27 }
 0x19e   : > { %5831 = vmatprep.subr.mxu1 %v6462_v2 }
 0x19f   : > { %5832 = vmatpush3.msra.mxu1 %v1872_v28 }
 0x1a0   : > { %5834 = vmatmul.mubr.msk.f32.vlgmr.msra.gmra.mxu1 %vm1697_vm2, %v1959_v29  ;;  %5847 = vmatprep.subr.mxu1 %v6462_v2 }
 0x1a1   : > { %5849 = vmatprep.mubr.msk.f32.mxu1 %vm6463_vm1, %v6462_v2 }
 0x250   : > { %v6936_v34 = vpop.f32.mrf.mxu1 }
 0x252   : > { %v5813_v35 = vpop.f32.mrf.mxu1 }
 0x258   : > { %v1947_v36 = vpop.f32.mrf.mxu1 }
 0x259   : > { %v1957_v39 = vadd.f32 %v5560_v38, %v1947_v36  ;;  %v2697_v36 = vld [vmem:[%s6836_s23 + $0x18] sm:$0xff]  ;;  %v2695_v38 = vld [vmem:[%s6836_s23 + $0x8] sm:$0xff] }
 0x25a   : > { %v5824_v37 = vpop.f32.mrf.mxu1 }
 0x25b   : > { %v2696_v37 = vld [vmem:[%s6836_s23 + $0x10] sm:$0xff] }
 0x260   : > { %v2029_v40 = vpop.f32.mrf.mxu1 }
 0x261   : > { %v2033_v41 = vadd.f32 %v2029_v40, %v1957_v39  ;;  %v5557_v39 = vld [vmem:[%s7524_s9] ss:$0 sm:$0xff]  ;;  %s6468_s9 = smov 72  }
 0x262   : > { %v5835_v42 = vpop.f32.mrf.mxu1  ;;  %v2694_v40 = vld [vmem:[%s6836_s23] sm:$0xff] }
 0x263   : > { %v2035_v43 = vmul.f32 0.70710677, %v2033_v41  ;;  %v2034_v45 = vmul.f32 0.5, %v2033_v41  ;;  %v1864_v41 = vadd.f32 %v5557_v39, %v6936_v34  ;;  %v5571_v42 = vld [vmem:[%s7526_s21] ss:$0 sm:$0xff]  ;;  %s6471_s21 = smov 120  }
 0x265   : > { %6283 = verf.f32 %v2035_v43 }
 0x272   : > { %v6284_v44 = vpop.eup %6283 }
 0x273   : > { %v2037_v46 = vadd.f32 1.0, %v6284_v44 }
 0x275   : > { %v2038_v47 = vmul.f32 %v2037_v46, %v2034_v45  ;;  %v2201_v45 = vld [vmem:[%s7525_s17] sm:$0xff]  ;;  %v2701_v46 = vld [vmem:[%s6836_s23 + $0x38] sm:$0xff]  ;;  %s6470_s17 = smov 68  }
 0x277   : > { %5845 = vmatmul.mubr.msk.f32.vlgmr.msra.gmra.mxu0 %vm1697_vm2, %v2038_v47  ;;  %v2700_v47 = vld [vmem:[%s6836_s23 + $0x30] sm:$0xff] }
 0x278   : > { %5871 = vmatprep.mubr.msk.f32.mxu0 %vm6463_vm1, %v6462_v2  ;;  %5864 = vmatpush3.msra.mxu0 %v2209_v48  ;;  %v2699_v48 = vld [vmem:[%s6836_s23 + $0x28] sm:$0xff] }
 0x279   : > { %5865 = vmatprep.subr.mxu0 %v6462_v2 }
 0x27a   : > { %5866 = vmatpush3.msra.mxu0 %v2208_v49 }
 0x27b   : > { %5867 = vmatprep.subr.mxu0 %v6462_v2 }
 0x27c   : > { %5868 = vmatpush3.msra.mxu0 %v2207_v50  ;;  %v2698_v50 = vld [vmem:[%s6836_s23 + $0x20] sm:$0xff] }
 0x27d   : > { %5869 = vmatprep.subr.mxu0 %v6462_v2 }
 0x27e   : > { %5870 = vmatpush3.msra.mxu0 %v2206_v51 }
 0x27f   : > { %5885 = vmatprep.subr.mxu0 %v6462_v2  ;;  %5872 = vmatmul.mubr.msk.f32.vlgmr.msra.gmra.mxu0 %vm1697_vm2, %v2300_v52  ;;  %v2705_v52 = vld [vmem:[%s6836_s23 + $0x58] sm:$0xff] }
 0x280   : > { %5886 = vmatpush3.msra.mxu0 %v2217_v53  ;;  %5893 = vmatprep.mubr.msk.f32.mxu0 %vm6463_vm1, %v6462_v2  ;;  %v2704_v53 = vld [vmem:[%s6836_s23 + $0x50] sm:$0xff] }
 0x281   : > { %5887 = vmatprep.subr.mxu0 %v6462_v2 }
 0x282   : > { %5888 = vmatpush3.msra.mxu0 %v2216_v54  ;;  %v2703_v54 = vld [vmem:[%s6836_s23 + $0x48] sm:$0xff] }
 0x283   : > { %5889 = vmatprep.subr.mxu0 %v6462_v2 }
 0x284   : > { %5890 = vmatpush3.msra.mxu0 %v2215_v55  ;;  %v2702_v55 = vld [vmem:[%s6836_s23 + $0x40] sm:$0xff]  ;;  %s7529_s23 = sld [smem:[#allocation10_spill]] }
 0x285   : > { %5891 = vmatprep.subr.mxu0 %v6462_v2 }
 0x286   : > { %5892 = vmatpush3.msra.mxu0 %v2214_v56 }
 0x287   : > { %5894 = vmatmul.mubr.msk.f32.vlgmr.msra.gmra.mxu0 %vm1697_vm2, %v2452_v57  ;;  %5907 = vmatprep.subr.mxu0 %v6462_v2 }
 0x288   : > { %5909 = vmatprep.mubr.msk.f32.mxu0 %vm6463_vm1, %v6462_v2 }
 0x28a   : > { %s7534_s26 = scalar_lea.vmem %s7529_s23, %s7530_s14  ;;  %s6474_s23 = smov 116  }
 0x28b   : > { %s6475_s14 = smov 80  }
 0x337   : > { %v2119_v59 = vpop.f32.mrf.mxu0 }
 0x338   : > { %v2120_v60 = vadd.f32 %v5562_v58, %v2119_v59 }
 0x339   : > { %v5846_v62 = vpop.f32.mrf.mxu0 }
 0x33a   : > { %5848 = vmatpush3.msk.msra.mxu1 %vm2127_vm3, %v2120_v60  ;;  %v2942_v60 = vld [vmem:[%s7527_s29 + $0x18] sm:$0xff]  ;;  %v2940_v62 = vld [vmem:[%s7527_s29 + $0x8] sm:$0xff] }
 0x33b   : > { %5850 = vmatmul.mubr.msk.f32.vlgmr.msra.gmra.mxu1 %vm2123_vm4, %v1867_v61  ;;  %5852 = vmatprep.subr.mxu1 %v6462_v2  ;;  %v2941_v61 = vld [vmem:[%s7527_s29 + $0x10] sm:$0xff] }
 0x33c   : > { %5853 = vmatpush3.msra.mxu1 %v2205_v63  ;;  %5860 = vmatprep.mubr.msk.f32.mxu1 %vm6463_vm1, %v6462_v2  ;;  %v2939_v63 = vld [vmem:[%s7527_s29] sm:$0xff]  ;;  %s6472_s29 = smov 64  }
 0x33d   : > { %5854 = vmatprep.subr.mxu1 %v6462_v2 }
 0x33e   : > { %5855 = vmatpush3.msra.mxu1 %v2204_v0 }
 0x33f   : > { %5856 = vmatprep.subr.mxu1 %v6462_v2  ;;  %v2370_v11 = vpop.f32.mrf.mxu0 }
 0x340   : > { %5857 = vmatpush3.msra.mxu1 %v2203_v1 }
 0x341   : > { %5858 = vmatprep.subr.mxu1 %v6462_v2  ;;  %v5873_v12 = vpop.f32.mrf.mxu0 }
 0x342   : > { %5859 = vmatpush3.msra.mxu1 %v2202_v3  ;;  %v5578_v3 = vld [vmem:[%s7531_s24] ss:$0 sm:$0xff]  ;;  %s6476_s24 = smov 112  }
 0x343   : > { %5861 = vmatmul.mubr.msk.f32.vlgmr.msra.gmra.mxu1 %vm1697_vm2, %v2219_v4  ;;  %5874 = vmatprep.subr.mxu1 %v6462_v2 }
 0x344   : > { %5875 = vmatpush3.msra.mxu1 %v2213_v5  ;;  %5882 = vmatprep.mubr.msk.f32.mxu1 %vm6463_vm1, %v6462_v2 }
 0x345   : > { %5876 = vmatprep.subr.mxu1 %v6462_v2 }
 0x346   : > { %5877 = vmatpush3.msra.mxu1 %v2212_v7 }
 0x347   : > { %5878 = vmatprep.subr.mxu1 %v6462_v2  ;;  %v2522_v13 = vpop.f32.mrf.mxu0 }
 0x348   : > { %5879 = vmatpush3.msra.mxu1 %v2211_v8 }
 0x349   : > { %5880 = vmatprep.subr.mxu1 %v6462_v2  ;;  %v5895_v14 = vpop.f32.mrf.mxu0 }
 0x34a   : > { %5881 = vmatpush3.msra.mxu1 %v2210_v9 }
 0x34b   : > { %5883 = vmatmul.mubr.msk.f32.vlgmr.msra.gmra.mxu1 %vm1697_vm2, %v2376_v10  ;;  %5896 = vmatprep.subr.mxu1 %v6462_v2 }
 0x34c   : > { %5904 = vmatprep.mubr.msk.f32.mxu1 %vm6463_vm1, %v6462_v2  ;;  %5897 = vmatpush3.msra.mxu1 %v2535_v15  ;;  %v1690_v15 = vld [vmem:[%s7534_s26] sm:$0x1]  ;;  %s6479_s26 = smov 100  }
 0x34d   : > { %5898 = vmatprep.subr.mxu1 %v6462_v2 }
 0x34e   : > { %5899 = vmatpush3.msra.mxu1 %v2534_v16  ;;  %v3024_v16 = vadd.f32 1.0, %v1690_v15 }
 0x34f   : > { %5900 = vmatprep.subr.mxu1 %v6462_v2 }
 0x350   : > { %5901 = vmatpush3.msra.mxu1 %v2533_v17 }
 0x351   : > { %5902 = vmatprep.subr.mxu1 %v6462_v2 }
 0x352   : > { %5903 = vmatpush3.msra.mxu1 %v2532_v18  ;;  %v5579_v18 = vld [vmem:[%s7535_s1] ss:$0 sm:$0xff]  ;;  %s6480_s1 = smov 60  }
 0x353   : > { %5923 = vmatprep.subr.mxu1 %v6462_v2 }
 0x3fb   : > { %v2197_v19 = vpop.f32.mrf.mxu1 }
 0x3fd   : > { %v5851_v20 = vpop.f32.mrf.mxu1 }
 0x403   : > { %v2289_v22 = vpop.f32.mrf.mxu1 }
 0x404   : > { %v2299_v24 = vadd.f32 %v5567_v21, %v2289_v22 }
 0x405   : > { %v5862_v23 = vpop.f32.mrf.mxu1 }
 0x406   : > { %v2374_v25 = vadd.f32 %v2370_v11, %v2299_v24  ;;  %v5581_v24 = vld [vmem:[%s7536_s28] ss:$0 sm:$0xff]  ;;  %s6481_s28 = smov 52  }
 0x40b   : > { %v2446_v26 = vpop.f32.mrf.mxu1 }
 0x40c   : > { %v2450_v27 = vadd.f32 %v2446_v26, %v2374_v25 }
 0x40d   : > { %v5884_v28 = vpop.f32.mrf.mxu1 }
 0x40e   : > { %v2526_v29 = vadd.f32 %v2522_v13, %v2450_v27  ;;  %v3026_v13 = vlaneseq }
 0x410   : > { %v2528_v30 = vmul.f32 0.70710677, %v2526_v29  ;;  %v2527_v32 = vmul.f32 0.5, %v2526_v29  ;;  %v3027_v14 = vshrl.u32 %v3026_v13, 7 }
 0x412   : > { %6285 = verf.f32 %v2528_v30  ;;  %v3028_v17 = vsub.s32 0, %v3027_v14 }
 0x414   : > { %v3029_v21 = vrot.slane %v3024_v16, %v3028_v17 }
 0x41f   : > { %v6286_v31 = vpop.eup %6285 }
 0x420   : > { %v2530_v33 = vadd.f32 1.0, %v6286_v31 }
 0x422   : > { %v2531_v35 = vmul.f32 %v2530_v33, %v2527_v32  ;;  %v3072_v33 = vld [vmem:[%s6844_s20 + $0x18] sm:$0xff] }
 0x424   : > { %5905 = vmatmul.mubr.msk.f32.vlgmr.msra.gmra.mxu1 %vm1697_vm2, %v2531_v35  ;;  %v3070_v35 = vld [vmem:[%s6844_s20 + $0x8] sm:$0xff] }
 0x425   : > { %5924 = vmatpush3.msra.mxu1 %v2697_v36  ;;  %5931 = vmatprep.mubr.msk.f32.mxu1 %vm6463_vm1, %v6462_v2  ;;  %v3069_v36 = vld [vmem:[%s6844_s20] sm:$0xff] }
 0x426   : > { %5925 = vmatprep.subr.mxu1 %v6462_v2 }
 0x427   : > { %5926 = vmatpush3.msra.mxu1 %v2696_v37 }
 0x428   : > { %5927 = vmatprep.subr.mxu1 %v6462_v2 }
 0x429   : > { %5928 = vmatpush3.msra.mxu1 %v2695_v38 }
 0x42a   : > { %5929 = vmatprep.subr.mxu1 %v6462_v2 }
 0x42b   : > { %5930 = vmatpush3.msra.mxu1 %v2694_v40 }
 0x42c   : > { %5932 = vmatmul.mubr.msk.f32.vlgmr.msra.gmra.mxu1 %vm1697_vm2, %v1864_v41  ;;  %5945 = vmatprep.subr.mxu1 %v6462_v2  ;;  %v5582_v41 = vld [vmem:[%s1640_s11] ss:$0 sm:$0xff]  ;;  %s6465_s11 = smov 96  }
 0x42d   : > { %5953 = vmatprep.mubr.msk.f32.mxu1 %vm6463_vm1, %v6462_v2  ;;  %5946 = vmatpush3.msra.mxu1 %v2942_v60 }
 0x42e   : > { %5947 = vmatprep.subr.mxu1 %v6462_v2 }
 0x42f   : > { %5948 = vmatpush3.msra.mxu1 %v2941_v61 }
 0x430   : > { %5949 = vmatprep.subr.mxu1 %v6462_v2 }
 0x431   : > { %5950 = vmatpush3.msra.mxu1 %v2940_v62 }
 0x432   : > { %5951 = vmatprep.subr.mxu1 %v6462_v2 }
 0x433   : > { %5952 = vmatpush3.msra.mxu1 %v2939_v63 }
 0x434   : > { %5967 = vmatprep.subr.mxu1 %v6462_v2 }
 0x4e4   : > { %v2612_v43 = vpop.f32.mrf.mxu1 }
 0x4e5   : > { %v2613_v44 = vadd.f32 %v5571_v42, %v2612_v43  ;;  %v5583_v43 = vld [vmem:[%s1643_s12] ss:$0 sm:$0xff]  ;;  %s6466_s12 = smov 76  }
 0x4e6   : > { %v5906_v34 = vpop.f32.mrf.mxu1 }
 0x4e7   : > { %5908 = vmatpush3.msk.msra.mxu0 %vm2620_vm5, %v2613_v44  ;;  %v5584_v34 = vld [vmem:[%s1651_s19] ss:$0 sm:$0xff]  ;;  %s6469_s19 = smov 88  }
 0x4e8   : > { %5910 = vmatmul.mubr.msk.f32.vlgmr.msra.gmra.mxu0 %vm2616_vm6, %v2201_v45  ;;  %5912 = vmatprep.subr.mxu0 %v6462_v2 }
 0x4e9   : > { %5913 = vmatpush3.msra.mxu0 %v2701_v46  ;;  %5920 = vmatprep.mubr.msk.f32.mxu0 %vm6463_vm1, %v6462_v2 }
 0x4ea   : > { %5914 = vmatprep.subr.mxu0 %v6462_v2 }
 0x4eb   : > { %5915 = vmatpush3.msra.mxu0 %v2700_v47 }
 0x4ec   : > { %v2848_v49 = vpop.f32.mrf.mxu1  ;;  %5916 = vmatprep.subr.mxu0 %v6462_v2 }
 0x4ed   : > { %5917 = vmatpush3.msra.mxu0 %v2699_v48 }
 0x4ee   : > { %v5933_v51 = vpop.f32.mrf.mxu1  ;;  %5918 = vmatprep.subr.mxu0 %v6462_v2 }
 0x4ef   : > { %5919 = vmatpush3.msra.mxu0 %v2698_v50 }
 0x4f0   : > { %5921 = vmatmul.mubr.msk.f32.vlgmr.msra.gmra.mxu0 %vm1697_vm2, %v2197_v19  ;;  %5934 = vmatprep.subr.mxu0 %v6462_v2 }
 0x4f1   : > { %5935 = vmatpush3.msra.mxu0 %v2705_v52  ;;  %5942 = vmatprep.mubr.msk.f32.mxu0 %vm6463_vm1, %v6462_v2 }
 0x4f2   : > { %5936 = vmatprep.subr.mxu0 %v6462_v2 }
 0x4f3   : > { %5937 = vmatpush3.msra.mxu0 %v2704_v53 }
 0x4f4   : > { %5938 = vmatprep.subr.mxu0 %v6462_v2 }
 0x4f5   : > { %5939 = vmatpush3.msra.mxu0 %v2703_v54 }
 0x4f6   : > { %5940 = vmatprep.subr.mxu0 %v6462_v2 }
 0x4f7   : > { %5941 = vmatpush3.msra.mxu0 %v2702_v55 }
 0x4f8   : > { %5956 = vmatprep.subr.mxu0 %v6462_v2 }
 0x5a8   : > { %v2690_v56 = vpop.f32.mrf.mxu0 }
 0x5a9   : > { %5943 = vmatmul.mubr.msk.f32.vlgmr.msra.gmra.mxu0 %vm1697_vm2, %v2690_v56 }
 0x5aa   : > { %v5911_v57 = vpop.f32.mrf.mxu0  ;;  %5964 = vmatprep.mubr.msk.f32.mxu0 %vm6463_vm1, %v6462_v2  ;;  %5957 = vmatpush3.msra.mxu0 %v3072_v33 }
 0x5ab   : > { %5958 = vmatprep.subr.mxu0 %v6462_v2 }
 0x5b0   : > { %v2775_v58 = vpop.f32.mrf.mxu0 }
 0x5b1   : > { %v2849_v0 = vadd.f32 %v2848_v49, %v2775_v58 }
 0x5b2   : > { %v5922_v59 = vpop.f32.mrf.mxu0 }
 0x669   : > { %v2921_v1 = vpop.f32.mrf.mxu0 }
 0x66a   : > { %v2925_v4 = vadd.f32 %v2921_v1, %v2849_v0 }
 0x66b   : > { %v5944_v5 = vpop.f32.mrf.mxu0 }
 0x66c   : > { %v2933_v7 = vadd.f32 %v5578_v3, %v2925_v4 }
 0x66e   : > { %v2935_v8 = vmul.f32 0.70710677, %v2933_v7  ;;  %v2934_v10 = vmul.f32 0.5, %v2933_v7 }
 0x670   : > { %6287 = verf.f32 %v2935_v8 }
 0x67d   : > { %v6288_v9 = vpop.eup %6287 }
 0x67e   : > { %v2937_v11 = vadd.f32 1.0, %v6288_v9 }
 0x680   : > { %v2938_v12 = vmul.f32 %v2937_v11, %v2934_v10 }
 0x682   : > { %5954 = vmatmul.mubr.msk.f32.vlgmr.msra.gmra.mxu1 %vm1697_vm2, %v2938_v12 }
 0x683   : > { %5969 = vmatprep.mubr.msk.f32.mxu1 %vm6463_vm1, %v6462_v2 }
 0x742   : > { %v3019_v19 = vpop.f32.mrf.mxu1 }
 0x743   : > { %v3020_v20 = vadd.f32 %v5579_v18, %v3019_v19 }
 0x744   : > { %v5955_v22 = vpop.f32.mrf.mxu1 }
 0x745   : > { %v3023_v23 = vadd.f32 %v3020_v20, %v6884_v6  ;;  %v3071_v6 = vld [vmem:[%s6844_s20 + $0x10] sm:$0xff]  ;;  %s6464_s20 = smov 124  }
 0x746   : > { %5959 = vmatpush3.msra.mxu0 %v3071_v6 }
 0x747   : > { %v3031_v25 = vmul.f32 %v3029_v21, %v3023_v23  ;;  %5960 = vmatprep.subr.mxu0 %v6462_v2 }
 0x748   : > { %5961 = vmatpush3.msra.mxu0 %v3070_v35 }
 0x749   : > { %v3038_v26 = vadd.f32 %v5581_v24, %v3031_v25  ;;  %5962 = vmatprep.subr.mxu0 %v6462_v2 }
 0x74a   : > { %5963 = vmatpush3.msra.mxu0 %v3069_v36 }
 0x74b   : > { %v3041_v27 = vsel %vm1697_vm2, %v3038_v26, 0.0  ;;  %5977 = vmatprep.subr.mxu0 %v6462_v2 }
 0x74c   : > { %3042 = vadd.xlane.f32.xlu0 %v3041_v27 }
 0x7d5   : > { %v3043_v28 = vpop.xlane.xlu0 %3042 }
 0x7d6   : > { %v3045_v29 = vmul.f32 0.03125, %v3043_v28 }
 0x7d8   : > { %v3046_v30 = vsub.f32 %v3038_v26, %v3045_v29 }
 0x7da   : > { %v3047_v31 = vmul.f32 %v3046_v30, %v3046_v30 }
 0x7dc   : > { %v3048_v32 = vsel %vm1697_vm2, %v3047_v31, 0.0 }
 0x7dd   : > { %3049 = vadd.xlane.f32.xlu0 %v3048_v32 }
 0x866   : > { %v3050_v37 = vpop.xlane.xlu0 %3049 }
 0x867   : > { %v3051_v38 = vmul.f32 0.03125, %v3050_v37 }
 0x869   : > { %v3052_v39 = vadd.f32 1e-05, %v3051_v38 }
 0x86b   : > { %6289 = vrsqrt.f32 %v3052_v39 }
 0x878   : > { %v6290_v40 = vpop.eup %6289 }
 0x879   : > { %v3054_v42 = vmul.f32 %v6290_v40, %v3046_v30 }
 0x87b   : > { %v3061_v44 = vmul.f32 %v5582_v41, %v3054_v42 }
 0x87d   : > { %v3068_v45 = vadd.f32 %v5583_v43, %v3061_v44 }
 0x87f   : > { %5965 = vmatmul.mubr.msk.f32.vlgmr.msra.gmra.mxu0 %vm1697_vm2, %v3068_v45 }
 0x880   : > { %5979 = vmatprep.mubr.msk.f32.mxu0 %vm6463_vm1, %v6462_v2 }
 0x93f   : > { %v3149_v46 = vpop.f32.mrf.mxu0 }
 0x940   : > { %v7100_v47 = vadd.f32 %v5584_v34, %v3149_v46 }
 0x941   : > { %v5966_v48 = vpop.f32.mrf.mxu0 }
 0x942   : > { %3319 = vrot.lane.b32.xlu0 %v7100_v47, %s6464_s20  ;;  %3154 = vrot.lane.b32.xlu1 %v7100_v47, %s6465_s11  ;;  %s6485_s20 = smov 36   ;;  %s6486_s11 = smov 40  }
 0x946   : > { %3985 = vrot.lane.b32.xlu0 %v7100_v47, %s6466_s12  ;;  %3321 = vrot.lane.b32.xlu1 %v7100_v47, %s6467_s25  ;;  %s6487_s12 = smov 4   ;;  %s6488_s25 = smov 8  }
 0x94a   : > { %4151 = vrot.lane.b32.xlu0 %v7100_v47, %s6468_s9  ;;  %3487 = vrot.lane.b32.xlu1 %v7100_v47, %s6469_s19  ;;  %s6489_s9 = smov 12   ;;  %s6490_s19 = smov 16  }
 0x94e   : > { %4317 = vrot.lane.b32.xlu0 %v7100_v47, %s6470_s17  ;;  %3485 = vrot.lane.b32.xlu1 %v7100_v47, %s6471_s21  ;;  %s6491_s17 = smov 20   ;;  %s6492_s21 = smov 24  }
 0x952   : > { %3243 = vrot.lane.b32.xlu0 %v7100_v47, %s6472_s29  ;;  %3653 = vrot.lane.b32.xlu1 %v7100_v47, %s6473_s8  ;;  %s6493_s29 = smov 28  }
 0x956   : > { %3651 = vrot.lane.b32.xlu1 %v7100_v47, %s6474_s23 }
 0x95a   : > { %3819 = vrot.lane.b32.xlu1 %v7100_v47, %s6475_s14 }
 0x95e   : > { %3817 = vrot.lane.b32.xlu1 %v7100_v47, %s6476_s24 }
 0x962   : > { %3983 = vrot.lane.b32.xlu1 %v7100_v47, %s6477_s6 }
 0x966   : > { %4149 = vrot.lane.b32.xlu1 %v7100_v47, %s6478_s22 }
 0x96a   : > { %4315 = vrot.lane.b32.xlu1 %v7100_v47, %s6479_s26 }
 0x96e   : > { %3409 = vrot.lane.b32.xlu1 %v7100_v47, %s6480_s1 }
 0x9b4   : > { %v3320_v49 = vpop.permute.xlu0 %3319  ;;  %v3155_v50 = vpop.permute.xlu1 %3154 }
 0x9b5   : > { %5968 = vmatpush3.xpose.msk.msra.mxu1 %vm2123_vm4, %v3155_v50 }
 0x9b6   : > { %5972 = vmatprep.subr.mxu1 %v6462_v2 }
 0x9b8   : > { %v3986_v51 = vpop.permute.xlu0 %3985  ;;  %5970 = vmatmul.mubr.msk.f32.vlgmr.msra.gmra.mxu1 %vm2123_vm4, %v7100_v47  ;;  %v3322_v52 = vpop.permute.xlu1 %3321 }
 0x9b9   : > { %5978 = vmatpush3.xpose.msk.msra.mxu0 %vm2123_vm4, %v3322_v52  ;;  %5974 = vmatprep.mubr.msk.f32.mxu1 %vm6463_vm1, %v6462_v2 }
 0x9ba   : > { %5987 = vmatprep.subr.mxu0 %v6462_v2 }
 0x9bc   : > { %v4152_v53 = vpop.permute.xlu0 %4151  ;;  %5980 = vmatmul.mubr.msk.f32.vlgmr.msra.gmra.mxu0 %vm2123_vm4, %v3320_v49  ;;  %v3488_v54 = vpop.permute.xlu1 %3487 }
 0x9bd   : > { %5988 = vmatpush3.xpose.msk.msra.mxu0 %vm2123_vm4, %v3488_v54  ;;  %5989 = vmatprep.mubr.msk.f32.mxu0 %vm6463_vm1, %v6462_v2 }
 0x9be   : > { %5997 = vmatprep.subr.mxu0 %v6462_v2 }
 0x9c0   : > { %v4318_v55 = vpop.permute.xlu0 %4317  ;;  %v3486_v56 = vpop.permute.xlu1 %3485 }
 0x9c1   : > { %5990 = vmatmul.mubr.msk.f32.vlgmr.msra.gmra.mxu0 %vm2123_vm4, %v3486_v56 }
 0x9c2   : > { %5999 = vmatprep.mubr.msk.f32.mxu0 %vm6463_vm1, %v6462_v2 }
 0x9c4   : > { %v3244_v57 = vpop.permute.xlu0 %3243  ;;  %v3654_v58 = vpop.permute.xlu1 %3653 }
 0x9c5   : > { %5973 = vmatpush3.msra.mxu1 %v3244_v57  ;;  %5998 = vmatpush3.xpose.msk.msra.mxu0 %vm2123_vm4, %v3654_v58 }
 0x9c6   : > { %6007 = vmatprep.subr.mxu0 %v6462_v2  ;;  %5982 = vmatprep.subr.mxu1 %v6462_v2 }
 0x9c8   : > { %v3652_v59 = vpop.permute.xlu1 %3651 }
 0x9c9   : > { %6000 = vmatmul.mubr.msk.f32.vlgmr.msra.gmra.mxu0 %vm2123_vm4, %v3652_v59 }
 0x9ca   : > { %6009 = vmatprep.mubr.msk.f32.mxu0 %vm6463_vm1, %v6462_v2 }
 0x9cc   : > { %v3820_v60 = vpop.permute.xlu1 %3819 }
 0x9cd   : > { %6008 = vmatpush3.xpose.msk.msra.mxu0 %vm2123_vm4, %v3820_v60 }
 0x9ce   : > { %6017 = vmatprep.subr.mxu0 %v6462_v2 }
 0x9d0   : > { %v3818_v61 = vpop.permute.xlu1 %3817 }
 0x9d1   : > { %6010 = vmatmul.mubr.msk.f32.vlgmr.msra.gmra.mxu0 %vm2123_vm4, %v3818_v61 }
 0x9d2   : > { %6018 = vmatpush3.xpose.msk.msra.mxu0 %vm2123_vm4, %v3986_v51  ;;  %6019 = vmatprep.mubr.msk.f32.mxu0 %vm6463_vm1, %v6462_v2 }
 0x9d3   : > { %6027 = vmatprep.subr.mxu0 %v6462_v2 }
 0x9d4   : > { %v3984_v62 = vpop.permute.xlu1 %3983 }
 0x9d5   : > { %6020 = vmatmul.mubr.msk.f32.vlgmr.msra.gmra.mxu0 %vm2123_vm4, %v3984_v62 }
 0x9d6   : > { %6028 = vmatpush3.xpose.msk.msra.mxu0 %vm2123_vm4, %v4152_v53  ;;  %6029 = vmatprep.mubr.msk.f32.mxu0 %vm6463_vm1, %v6462_v2 }
 0x9d7   : > { %6037 = vmatprep.subr.mxu0 %v6462_v2 }
 0x9d8   : > { %v4150_v63 = vpop.permute.xlu1 %4149 }
 0x9d9   : > { %6030 = vmatmul.mubr.msk.f32.vlgmr.msra.gmra.mxu0 %vm2123_vm4, %v4150_v63 }
 0x9da   : > { %6038 = vmatpush3.xpose.msk.msra.mxu0 %vm2123_vm4, %v4318_v55  ;;  %6039 = vmatprep.mubr.msk.f32.mxu0 %vm6463_vm1, %v6462_v2 }
 0x9db   : > { %6047 = vmatprep.subr.mxu0 %v6462_v2 }
 0x9dc   : > { %v4316_v0 = vpop.permute.xlu1 %4315 }
 0x9dd   : > { %6040 = vmatmul.mubr.msk.f32.vlgmr.msra.gmra.mxu0 %vm2123_vm4, %v4316_v0 }
 0x9de   : > { %6055 = vmatprep.mubr.msk.f32.mxu0 %vm6463_vm1, %v6462_v2 }
 0x9e0   : > { %v7171_v35 = vpop.permute.xlu1 %3409 }
 0xa78   : > { %v3226_v1 = vpop.f32.mrf.mxu1 }
 0xa79   : > { %v3230_v3 = vmul.f32 0.5, %v3226_v1 }
 0xa7a   : > { %v5971_v4 = vpop.f32.mrf.mxu1 }
 0xa7b   : > { %v3232_v5 = vsel %vm3231_vm7, %v3230_v3, -inf }
 0xa7c   : > { %v3393_v7 = vpop.f32.mrf.mxu0  ;;  %3233 = vmax.xlane.f32.xlu0 %v3232_v5 }
 0xa7d   : > { %v3397_v8 = vmul.f32 0.5, %v3393_v7 }
 0xa7e   : > { %v5981_v9 = vpop.f32.mrf.mxu0 }
 0xa7f   : > { %v3398_v10 = vsel %vm3231_vm7, %v3397_v8, -inf }
 0xa80   : > { %3399 = vmax.xlane.f32.xlu1 %v3398_v10 }
 0xa81   : > { %v3559_v11 = vpop.f32.mrf.mxu0 }
 0xa82   : > { %v3563_v12 = vmul.f32 0.5, %v3559_v11 }
 0xa83   : > { %v5991_v13 = vpop.f32.mrf.mxu0 }
 0xa84   : > { %v3564_v14 = vsel %vm3231_vm7, %v3563_v12, -inf }
 0xa85   : > { %3565 = vmax.xlane.f32.xlu0 %v3564_v14 }
 0xa89   : > { %v3725_v15 = vpop.f32.mrf.mxu0 }
 0xa8a   : > { %v3729_v16 = vmul.f32 0.5, %v3725_v15 }
 0xa8b   : > { %v6001_v17 = vpop.f32.mrf.mxu0 }
 0xa8c   : > { %v3730_v18 = vsel %vm3231_vm7, %v3729_v16, -inf }
 0xa8d   : > { %3731 = vmax.xlane.f32.xlu0 %v3730_v18 }
 0xa91   : > { %v3891_v19 = vpop.f32.mrf.mxu0 }
 0xa92   : > { %v3895_v20 = vmul.f32 0.5, %v3891_v19 }
 0xa93   : > { %v6011_v21 = vpop.f32.mrf.mxu0 }
 0xa94   : > { %v3896_v22 = vsel %vm3231_vm7, %v3895_v20, -inf }
 0xa95   : > { %3897 = vmax.xlane.f32.xlu1 %v3896_v22  ;;  %v4057_v23 = vpop.f32.mrf.mxu0 }
 0xa96   : > { %v4061_v24 = vmul.f32 0.5, %v4057_v23 }
 0xa97   : > { %v6021_v25 = vpop.f32.mrf.mxu0 }
 0xa98   : > { %v4062_v26 = vsel %vm3231_vm7, %v4061_v24, -inf }
 0xa99   : > { %v4223_v27 = vpop.f32.mrf.mxu0  ;;  %4063 = vmax.xlane.f32.xlu0 %v4062_v26 }
 0xa9a   : > { %v4227_v28 = vmul.f32 0.5, %v4223_v27 }
 0xa9b   : > { %v6031_v29 = vpop.f32.mrf.mxu0 }
 0xa9c   : > { %v4228_v30 = vsel %vm3231_vm7, %v4227_v28, -inf }
 0xa9d   : > { %4229 = vmax.xlane.f32.xlu1 %v4228_v30  ;;  %v4389_v31 = vpop.f32.mrf.mxu0 }
 0xa9e   : > { %v4393_v32 = vmul.f32 0.5, %v4389_v31 }
 0xa9f   : > { %v6041_v33 = vpop.f32.mrf.mxu0 }
 0xaa0   : > { %v4394_v6 = vsel %vm3231_vm7, %v4393_v32, -inf }
 0xaa1   : > { %4395 = vmax.xlane.f32.xlu0 %v4394_v6 }
 0xaae   : > { %3741 = vrot.lane.b32.xlu1 %v7100_v47, %s6481_s28 }
 0xab7   : > { %3575 = vrot.lane.b32.xlu0 %v7100_v47, %s6482_s7 }
 0xb05   : > { %v3234_v36 = vpop.xlane.xlu0 %3233 }
 0xb06   : > { %v3235_v37 = vsub.f32 %v3230_v3, %v3234_v36 }
 0xb08   : > { %v3236_v38 = vmul.f32 1.442695, %v3235_v37 }
 0xb09   : > { %v3400_v39 = vpop.xlane.xlu1 %3399 }
 0xb0a   : > { %6291 = vpow2.f32 %v3236_v38  ;;  %v3401_v40 = vsub.f32 %v3397_v8, %v3400_v39 }
 0xb0c   : > { %v3402_v41 = vmul.f32 1.442695, %v3401_v40 }
 0xb0e   : > { %6293 = vpow2.f32 %v3402_v41  ;;  %v3566_v42 = vpop.xlane.xlu0 %3565 }
 0xb0f   : > { %v3567_v43 = vsub.f32 %v3563_v12, %v3566_v42 }
 0xb11   : > { %v3568_v44 = vmul.f32 1.442695, %v3567_v43 }
 0xb13   : > { %6295 = vpow2.f32 %v3568_v44 }
 0xb16   : > { %v3732_v45 = vpop.xlane.xlu0 %3731 }
 0xb17   : > { %v6292_v34 = vpop.eup %6291  ;;  %v3733_v46 = vsub.f32 %v3729_v16, %v3732_v45 }
 0xb18   : > { %v3238_v48 = vsel %vm3231_vm7, %v6292_v34, 0.0 }
 0xb19   : > { %v3734_v49 = vmul.f32 1.442695, %v3733_v46  ;;  %3239 = vadd.xlane.f32.xlu1 %v3238_v48 }
 0xb1b   : > { %v7174_v50 = vpop.eup %6293  ;;  %6297 = vpow2.f32 %v3734_v49 }
 0xb1c   : > { %v3404_v51 = vsel %vm3231_vm7, %v7174_v50, 0.0 }
 0xb1d   : > { %3405 = vadd.xlane.f32.xlu0 %v3404_v51  ;;  %v4524_v51 = vld [vmem:[%s6850_s15 + $0x18] sm:$0xff] }
 0xb1e   : > { %v3898_v56 = vpop.xlane.xlu1 %3897  ;;  %6048 = vmatpush3.msra.mxu0 %v4524_v51  ;;  %v4727_v51 = vld [vmem:[%s6865_s0 + $0x18] sm:$0xff] }
 0xb1f   : > { %v3899_v57 = vsub.f32 %v3895_v20, %v3898_v56  ;;  %6049 = vmatprep.subr.mxu0 %v6462_v2  ;;  %v4521_v56 = vld [vmem:[%s6850_s15] sm:$0xff] }
 0xb20   : > { %v7178_v52 = vpop.eup %6295 }
 0xb21   : > { %v3570_v53 = vsel %vm3231_vm7, %v7178_v52, 0.0  ;;  %v3900_v60 = vmul.f32 1.442695, %v3899_v57 }
 0xb22   : > { %3571 = vadd.xlane.f32.xlu1 %v3570_v53  ;;  %v4064_v58 = vpop.xlane.xlu0 %4063  ;;  %v4523_v53 = vld [vmem:[%s6850_s15 + $0x10] sm:$0xff] }
 0xb23   : > { %v4065_v63 = vsub.f32 %v4061_v24, %v4064_v58  ;;  %6299 = vpow2.f32 %v3900_v60  ;;  %6050 = vmatpush3.msra.mxu0 %v4523_v53  ;;  %v4725_v53 = vld [vmem:[%s6865_s0 + $0x8] sm:$0xff] }
 0xb24   : > { %6051 = vmatprep.subr.mxu0 %v6462_v2 }
 0xb25   : > { %v4066_v3 = vmul.f32 1.442695, %v4065_v63 }
 0xb26   : > { %v4230_v59 = vpop.xlane.xlu1 %4229 }
 0xb27   : > { %v4231_v61 = vsub.f32 %v4227_v28, %v4230_v59 }
 0xb28   : > { %v7182_v54 = vpop.eup %6297 }
 0xb29   : > { %v3736_v55 = vsel %vm3231_vm7, %v7182_v54, 0.0  ;;  %v4232_v0 = vmul.f32 1.442695, %v4231_v61 }
 0xb2a   : > { %3737 = vadd.xlane.f32.xlu0 %v3736_v55  ;;  %v4396_v62 = vpop.xlane.xlu0 %4395  ;;  %v3742_v14 = vpop.permute.xlu1 %3741 }
 0xb2b   : > { %v4397_v1 = vsub.f32 %v4393_v32, %v4396_v62  ;;  %6301 = vpow2.f32 %v4232_v0 }
 0xb2c   : > { %6303 = vpow2.f32 %v4066_v3 }
 0xb2d   : > { %v4398_v4 = vmul.f32 1.442695, %v4397_v1 }
 0xb2e   : > { %v3576_v15 = vpop.permute.xlu0 %3575 }
 0xb2f   : > { %6305 = vpow2.f32 %v4398_v4 }
 0xb30   : > { %v6300_v5 = vpop.eup %6299 }
 0xb31   : > { %v3902_v7 = vsel %vm3231_vm7, %v6300_v5, 0.0 }
 0xb33   : > { %4073 = vrot.lane.b32.xlu1 %v7100_v47, %s6483_s18 }
 0xb38   : > { %v7189_v8 = vpop.eup %6301 }
 0xb39   : > { %v7191_v9 = vpop.eup %6303  ;;  %v4234_v10 = vsel %vm3231_vm7, %v7189_v8, 0.0 }
 0xb3a   : > { %v4068_v12 = vsel %vm3231_vm7, %v7191_v9, 0.0 }
 0xb3c   : > { %v7195_v11 = vpop.eup %6305 }
 0xb3d   : > { %v4400_v13 = vsel %vm3231_vm7, %v7195_v11, 0.0 }
 0xb40   : > { %3907 = vrot.lane.b32.xlu0 %v7100_v47, %s6484_s27 }
 0xb57   : > { %3903 = vadd.xlane.f32.xlu1 %v3902_v7 }
 0xb5b   : > { %4235 = vadd.xlane.f32.xlu1 %v4234_v10 }
 0xb5f   : > { %4069 = vadd.xlane.f32.xlu0 %v4068_v12  ;;  %4401 = vadd.xlane.f32.xlu1 %v4400_v13 }
 0xb70   : > { %4405 = vrot.lane.b32.xlu1 %v7100_v47, %s6485_s20 }
 0xb75   : > { %4239 = vrot.lane.b32.xlu0 %v7100_v47, %s6486_s11 }
 0xba2   : > { %v3240_v16 = vpop.xlane.xlu1 %3239 }
 0xba3   : > { %6307 = vrcp.f32 %v3240_v16 }
 0xba6   : > { %v3406_v17 = vpop.xlane.xlu0 %3405 }
 0xba7   : > { %6309 = vrcp.f32 %v3406_v17 }
 0xbab   : > { %v3572_v18 = vpop.xlane.xlu1 %3571 }
 0xbac   : > { %6311 = vrcp.f32 %v3572_v18 }
 0xbaf   : > { %v4074_v28 = vpop.permute.xlu1 %4073 }
 0xbb0   : > { %v6308_v19 = vpop.eup %6307 }
 0xbb1   : > { %v3242_v20 = vmul.f32 %v6308_v19, %v6292_v34  ;;  %v6327_v19 = vld [vmem:[#allocation2] sm:$0xff] }
 0xbb3   : > { %5975 = vmatmul.mubr.msk.f32.vlgmr.msra.gmra.mxu1 %vm3231_vm7, %v3242_v20  ;;  %v3738_v21 = vpop.xlane.xlu0 %3737 }
 0xbb4   : > { %v6310_v22 = vpop.eup %6309  ;;  %5983 = vmatpush3.msra.mxu1 %v7171_v35  ;;  %6313 = vrcp.f32 %v3738_v21  ;;  %5984 = vmatprep.mubr.msk.f32.mxu1 %vm6463_vm1, %v6462_v2 }
 0xbb5   : > { %5992 = vmatprep.subr.mxu1 %v6462_v2  ;;  %v3408_v47 = vmul.f32 %v6310_v22, %v7174_v50 }
 0xbb7   : > { %5985 = vmatmul.mubr.msk.f32.vlgmr.msra.gmra.mxu1 %vm3231_vm7, %v3408_v47  ;;  %v3908_v27 = vpop.permute.xlu0 %3907 }
 0xbb8   : > { %5993 = vmatpush3.msra.mxu1 %v3576_v15  ;;  %5994 = vmatprep.mubr.msk.f32.mxu1 %vm6463_vm1, %v6462_v2  ;;  %v5610_v15 = vld [vmem:[%s1659_s13] ss:$0 sm:$0xff] }
 0xbb9   : > { %v6312_v23 = vpop.eup %6311  ;;  %6002 = vmatprep.subr.mxu1 %v6462_v2 }
 0xbba   : > { %v3574_v24 = vmul.f32 %v6312_v23, %v7178_v52 }
 0xbbc   : > { %5995 = vmatmul.mubr.msk.f32.vlgmr.msra.gmra.mxu1 %vm3231_vm7, %v3574_v24 }
 0xbbd   : > { %6003 = vmatpush3.msra.mxu1 %v3742_v14  ;;  %6004 = vmatprep.mubr.msk.f32.mxu1 %vm6463_vm1, %v6462_v2 }
 0xbbe   : > { %6012 = vmatprep.subr.mxu1 %v6462_v2 }
 0xbc1   : > { %v6314_v25 = vpop.eup %6313 }
 0xbc2   : > { %v3740_v26 = vmul.f32 %v6314_v25, %v7182_v54  ;;  %v4522_v54 = vld [vmem:[%s6850_s15 + $0x8] sm:$0xff] }
 0xbc3   : > { %6052 = vmatpush3.msra.mxu0 %v4522_v54  ;;  %v4724_v54 = vld [vmem:[%s6865_s0] sm:$0xff] }
 0xbc4   : > { %6005 = vmatmul.mubr.msk.f32.vlgmr.msra.gmra.mxu1 %vm3231_vm7, %v3740_v26  ;;  %6053 = vmatprep.subr.mxu0 %v6462_v2  ;;  %v4638_v26 = vld [vmem:[%s6860_s2 + $0x18] sm:$0xff] }
 0xbc5   : > { %6013 = vmatpush3.msra.mxu1 %v3908_v27  ;;  %6014 = vmatprep.mubr.msk.f32.mxu1 %vm6463_vm1, %v6462_v2  ;;  %v4637_v27 = vld [vmem:[%s6860_s2 + $0x10] sm:$0xff] }
 0xbc6   : > { %6022 = vmatprep.subr.mxu1 %v6462_v2  ;;  %6054 = vmatpush3.msra.mxu0 %v4521_v56 }
 0xbc7   : > { %6069 = vmatprep.subr.mxu0 %v6462_v2 }
 0xbe0   : > { %v3904_v29 = vpop.xlane.xlu1 %3903 }
 0xbe1   : > { %6315 = vrcp.f32 %v3904_v29  ;;  %v4635_v29 = vld [vmem:[%s6860_s2] sm:$0xff] }
 0xbe4   : > { %v4236_v30 = vpop.xlane.xlu1 %4235 }
 0xbe8   : > { %v4070_v31 = vpop.xlane.xlu0 %4069  ;;  %v4402_v32 = vpop.xlane.xlu1 %4401 }
 0xbe9   : > { %6317 = vrcp.f32 %v4070_v31  ;;  %v4738_v31 = vld [vmem:[%s6865_s0 + $0x70] sm:$0xff] }
 0xbea   : > { %6319 = vrcp.f32 %v4236_v30  ;;  %v4739_v30 = vld [vmem:[%s6865_s0 + $0x78] sm:$0xff] }
 0xbeb   : > { %6321 = vrcp.f32 %v4402_v32  ;;  %v4737_v32 = vld [vmem:[%s6865_s0 + $0x68] sm:$0xff] }
 0xbec   : > { %v4240_v38 = vpop.permute.xlu0 %4239  ;;  %v4406_v41 = vpop.permute.xlu1 %4405 }
 0xbee   : > { %v6316_v33 = vpop.eup %6315 }
 0xbef   : > { %v3906_v6 = vmul.f32 %v6316_v33, %v6300_v5  ;;  %v4736_v33 = vld [vmem:[%s6865_s0 + $0x60] sm:$0xff] }
 0xbf1   : > { %6015 = vmatmul.mubr.msk.f32.vlgmr.msra.gmra.mxu1 %vm3231_vm7, %v3906_v6 }
 0xbf2   : > { %6023 = vmatpush3.msra.mxu1 %v4074_v28  ;;  %6024 = vmatprep.mubr.msk.f32.mxu1 %vm6463_vm1, %v6462_v2  ;;  %v4636_v28 = vld [vmem:[%s6860_s2 + $0x8] sm:$0xff] }
 0xbf3   : > { %6032 = vmatprep.subr.mxu1 %v6462_v2 }
 0xbf6   : > { %v6318_v35 = vpop.eup %6317 }
 0xbf7   : > { %v4072_v36 = vmul.f32 %v6318_v35, %v7191_v9  ;;  %v6320_v37 = vpop.eup %6319 }
 0xbf8   : > { %v4238_v39 = vmul.f32 %v6320_v37, %v7189_v8  ;;  %v6322_v40 = vpop.eup %6321 }
 0xbf9   : > { %6025 = vmatmul.mubr.msk.f32.vlgmr.msra.gmra.mxu1 %vm3231_vm7, %v4072_v36  ;;  %v4404_v42 = vmul.f32 %v6322_v40, %v7195_v11  ;;  %v5613_v40 = vld [vmem:[%s1665_s5] ss:$0 sm:$0xff] }
 0xbfa   : > { %6033 = vmatpush3.msra.mxu1 %v4240_v38  ;;  %6034 = vmatprep.mubr.msk.f32.mxu1 %vm6463_vm1, %v6462_v2  ;;  %v5612_v38 = vld [vmem:[%s1662_s3] ss:$0 sm:$0xff] }
 0xbfb   : > { %6042 = vmatprep.subr.mxu1 %v6462_v2 }
 0xbfd   : > { %6035 = vmatmul.mubr.msk.f32.vlgmr.msra.gmra.mxu1 %vm3231_vm7, %v4238_v39 }
 0xbfe   : > { %6043 = vmatpush3.msra.mxu1 %v4406_v41  ;;  %6044 = vmatprep.mubr.msk.f32.mxu1 %vm6463_vm1, %v6462_v2 }
 0xbff   : > { %6058 = vmatprep.subr.mxu1 %v6462_v2 }
 0xc01   : > { %6045 = vmatmul.mubr.msk.f32.vlgmr.msra.gmra.mxu1 %vm3231_vm7, %v4404_v42 }
 0xc02   : > { %6066 = vmatprep.mubr.msk.f32.mxu1 %vm6463_vm1, %v6462_v2  ;;  %6059 = vmatpush3.msra.mxu1 %v4638_v26 }
 0xc03   : > { %6060 = vmatprep.subr.mxu1 %v6462_v2 }
 0xc04   : > { %6061 = vmatpush3.msra.mxu1 %v4637_v27 }
 0xc05   : > { %6062 = vmatprep.subr.mxu1 %v6462_v2 }
 0xc06   : > { %6063 = vmatpush3.msra.mxu1 %v4636_v28 }
 0xc07   : > { %6064 = vmatprep.subr.mxu1 %v6462_v2 }
 0xc08   : > { %6065 = vmatpush3.msra.mxu1 %v4635_v29 }
 0xc73   : > { %v3315_v43 = vpop.f32.mrf.mxu1 }
 0xc75   : > { %v5976_v44 = vpop.f32.mrf.mxu1 }
 0xc76   : > { %v4734_v44 = vld [vmem:[%s6865_s0 + $0x50] sm:$0xff] }
 0xc77   : > { %v3481_v45 = vpop.f32.mrf.mxu1 }
 0xc78   : > { %4482 = vrot.lane.b32.xlu0 %v3481_v45, %s6487_s12  ;;  %v4733_v45 = vld [vmem:[%s6865_s0 + $0x48] sm:$0xff] }
 0xc79   : > { %v5986_v34 = vpop.f32.mrf.mxu1 }
 0xc7a   : > { %v4732_v34 = vld [vmem:[%s6865_s0 + $0x40] sm:$0xff] }
 0xc7c   : > { %v3647_v46 = vpop.f32.mrf.mxu1 }
 0xc7d   : > { %4486 = vrot.lane.b32.xlu1 %v3647_v46, %s6488_s25  ;;  %v4731_v46 = vld [vmem:[%s6865_s0 + $0x38] sm:$0xff] }
 0xc7e   : > { %v5996_v48 = vpop.f32.mrf.mxu1 }
 0xc7f   : > { %v4730_v48 = vld [vmem:[%s6865_s0 + $0x30] sm:$0xff] }
 0xc84   : > { %v3813_v49 = vpop.f32.mrf.mxu1 }
 0xc85   : > { %4490 = vrot.lane.b32.xlu0 %v3813_v49, %s6489_s9  ;;  %v4729_v49 = vld [vmem:[%s6865_s0 + $0x28] sm:$0xff] }
 0xc86   : > { %v6006_v50 = vpop.f32.mrf.mxu1 }
 0xc87   : > { %v4728_v50 = vld [vmem:[%s6865_s0 + $0x20] sm:$0xff] }
 0xcb1   : > { %v3979_v52 = vpop.f32.mrf.mxu1 }
 0xcb2   : > { %4494 = vrot.lane.b32.xlu1 %v3979_v52, %s6490_s19  ;;  %v4726_v52 = vld [vmem:[%s6865_s0 + $0x10] sm:$0xff] }
 0xcb3   : > { %v6016_v55 = vpop.f32.mrf.mxu1 }
 0xcb4   : > { %v5614_v55 = vld [vmem:[%s1673_s30] ss:$0 sm:$0xff]  ;;  %s7545_s30 = sld [smem:[#allocation49_spill]] }
 0xcb9   : > { %v4145_v57 = vpop.f32.mrf.mxu1 }
 0xcba   : > { %4498 = vrot.lane.b32.xlu0 %v4145_v57, %s6491_s17  ;;  %p5617_p1 = scmp.ne.s32.totalorder %s7545_s30, 1 }
 0xcbb   : > { %v6026_v58 = vpop.f32.mrf.mxu1 }
 0xcbd   : > { %v4311_v59 = vpop.f32.mrf.mxu1 }
 0xcbe   : > { %4502 = vrot.lane.b32.xlu1 %v4311_v59, %s6492_s21 }
 0xcbf   : > { %v6036_v60 = vpop.f32.mrf.mxu1 }
 0xcc1   : > { %v4477_v61 = vpop.f32.mrf.mxu1 }
 0xcc2   : > { %4506 = vrot.lane.b32.xlu0 %v4477_v61, %s6493_s29 }
 0xcc3   : > { %v6046_v62 = vpop.f32.mrf.mxu1 }
 0xcea   : > { %v4483_v63 = vpop.permute.xlu0 %4482 }
 0xceb   : > { %v4509_v4 = vsel %vm2123_vm4, %v3315_v43, %v4483_v63  ;;  %v4735_v43 = vld [vmem:[%s6865_s0 + $0x58] sm:$0xff] }
 0xcef   : > { %v4487_v0 = vpop.permute.xlu1 %4486 }
 0xcf0   : > { %v4510_v5 = vsel %vm3231_vm7, %v4509_v4, %v4487_v0 }
 0xcf7   : > { %v4491_v1 = vpop.permute.xlu0 %4490 }
 0xcf8   : > { %v4512_v8 = vsel %vm4511_vm8, %v4510_v5, %v4491_v1  ;;  %v5616_v1 = vld [vmem:[%s1681_s16] ss:$0 sm:$0xff] }
 0xd24   : > { %v4495_v3 = vpop.permute.xlu1 %4494 }
 0xd25   : > { %v4514_v10 = vsel %vm4513_vm9, %v4512_v8, %v4495_v3 }
 0xd2c   : > { %v4499_v7 = vpop.permute.xlu0 %4498 }
 0xd2d   : > { %v4516_v11 = vsel %vm4515_vm10, %v4514_v10, %v4499_v7 }
 0xd30   : > { %v4503_v9 = vpop.permute.xlu1 %4502 }
 0xd31   : > { %v4518_v12 = vsel %vm4517_vm11, %v4516_v11, %v4503_v9 }
 0xd34   : > { %v4507_v13 = vpop.permute.xlu0 %4506 }
 0xd35   : > { %v4520_v14 = vsel %vm4519_vm12, %v4518_v12, %v4507_v13 }
 0xd36   : > { %6056 = vmatmul.mubr.msk.f32.vlgmr.msra.gmra.mxu0 %vm1697_vm2, %v4520_v14 }
 0xd37   : > { %6101 = vmatprep.mubr.msk.f32.mxu0 %vm6463_vm1, %v6462_v2  ;;  %6070 = vmatpush3.msra.mxu0 %v4739_v30 }
 0xd38   : > { %6071 = vmatprep.subr.mxu0 %v6462_v2 }
 0xd39   : > { %6072 = vmatpush3.msra.mxu0 %v4738_v31 }
 0xd3a   : > { %6073 = vmatprep.subr.mxu0 %v6462_v2 }
 0xd3b   : > { %6074 = vmatpush3.msra.mxu0 %v4737_v32 }
 0xd3c   : > { %6075 = vmatprep.subr.mxu0 %v6462_v2 }
 0xd3d   : > { %6076 = vmatpush3.msra.mxu0 %v4736_v33 }
 0xd3e   : > { %6077 = vmatprep.subr.mxu0 %v6462_v2 }
 0xd3f   : > { %6078 = vmatpush3.msra.mxu0 %v4735_v43 }
 0xd40   : > { %6079 = vmatprep.subr.mxu0 %v6462_v2 }
 0xd41   : > { %6080 = vmatpush3.msra.mxu0 %v4734_v44 }
 0xd42   : > { %6081 = vmatprep.subr.mxu0 %v6462_v2 }
 0xd43   : > { %6082 = vmatpush3.msra.mxu0 %v4733_v45 }
 0xd44   : > { %6083 = vmatprep.subr.mxu0 %v6462_v2 }
 0xd45   : > { %6084 = vmatpush3.msra.mxu0 %v4732_v34 }
 0xd46   : > { %6085 = vmatprep.subr.mxu0 %v6462_v2 }
 0xd47   : > { %6086 = vmatpush3.msra.mxu0 %v4731_v46 }
 0xd48   : > { %6087 = vmatprep.subr.mxu0 %v6462_v2 }
 0xd49   : > { %6088 = vmatpush3.msra.mxu0 %v4730_v48 }
 0xd4a   : > { %6089 = vmatprep.subr.mxu0 %v6462_v2 }
 0xd4b   : > { %6090 = vmatpush3.msra.mxu0 %v4729_v49 }
 0xd4c   : > { %6091 = vmatprep.subr.mxu0 %v6462_v2 }
 0xd4d   : > { %6092 = vmatpush3.msra.mxu0 %v4728_v50 }
 0xd4e   : > { %6093 = vmatprep.subr.mxu0 %v6462_v2 }
 0xd4f   : > { %6094 = vmatpush3.msra.mxu0 %v4727_v51 }
 0xd50   : > { %6095 = vmatprep.subr.mxu0 %v6462_v2 }
 0xd51   : > { %6096 = vmatpush3.msra.mxu0 %v4726_v52 }
 0xd52   : > { %6097 = vmatprep.subr.mxu0 %v6462_v2 }
 0xd53   : > { %6098 = vmatpush3.msra.mxu0 %v4725_v53 }
 0xd54   : > { %6099 = vmatprep.subr.mxu0 %v6462_v2 }
 0xd55   : > { %6100 = vmatpush3.msra.mxu0 %v4724_v54 }
 0xdf6   : > { %v4601_v16 = vpop.f32.mrf.mxu0 }
 0xdf7   : > { %v4602_v17 = vadd.f32 %v5610_v15, %v4601_v16 }
 0xdf8   : > { %v6057_v18 = vpop.f32.mrf.mxu0 }
 0xdf9   : > { %v7257_v20 = vadd.f32 %v6327_v19, %v4602_v17 }
 0xdfb   : > { %v4608_v21 = vsel %vm1697_vm2, %v7257_v20, 0.0 }
 0xdfc   : > { %4609 = vadd.xlane.f32.xlu1 %v4608_v21 }
 0xe85   : > { %v4610_v22 = vpop.xlane.xlu1 %4609 }
 0xe86   : > { %v4611_v47 = vmul.f32 0.03125, %v4610_v22 }
 0xe88   : > { %v4612_v23 = vsub.f32 %v7257_v20, %v4611_v47 }
 0xe8a   : > { %v4613_v24 = vmul.f32 %v4612_v23, %v4612_v23 }
 0xe8c   : > { %v4614_v25 = vsel %vm1697_vm2, %v4613_v24, 0.0 }
 0xe8d   : > { %4615 = vadd.xlane.f32.xlu0 %v4614_v25 }
 0xf16   : > { %v4616_v6 = vpop.xlane.xlu0 %4615 }
 0xf17   : > { %v4617_v35 = vmul.f32 0.03125, %v4616_v6 }
 0xf19   : > { %v4618_v36 = vadd.f32 1e-05, %v4617_v35 }
 0xf1b   : > { %6323 = vrsqrt.f32 %v4618_v36 }
 0xf28   : > { %v6324_v37 = vpop.eup %6323 }
 0xf29   : > { %v4620_v39 = vmul.f32 %v6324_v37, %v4612_v23 }
 0xf2b   : > { %v4627_v41 = vmul.f32 %v5612_v38, %v4620_v39 }
 0xf2d   : > { %v4634_v42 = vadd.f32 %v5613_v40, %v4627_v41 }
 0xf2f   : > { %6067 = vmatmul.mubr.msk.f32.vlgmr.msra.gmra.mxu1 %vm1697_vm2, %v4634_v42 }
 0xfef   : > { %v4715_v56 = vpop.f32.mrf.mxu1 }
 0xff0   : > { %v4716_v57 = vadd.f32 %v5614_v55, %v4715_v56 }
 0xff1   : > { %v6068_v58 = vpop.f32.mrf.mxu1 }
 0xff2   : > { %v4720_v59 = vmul.f32 0.70710677, %v4716_v57  ;;  %v4719_v61 = vmul.f32 0.5, %v4716_v57 }
 0xff4   : > { %6325 = verf.f32 %v4720_v59 }
0x1001   : > { %v6326_v60 = vpop.eup %6325 }
0x1002   : > { %v4722_v62 = vadd.f32 1.0, %v6326_v60 }
0x1004   : > { %v4723_v63 = vmul.f32 %v4722_v62, %v4719_v61 }
0x1006   : > { %6102 = vmatmul.mubr.f32.vlgmr.msra.gmra.mxu0 %v4723_v63 }
0x10c6   : > { %v4806_v0 = vpop.f32.mrf.mxu0 }
0x10c7   : > { %v4810_v3 = vadd.f32 %v4806_v0, %v7257_v20  ;;  %4823 = sbr.rel (%p5617_p1) target bundleno = 4301 (0x10cd), region = 180 }
0x10c8   : > { %v6103_v4 = vpop.f32.mrf.mxu0 }
0x10c9   : > { %v4818_v2 = vadd.f32 %v5616_v1, %v4810_v3 }
0x10cb   : > { %4819 = vst.msk [vmem:[#allocation2] sm:$0xff] %vm1697_vm2, %v4818_v2 }
0x10cc   : > { %4824 = vst.msk [vmem:[#allocation3] sm:$0xff] %vm1697_vm2, %v4818_v2 }
0x10cd PF: > { %s7546_s0 = sld [smem:[#allocation49_spill]] }
0x10d3   : > { %p5618_p2 = scmp.ne.s32.totalorder %s7546_s0, 3 }
0x10d4   : > { %s7547_s2 = sld [smem:[#allocation41_spill]] (!%p5618_p2) }
0x10d5   : > { %4828 = sbr.rel (%p5618_p2) target bundleno = 4737 (0x1281), region = 184  ;;  %s7548_s23 = sld [smem:[#allocation40_spill]] (!%p5618_p2) }
0x10d6   : > { %s7550_s10 = sld [smem:[#allocation43_spill]] (!%p5618_p2) }
0x10d7   : > { %s7551_s16 = sld [smem:[#allocation42_spill]] (!%p5618_p2) }
0x10d8   : > { %s7552_s24 = sld [smem:[#allocation44_spill]] (!%p5618_p2) }
0x10da   : > { %v4837_v5 = vld [vmem:[%s7547_s2 + $0x18] sm:$0xff]  ;;  %v6494_v8 = vmov 0.0   ;;  %v4836_v9 = vld [vmem:[%s7547_s2 + $0x10] sm:$0xff]  ;;  %v4835_v11 = vld [vmem:[%s7547_s2 + $0x8] sm:$0xff]  ;;  %vm6495_vm13 = vmmov 0  }
0x10db   : > { %s7549_s14 = smov %s7548_s23  ;;  %v4833_v7 = vld [vmem:[%s7548_s23 + $0x18] sm:$0xff]  ;;  %6104 = vmatprep.subr.mxu0 %v6494_v8  ;;  %6115 = vmatprep.subr.mxu1 %v6494_v8  ;;  %v4834_v13 = vld [vmem:[%s7547_s2] sm:$0xff]  ;;  %v4829_v15 = vld [vmem:[#allocation3] sm:$0xff] }
0x10dc   : > { %v4832_v10 = vld [vmem:[%s7549_s14 + $0x10] sm:$0xff]  ;;  %6105 = vmatpush3.msra.mxu0 %v4837_v5  ;;  %6116 = vmatpush3.msra.mxu1 %v4833_v7  ;;  %v4831_v12 = vld [vmem:[%s7549_s14 + $0x8] sm:$0xff]  ;;  %v4830_v14 = vld [vmem:[%s7549_s14] sm:$0xff] }
0x10dd   : > { %6106 = vmatprep.subr.mxu0 %v6494_v8  ;;  %6117 = vmatprep.subr.mxu1 %v6494_v8  ;;  %v5000_v16 = vld [vmem:[%s7550_s10 + $0x18] sm:$0xff]  ;;  %v4999_v17 = vld [vmem:[%s7550_s10 + $0x10] sm:$0xff]  ;;  %v4998_v18 = vld [vmem:[%s7550_s10 + $0x8] sm:$0xff] }
0x10de   : > { %6107 = vmatpush3.msra.mxu0 %v4836_v9  ;;  %6118 = vmatpush3.msra.mxu1 %v4832_v10  ;;  %v4997_v19 = vld [vmem:[%s7550_s10] sm:$0xff] }
0x10df   : > { %6108 = vmatprep.subr.mxu0 %v6494_v8  ;;  %6119 = vmatprep.subr.mxu1 %v6494_v8  ;;  %v5621_v22 = vld [vmem:[%s7551_s16] ss:$0 sm:$0xff] }
0x10e0   : > { %6109 = vmatpush3.msra.mxu0 %v4835_v11  ;;  %6120 = vmatpush3.msra.mxu1 %v4831_v12  ;;  %v5622_v31 = vld [vmem:[%s7552_s24] ss:$0 sm:$0xff] }
0x10e1   : > { %6110 = vmatprep.subr.mxu0 %v6494_v8  ;;  %6121 = vmatprep.subr.mxu1 %v6494_v8 }
0x10e2   : > { %6111 = vmatpush3.msra.mxu0 %v4834_v13  ;;  %6112 = vmatprep.mubr.msk.f32.mxu0 %vm6495_vm13, %v6494_v8 }
0x10e3   : > { %6122 = vmatpush3.msra.mxu1 %v4830_v14  ;;  %6123 = vmatprep.mubr.msk.f32.mxu1 %vm6495_vm13, %v6494_v8 }
0x10e4   : > { %6113 = vmatmul.mubr.msk.f32.vlgmr.msra.gmra.mxu0 %vm1697_vm2, %v4818_v2  ;;  %6124 = vmatmul.mubr.msk.f32.vlgmr.msra.gmra.mxu1 %vm1697_vm2, %v4829_v15 }
0x10e5   : > { %6126 = vmatprep.subr.mxu0 %v6494_v8  ;;  %6134 = vmatprep.mubr.msk.f32.mxu0 %vm6495_vm13, %v6494_v8 }
0x10e6   : > { %6127 = vmatpush3.msra.mxu0 %v5000_v16 }
0x10e7   : > { %6128 = vmatprep.subr.mxu0 %v6494_v8 }
0x10e8   : > { %6129 = vmatpush3.msra.mxu0 %v4999_v17 }
0x10e9   : > { %6130 = vmatprep.subr.mxu0 %v6494_v8 }
0x10ea   : > { %6131 = vmatpush3.msra.mxu0 %v4998_v18 }
0x10eb   : > { %6132 = vmatprep.subr.mxu0 %v6494_v8 }
0x10ec   : > { %6133 = vmatpush3.msra.mxu0 %v4997_v19 }
0x11a4   : > { %v4907_v20 = vpop.f32.mrf.mxu0  ;;  %v4980_v21 = vpop.f32.mrf.mxu1 }
0x11a5   : > { %v4981_v47 = vadd.f32 %v4980_v21, %v4907_v20 }
0x11a6   : > { %v6114_v23 = vpop.f32.mrf.mxu0  ;;  %v6125_v24 = vpop.f32.mrf.mxu1 }
0x11a7   : > { %v4991_v25 = vadd.f32 %v5621_v22, %v4981_v47 }
0x11a9   : > { %v4993_v26 = vmul.f32 0.70710677, %v4991_v25  ;;  %v4992_v28 = vmul.f32 0.5, %v4991_v25 }
0x11ab   : > { %6328 = verf.f32 %v4993_v26 }
0x11b8   : > { %v6329_v27 = vpop.eup %6328 }
0x11b9   : > { %v4995_v29 = vadd.f32 1.0, %v6329_v27 }
0x11bb   : > { %v4996_v30 = vmul.f32 %v4995_v29, %v4992_v28 }
0x11bd   : > { %6135 = vmatmul.mubr.msk.f32.vlgmr.msra.gmra.mxu0 %vm1697_vm2, %v4996_v30 }
0x127d   : > { %v5077_v32 = vpop.f32.mrf.mxu0 }
0x127e   : > { %v5078_v33 = vadd.f32 %v5622_v31, %v5077_v32 }
0x127f   : > { %v6136_v6 = vpop.f32.mrf.mxu0 }
0x1280   : > { %5081 = vst.msk [vmem:[%s1555_s4] sm:$0xff] %vm1697_vm2, %v5078_v33 }
0x1281 PF: > { %s7554_s22 = sld [smem:[#allocation50_spill]]  ;;  %s5096_s11 = sshll.u32 %s1555_s4, 4  ;;  %s5097_s11 = int_to_ptr.vmem [resolvable:$true] %s5096_s11 }
0x1282   : > { %s7555_s26 = sld [smem:[#allocation45_spill]]  ;;  %s6330_s9 = scalar_lea.vmem %s5097_s11, 128 }
0x1283   : > { %s7558_s28 = sld [smem:[#allocation47_spill]]  ;;  %p6331_p4 = scmp.ne.s32.totalorder %s5097_s11, %s6330_s9 }
0x1284   : > { %s6496_s19 = smov [#allocation4]  }
0x1285   : > { %p6332_p5 = pnand %p6331_p4, %p6746_p3  ;;  %s6334_s17 = sshll.u32 %s6496_s19, 4  ;;  %s6335_s17 = int_to_ptr.vmem [resolvable:$false] %s6334_s17 }
0x1286   : > { %s6336_s21 = scalar_lea.vmem %s6335_s17, 256  ;;  %p6337_p7 = scmp.lt.s32.totalorder %s5097_s11, %s6335_s17 }
0x1287   : > { %s5625_s27 = sshll.u32 %s7554_s22, 7  ;;  %p6333_p6 = pneg %p6332_p5 }
0x1288   : > { %s7556_s7 = smov %s7555_s26  ;;  %s5094_s20 = scalar_lea.hbm %s7555_s26, %s5625_s27 }
0x1289   : > { %s7560_s12 = sand.u32 1, %s7558_s28   ;;  %p6338_p8 = scmp.lt.s32.totalorder %s6336_s21, %s6330_s9 }
0x128a   : > { %s5083_s25 = scalar_lea.sflag [#allocation5], %s7560_s12 }
0x128b   : > { %p6339_p10 = por %p6338_p8, %p6337_p7 }
0x128d   : > { %p6340_p11 = pnand %p6339_p10, %p6333_p6 }
0x128f   : > { %6343 = shalt.err (!%p6340_p11)
}
0x1290   : > { %s6344_s29 = scalar_lea.hbm %s5094_s20, 128  ;;  %s6348_s4 = scalar_lea.hbm %s7556_s7, 256 }
0x1291   : > { %p6345_p12 = scmp.ne.s32.totalorder %s5094_s20, %s6344_s29  ;;  %p6349_p1 = scmp.lt.s32.totalorder %s5094_s20, %s7556_s7 }
0x1292   : > { %p6350_p2 = scmp.lt.s32.totalorder %s6348_s4, %s6344_s29 }
0x1293   : > { %p6346_p13 = pnand %p6345_p12, %p6746_p3 }
0x1294   : > { %p6351_p4 = por %p6350_p2, %p6349_p1 }
0x1295   : > { %p6347_p0 = pneg %p6346_p13 }
0x1297   : > { %p6352_p5 = pnand %p6351_p4, %p6347_p0 }
0x1299   : > { %6355 = shalt.err (!%p6352_p5)
}
0x129a   : > { %6138 = dma.vmem_to_hbm [thread:$0]  (%p6746_p3), %s5097_s11, 128, %s5094_s20, %s5083_s25  }
0x129b PF: > { %s7561_s15 = sld [smem:[#allocation53_spill]] }
0x129c   : > { %s7562_s13 = sld [smem:[#allocation46_spill]] }
0x12a1   : > { %p6144_p6 = scmp.ge.s32.totalorder %s7561_s15, 2 }
0x12a2   : > { %s5108_s3 = sand.u32 1, %s7562_s13  }
0x12a3   : > { %p6141_p7 = pnand %p6144_p6, %p6756_p9  ;;  %s5109_s5 = scalar_lea.sflag [#allocation5], %s5108_s3 }
0x12a5   : > { %p6142_p8 = pneg %p6141_p7 }
0x12a7   : > { %6389 = dma.done.wait (%p6142_p8), %s5109_s5, 128  }
0x12a8   : > { %6391 = vsyncadd (%p6142_p8), %s5109_s5, 4294967168  ;;  %s90_s1 = sadd.s32 1, %s7561_s15   ;;  %s7564_s15 = sld [smem:[#allocation47_spill]] }
0x12a9   : > { %p87_p10 = scmp.ge.s32.totalorder %s90_s1, 10   ;;  %s7565_s16 = sld [smem:[#allocation48_spill]] }
0x12aa   : > { %s7566_s18 = sld [smem:[#allocation58_spill]] }
0x12ab   : > { %s7567_s22 = sld [smem:[#allocation51_spill]]  ;;  %89 = sbr.rel (!%p87_p10) target bundleno = 99 (0x63), region = 350 }
0x12ac   : > { %s7568_s23 = sld [smem:[#allocation52_spill]] }
0x12ad   : > { %s7569_s26 = sld [smem:[#allocation54_spill]] }
0x12ae   : > { %s7570_s28 = sld [smem:[#allocation56_spill]] }
0x12b0   :  { %5114 = vsyncpa [#allocation5], 1 }
0x12b1   :  { %5116 = vsyncpa [#allocation5 + $0x1], 1 }

</bundles_post_ra>
